<compile_context>
chip_gen: v5e
topology: v5e:2x2
jax: 0.10.0
libtpu: 0.0.40
codegen_flags: <defaults>
</compile_context>

<pallas_src>
import functools

import jax
import jax.numpy as jnp
from jax.experimental import pallas as pl
from jax.experimental.pallas import tpu as pltpu

LANE = 128


def _round_up(x, m):
    return (x + m - 1) // m * m


# ---------------------------------------------------------------------------
# Fused kernel: conv3x3 + (folded BN) + ReLU  ->  conv3x3 + (folded BN) + ReLU
# ---------------------------------------------------------------------------
def _conv_block_kernel(xp_ref, w1_ref, b1_ref, w2_ref, b2_ref, o_ref, mid_ref,
                       *, H, W, Cin, CP):
    # xp_ref : (1, H+2, W+2, Cin)  bf16  spatially zero-padded input image
    # w1_ref : (9, Cin, CP)        bf16  conv1 weight per 3x3 tap, BN1 scale folded, Cout->CP pad
    # b1_ref : (1, CP)             f32   folded conv1 bias + BN1 offset
    # w2_ref : (9, CP, CP)         bf16  conv2 weight per tap, BN2 scale folded
    # b2_ref : (1, CP)             f32
    # o_ref  : (1, H, W, CP)       f32
    # mid_ref: (H+2, W+16, CP)     f32   VMEM scratch: conv1 output with zero halo
    taps = [(dy, dx) for dy in range(3) for dx in range(3)]

    # ---- conv1: 9 shifted bf16 MXU matmuls, f32 accumulation ----
    x = xp_ref[0]                                           # (H+2, W+2, Cin) bf16
    acc = jnp.zeros((H * W, CP), jnp.float32)
    for k, (dy, dx) in enumerate(taps):
        patch = x[dy:dy + H, dx:dx + W, :].reshape(H * W, Cin)
        acc = acc + jnp.dot(patch, w1_ref[k], preferred_element_type=jnp.float32)
    y1 = jnp.maximum(acc + b1_ref[...], 0.0)                # BN1 scale already in w1; bias + ReLU

    # Dropout2d: identity in eval mode.
    # TODO(synk): training-mode Dropout2d would mask whole channels here via pltpu.prng_random_bits.

    # ---- stage conv1 output in VMEM with a zero halo (interior stored sublane-aligned at col 8) ----
    mid_ref[...] = jnp.zeros_like(mid_ref)
    mid_ref[pl.ds(1, H), pl.ds(8, W), :] = y1.reshape(H, W, CP)

    # ---- conv2: 9 shifted bf16 MXU matmuls over the staged (never-in-HBM) activation ----
    m = mid_ref[...]                                        # (H+2, W+16, CP) f32
    acc = jnp.zeros((H * W, CP), jnp.float32)
    for k, (dy, dx) in enumerate(taps):
        patch = m[dy:dy + H, dx + 7:dx + 7 + W, :].reshape(H * W, CP).astype(jnp.bfloat16)
        acc = acc + jnp.dot(patch, w2_ref[k], preferred_element_type=jnp.float32)
    y2 = jnp.maximum(acc + b2_ref[...], 0.0)

    o_ref[...] = y2.reshape(1, H, W, CP).astype(o_ref.dtype)


def conv_block_forward(x_nchw, params):
    N, Cin, H, W = x_nchw.shape
    CP = params["w1"].shape[-1]

    # NCHW -> NHWC, spatial zero halo of 1, bf16 (halves HBM input traffic).
    x = jnp.transpose(x_nchw, (0, 2, 3, 1))
    xp = jnp.pad(x, ((0, 0), (1, 1), (1, 1), (0, 0))).astype(jnp.bfloat16)

    kernel = functools.partial(_conv_block_kernel, H=H, W=W, Cin=Cin, CP=CP)
    out = pl.pallas_call(
        kernel,
        out_shape=jax.ShapeDtypeStruct((N, H, W, CP), jnp.float32),
        grid_spec=pltpu.PrefetchScalarGridSpec(
            num_scalar_prefetch=0,
            grid=(N,),
            in_specs=[
                pl.BlockSpec((1, H + 2, W + 2, Cin), lambda n: (n, 0, 0, 0)),
                pl.BlockSpec((9, Cin, CP), lambda n: (0, 0, 0)),
                pl.BlockSpec((1, CP), lambda n: (0, 0)),
                pl.BlockSpec((9, CP, CP), lambda n: (0, 0, 0)),
                pl.BlockSpec((1, CP), lambda n: (0, 0)),
            ],
            out_specs=pl.BlockSpec((1, H, W, CP), lambda n: (n, 0, 0, 0)),
            scratch_shapes=[pltpu.VMEM((H + 2, W + 16, CP), jnp.float32)],
        ),
        compiler_params=pltpu.CompilerParams(
            dimension_semantics=("parallel",),
            vmem_limit_bytes=48 * 1024 * 1024,
        ),
    )(xp, params["w1"], params["b1"], params["w2"], params["b2"])

    out = out[..., : params["cout"]]            # drop channel padding
    return jnp.transpose(out, (0, 3, 1, 2))     # NHWC -> NCHW


# ---------------------------------------------------------------------------
# Parameter construction (PyTorch-style init) with BN folding + padding
# ---------------------------------------------------------------------------
def make_params(key, in_feat, out_feat, eps=1e-5):
    ks = jax.random.split(key, 10)

    def conv_w(k, cin, cout):
        bound = 1.0 / jnp.sqrt(cin * 9.0)
        return jax.random.uniform(k, (cout, cin, 3, 3), jnp.float32, -bound, bound)

    def conv_b(k, cin, cout):
        bound = 1.0 / jnp.sqrt(cin * 9.0)
        return jax.random.uniform(k, (cout,), jnp.float32, -bound, bound)

    w1 = conv_w(ks[0], in_feat, out_feat)
    b1 = conv_b(ks[1], in_feat, out_feat)
    g1 = 1.0 + 0.1 * jax.random.normal(ks[2], (out_feat,), jnp.float32)
    be1 = 0.1 * jax.random.normal(ks[3], (out_feat,), jnp.float32)
    rm1 = 0.05 * jax.random.normal(ks[4], (out_feat,), jnp.float32)
    rv1 = 1.0 + 0.1 * jax.random.uniform(ks[5], (out_feat,), jnp.float32)
    w2 = conv_w(ks[6], out_feat, out_feat)
    b2 = conv_b(ks[7], out_feat, out_feat)
    g2 = 1.0 + 0.1 * jax.random.normal(ks[8], (out_feat,), jnp.float32)
    be2 = 0.1 * jax.random.normal(ks[9], (out_feat,), jnp.float32)
    rm2 = jnp.zeros((out_feat,), jnp.float32)
    rv2 = jnp.ones((out_feat,), jnp.float32)

    CP = _round_up(out_feat, LANE)

    def prep(w, b, g, be, rm, rv, cin_pad):
        cout, cin = w.shape[0], w.shape[1]
        scale = g / jnp.sqrt(rv + eps)                                   # (Cout,)
        # torch (Cout, Cin, 3, 3) -> (kh, kw, Cin, Cout) -> (9, Cin, Cout); fold BN scale in.
        wk = jnp.transpose(w, (2, 3, 1, 0)).reshape(9, cin, cout) * scale[None, None, :]
        bias = (b - rm) * scale + be
        wk = jnp.pad(wk, ((0, 0), (0, cin_pad - cin), (0, CP - cout)))
        bias = jnp.pad(bias, (0, CP - cout))
        return wk.astype(jnp.bfloat16), bias.reshape(1, CP).astype(jnp.float32)

    w1k, b1k = prep(w1, b1, g1, be1, rm1, rv1, cin_pad=in_feat)  # conv1: input channels unpadded
    w2k, b2k = prep(w2, b2, g2, be2, rm2, rv2, cin_pad=CP)       # conv2: input channels padded to CP

    return {
        "w1": w1k, "b1": b1k, "w2": w2k, "b2": b2k, "cout": out_feat,
        "raw": dict(w1=w1, b1=b1, g1=g1, be1=be1, rm1=rm1, rv1=rv1,
                    w2=w2, b2=b2, g2=g2, be2=be2, rm2=rm2, rv2=rv2),
    }


# ---------------------------------------------------------------------------
# Pure-JAX f32 reference (NCHW, mirrors PyTorch eval-mode semantics)
# ---------------------------------------------------------------------------
def reference_forward(x_nchw, raw, eps=1e-5):
    def conv_bn_relu_ref(x, w, b, g, be, rm, rv):
        y = jax.lax.conv_general_dilated(
            x, w, window_strides=(1, 1), padding=((1, 1), (1, 1)),
            dimension_numbers=("NCHW", "OIHW", "NCHW"))
        y = y + b[None, :, None, None]
        y = (y - rm[None, :, None, None]) / jnp.sqrt(rv[None, :, None, None] + eps)
        y = y * g[None, :, None, None] + be[None, :, None, None]
        return jnp.maximum(y, 0.0)

    y = conv_bn_relu_ref(x_nchw, raw["w1"], raw["b1"], raw["g1"], raw["be1"], raw["rm1"], raw["rv1"])
    return conv_bn_relu_ref(y, raw["w2"], raw["b2"], raw["g2"], raw["be2"], raw["rm2"], raw["rv2"])


if __name__ == "__main__":
    key = jax.random.PRNGKey(0)
    k_x, k_p = jax.random.split(key)

    N, Cin, Cout, H, W = 2, 4, 8, 16, 16
    x = jax.random.normal(k_x, (N, Cin, H, W), jnp.float32)
    params = make_params(k_p, Cin, Cout)

    out = jax.block_until_ready(conv_block_forward(x, params))
    ref = jax.block_until_ready(reference_forward(x, params["raw"]))

    assert out.shape == (N, Cout, H, W)
    # bf16 MXU operands -> compare against the f32 reference at a bf16-appropriate tolerance.
    assert jnp.allclose(out, ref, rtol=3e-2, atol=3e-2), "mismatch vs pure-JAX reference"

    print("KERNEL_OK")
</pallas_src>

<mosaic_0001>
module attributes {stable_mosaic.version = 11 : i64} {
  func.func @_conv_block_kernel(%arg0: i32, %arg1: memref<1x18x18x4xbf16, #tpu.memory_space<vmem>>, %arg2: memref<9x4x128xbf16, #tpu.memory_space<vmem>>, %arg3: memref<1x128xf32, #tpu.memory_space<vmem>>, %arg4: memref<9x128x128xbf16, #tpu.memory_space<vmem>>, %arg5: memref<1x128xf32, #tpu.memory_space<vmem>>, %arg6: memref<1x16x16x128xf32, #tpu.memory_space<vmem>>, %arg7: memref<18x32x128xf32, #tpu.memory_space<vmem>>) attributes {dimension_semantics = [#tpu.dimension_semantics<parallel>], iteration_bounds = array<i64: 2>, scalar_prefetch = 0 : i64, scratch_operands = 1 : i64, tpu.core_type = #tpu.core_type<tc>, window_params = [{transform_indices = @transform_0, window_bounds = array<i64: 1, 18, 18, 4>}, {pipeline_mode = #tpu.pipeline_mode<synchronous>, transform_indices = @transform_1, window_bounds = array<i64: 9, 4, 128>}, {pipeline_mode = #tpu.pipeline_mode<synchronous>, transform_indices = @transform_2, window_bounds = array<i64: 1, 128>}, {pipeline_mode = #tpu.pipeline_mode<synchronous>, transform_indices = @transform_3, window_bounds = array<i64: 9, 128, 128>}, {pipeline_mode = #tpu.pipeline_mode<synchronous>, transform_indices = @transform_4, window_bounds = array<i64: 1, 128>}, {transform_indices = @transform_5, window_bounds = array<i64: 1, 16, 16, 128>}]} {
    %c0 = arith.constant 0 : index
    %c0_0 = arith.constant 0 : index
    %c0_1 = arith.constant 0 : index
    %c0_2 = arith.constant 0 : index
    %0 = vector.load %arg1[%c0, %c0_0, %c0_1, %c0_2] : memref<1x18x18x4xbf16, #tpu.memory_space<vmem>>, vector<1x18x18x4xbf16>
    %1 = vector.shape_cast %0 : vector<1x18x18x4xbf16> to vector<18x18x4xbf16>
    %cst = arith.constant 0.000000e+00 : f32
    %2 = vector.broadcast %cst : f32 to vector<256x128xf32>
    %3 = vector.extract_strided_slice %1 {offsets = [0, 0, 0], sizes = [16, 16, 4], strides = [1, 1, 1]} : vector<18x18x4xbf16> to vector<16x16x4xbf16>
    %4 = vector.shape_cast %3 : vector<16x16x4xbf16> to vector<256x4xbf16>
    %c0_3 = arith.constant 0 : index
    %c0_4 = arith.constant 0 : index
    %c0_5 = arith.constant 0 : index
    %5 = vector.load %arg2[%c0_3, %c0_4, %c0_5] : memref<9x4x128xbf16, #tpu.memory_space<vmem>>, vector<1x4x128xbf16>
    %6 = vector.shape_cast %5 : vector<1x4x128xbf16> to vector<4x128xbf16>
    %cst_6 = arith.constant dense<0.000000e+00> : vector<256x128xf32>
    %7 = tpu.matmul %4, %6, %cst_6 {dimension_numbers = #tpu.dot_dimension_numbers<[1], [0], [0], [1], [0, 0, 1, 1], [], []>} : vector<256x4xbf16>, vector<4x128xbf16>, vector<256x128xf32> -> vector<256x128xf32>
    %8 = arith.addf %2, %7 : vector<256x128xf32>
    %9 = vector.extract_strided_slice %1 {offsets = [0, 1, 0], sizes = [16, 16, 4], strides = [1, 1, 1]} : vector<18x18x4xbf16> to vector<16x16x4xbf16>
    %10 = vector.shape_cast %9 : vector<16x16x4xbf16> to vector<256x4xbf16>
    %c1 = arith.constant 1 : index
    %c0_7 = arith.constant 0 : index
    %c0_8 = arith.constant 0 : index
    %11 = vector.load %arg2[%c1, %c0_7, %c0_8] : memref<9x4x128xbf16, #tpu.memory_space<vmem>>, vector<1x4x128xbf16>
    %12 = vector.shape_cast %11 : vector<1x4x128xbf16> to vector<4x128xbf16>
    %cst_9 = arith.constant dense<0.000000e+00> : vector<256x128xf32>
    %13 = tpu.matmul %10, %12, %cst_9 {dimension_numbers = #tpu.dot_dimension_numbers<[1], [0], [0], [1], [0, 0, 1, 1], [], []>} : vector<256x4xbf16>, vector<4x128xbf16>, vector<256x128xf32> -> vector<256x128xf32>
    %14 = arith.addf %8, %13 : vector<256x128xf32>
    %15 = vector.extract_strided_slice %1 {offsets = [0, 2, 0], sizes = [16, 16, 4], strides = [1, 1, 1]} : vector<18x18x4xbf16> to vector<16x16x4xbf16>
    %16 = vector.shape_cast %15 : vector<16x16x4xbf16> to vector<256x4xbf16>
    %c2 = arith.constant 2 : index
    %c0_10 = arith.constant 0 : index
    %c0_11 = arith.constant 0 : index
    %17 = vector.load %arg2[%c2, %c0_10, %c0_11] : memref<9x4x128xbf16, #tpu.memory_space<vmem>>, vector<1x4x128xbf16>
    %18 = vector.shape_cast %17 : vector<1x4x128xbf16> to vector<4x128xbf16>
    %cst_12 = arith.constant dense<0.000000e+00> : vector<256x128xf32>
    %19 = tpu.matmul %16, %18, %cst_12 {dimension_numbers = #tpu.dot_dimension_numbers<[1], [0], [0], [1], [0, 0, 1, 1], [], []>} : vector<256x4xbf16>, vector<4x128xbf16>, vector<256x128xf32> -> vector<256x128xf32>
    %20 = arith.addf %14, %19 : vector<256x128xf32>
    %21 = vector.extract_strided_slice %1 {offsets = [1, 0, 0], sizes = [16, 16, 4], strides = [1, 1, 1]} : vector<18x18x4xbf16> to vector<16x16x4xbf16>
    %22 = vector.shape_cast %21 : vector<16x16x4xbf16> to vector<256x4xbf16>
    %c3 = arith.constant 3 : index
    %c0_13 = arith.constant 0 : index
    %c0_14 = arith.constant 0 : index
    %23 = vector.load %arg2[%c3, %c0_13, %c0_14] : memref<9x4x128xbf16, #tpu.memory_space<vmem>>, vector<1x4x128xbf16>
    %24 = vector.shape_cast %23 : vector<1x4x128xbf16> to vector<4x128xbf16>
    %cst_15 = arith.constant dense<0.000000e+00> : vector<256x128xf32>
    %25 = tpu.matmul %22, %24, %cst_15 {dimension_numbers = #tpu.dot_dimension_numbers<[1], [0], [0], [1], [0, 0, 1, 1], [], []>} : vector<256x4xbf16>, vector<4x128xbf16>, vector<256x128xf32> -> vector<256x128xf32>
    %26 = arith.addf %20, %25 : vector<256x128xf32>
    %27 = vector.extract_strided_slice %1 {offsets = [1, 1, 0], sizes = [16, 16, 4], strides = [1, 1, 1]} : vector<18x18x4xbf16> to vector<16x16x4xbf16>
    %28 = vector.shape_cast %27 : vector<16x16x4xbf16> to vector<256x4xbf16>
    %c4 = arith.constant 4 : index
    %c0_16 = arith.constant 0 : index
    %c0_17 = arith.constant 0 : index
    %29 = vector.load %arg2[%c4, %c0_16, %c0_17] : memref<9x4x128xbf16, #tpu.memory_space<vmem>>, vector<1x4x128xbf16>
    %30 = vector.shape_cast %29 : vector<1x4x128xbf16> to vector<4x128xbf16>
    %cst_18 = arith.constant dense<0.000000e+00> : vector<256x128xf32>
    %31 = tpu.matmul %28, %30, %cst_18 {dimension_numbers = #tpu.dot_dimension_numbers<[1], [0], [0], [1], [0, 0, 1, 1], [], []>} : vector<256x4xbf16>, vector<4x128xbf16>, vector<256x128xf32> -> vector<256x128xf32>
    %32 = arith.addf %26, %31 : vector<256x128xf32>
    %33 = vector.extract_strided_slice %1 {offsets = [1, 2, 0], sizes = [16, 16, 4], strides = [1, 1, 1]} : vector<18x18x4xbf16> to vector<16x16x4xbf16>
    %34 = vector.shape_cast %33 : vector<16x16x4xbf16> to vector<256x4xbf16>
    %c5 = arith.constant 5 : index
    %c0_19 = arith.constant 0 : index
    %c0_20 = arith.constant 0 : index
    %35 = vector.load %arg2[%c5, %c0_19, %c0_20] : memref<9x4x128xbf16, #tpu.memory_space<vmem>>, vector<1x4x128xbf16>
    %36 = vector.shape_cast %35 : vector<1x4x128xbf16> to vector<4x128xbf16>
    %cst_21 = arith.constant dense<0.000000e+00> : vector<256x128xf32>
    %37 = tpu.matmul %34, %36, %cst_21 {dimension_numbers = #tpu.dot_dimension_numbers<[1], [0], [0], [1], [0, 0, 1, 1], [], []>} : vector<256x4xbf16>, vector<4x128xbf16>, vector<256x128xf32> -> vector<256x128xf32>
    %38 = arith.addf %32, %37 : vector<256x128xf32>
    %39 = vector.extract_strided_slice %1 {offsets = [2, 0, 0], sizes = [16, 16, 4], strides = [1, 1, 1]} : vector<18x18x4xbf16> to vector<16x16x4xbf16>
    %40 = vector.shape_cast %39 : vector<16x16x4xbf16> to vector<256x4xbf16>
    %c6 = arith.constant 6 : index
    %c0_22 = arith.constant 0 : index
    %c0_23 = arith.constant 0 : index
    %41 = vector.load %arg2[%c6, %c0_22, %c0_23] : memref<9x4x128xbf16, #tpu.memory_space<vmem>>, vector<1x4x128xbf16>
    %42 = vector.shape_cast %41 : vector<1x4x128xbf16> to vector<4x128xbf16>
    %cst_24 = arith.constant dense<0.000000e+00> : vector<256x128xf32>
    %43 = tpu.matmul %40, %42, %cst_24 {dimension_numbers = #tpu.dot_dimension_numbers<[1], [0], [0], [1], [0, 0, 1, 1], [], []>} : vector<256x4xbf16>, vector<4x128xbf16>, vector<256x128xf32> -> vector<256x128xf32>
    %44 = arith.addf %38, %43 : vector<256x128xf32>
    %45 = vector.extract_strided_slice %1 {offsets = [2, 1, 0], sizes = [16, 16, 4], strides = [1, 1, 1]} : vector<18x18x4xbf16> to vector<16x16x4xbf16>
    %46 = vector.shape_cast %45 : vector<16x16x4xbf16> to vector<256x4xbf16>
    %c7 = arith.constant 7 : index
    %c0_25 = arith.constant 0 : index
    %c0_26 = arith.constant 0 : index
    %47 = vector.load %arg2[%c7, %c0_25, %c0_26] : memref<9x4x128xbf16, #tpu.memory_space<vmem>>, vector<1x4x128xbf16>
    %48 = vector.shape_cast %47 : vector<1x4x128xbf16> to vector<4x128xbf16>
    %cst_27 = arith.constant dense<0.000000e+00> : vector<256x128xf32>
    %49 = tpu.matmul %46, %48, %cst_27 {dimension_numbers = #tpu.dot_dimension_numbers<[1], [0], [0], [1], [0, 0, 1, 1], [], []>} : vector<256x4xbf16>, vector<4x128xbf16>, vector<256x128xf32> -> vector<256x128xf32>
    %50 = arith.addf %44, %49 : vector<256x128xf32>
    %51 = vector.extract_strided_slice %1 {offsets = [2, 2, 0], sizes = [16, 16, 4], strides = [1, 1, 1]} : vector<18x18x4xbf16> to vector<16x16x4xbf16>
    %52 = vector.shape_cast %51 : vector<16x16x4xbf16> to vector<256x4xbf16>
    %c8 = arith.constant 8 : index
    %c0_28 = arith.constant 0 : index
    %c0_29 = arith.constant 0 : index
    %53 = vector.load %arg2[%c8, %c0_28, %c0_29] : memref<9x4x128xbf16, #tpu.memory_space<vmem>>, vector<1x4x128xbf16>
    %54 = vector.shape_cast %53 : vector<1x4x128xbf16> to vector<4x128xbf16>
    %cst_30 = arith.constant dense<0.000000e+00> : vector<256x128xf32>
    %55 = tpu.matmul %52, %54, %cst_30 {dimension_numbers = #tpu.dot_dimension_numbers<[1], [0], [0], [1], [0, 0, 1, 1], [], []>} : vector<256x4xbf16>, vector<4x128xbf16>, vector<256x128xf32> -> vector<256x128xf32>
    %56 = arith.addf %50, %55 : vector<256x128xf32>
    %c0_31 = arith.constant 0 : index
    %c0_32 = arith.constant 0 : index
    %57 = vector.load %arg3[%c0_31, %c0_32] : memref<1x128xf32, #tpu.memory_space<vmem>>, vector<1x128xf32>
    %58 = vector.broadcast %57 : vector<1x128xf32> to vector<256x128xf32>
    %59 = arith.addf %56, %58 : vector<256x128xf32>
    %cst_33 = arith.constant 0.000000e+00 : f32
    %60 = vector.broadcast %cst_33 : f32 to vector<256x128xf32>
    %61 = arith.maximumf %59, %60 : vector<256x128xf32>
    %cst_34 = arith.constant 0.000000e+00 : f32
    %62 = vector.broadcast %cst_34 : f32 to vector<18x32x128xf32>
    %c0_35 = arith.constant 0 : index
    %c0_36 = arith.constant 0 : index
    %c0_37 = arith.constant 0 : index
    %63 = vector.load %arg7[%c0_35, %c0_36, %c0_37] : memref<18x32x128xf32, #tpu.memory_space<vmem>>, vector<18x32x128xf32>
    tpu.vector_store %arg7[%c0_35, %c0_36, %c0_37], %62 {strides = array<i32>} : memref<18x32x128xf32, #tpu.memory_space<vmem>>, vector<18x32x128xf32>,
    %64 = vector.shape_cast %61 : vector<256x128xf32> to vector<16x16x128xf32>
    %c1_38 = arith.constant 1 : index
    %c8_39 = arith.constant 8 : index
    %c0_40 = arith.constant 0 : index
    %65 = vector.load %arg7[%c1_38, %c8_39, %c0_40] : memref<18x32x128xf32, #tpu.memory_space<vmem>>, vector<16x16x128xf32>
    tpu.vector_store %arg7[%c1_38, %c8_39, %c0_40], %64 {strides = array<i32>} : memref<18x32x128xf32, #tpu.memory_space<vmem>>, vector<16x16x128xf32>,
    %c0_41 = arith.constant 0 : index
    %c0_42 = arith.constant 0 : index
    %c0_43 = arith.constant 0 : index
    %66 = vector.load %arg7[%c0_41, %c0_42, %c0_43] : memref<18x32x128xf32, #tpu.memory_space<vmem>>, vector<18x32x128xf32>
    %cst_44 = arith.constant 0.000000e+00 : f32
    %67 = vector.broadcast %cst_44 : f32 to vector<256x128xf32>
    %68 = vector.extract_strided_slice %66 {offsets = [0, 7, 0], sizes = [16, 16, 128], strides = [1, 1, 1]} : vector<18x32x128xf32> to vector<16x16x128xf32>
    %69 = vector.shape_cast %68 : vector<16x16x128xf32> to vector<256x128xf32>
    %70 = arith.truncf %69 : vector<256x128xf32> to vector<256x128xbf16>
    %c0_45 = arith.constant 0 : index
    %c0_46 = arith.constant 0 : index
    %c0_47 = arith.constant 0 : index
    %71 = vector.load %arg4[%c0_45, %c0_46, %c0_47] : memref<9x128x128xbf16, #tpu.memory_space<vmem>>, vector<1x128x128xbf16>
    %72 = vector.shape_cast %71 : vector<1x128x128xbf16> to vector<128x128xbf16>
    %cst_48 = arith.constant dense<0.000000e+00> : vector<256x128xf32>
    %73 = tpu.matmul %70, %72, %cst_48 {dimension_numbers = #tpu.dot_dimension_numbers<[1], [0], [0], [1], [0, 0, 1, 1], [], []>} : vector<256x128xbf16>, vector<128x128xbf16>, vector<256x128xf32> -> vector<256x128xf32>
    %74 = arith.addf %67, %73 : vector<256x128xf32>
    %75 = vector.extract_strided_slice %66 {offsets = [0, 8, 0], sizes = [16, 16, 128], strides = [1, 1, 1]} : vector<18x32x128xf32> to vector<16x16x128xf32>
    %76 = vector.shape_cast %75 : vector<16x16x128xf32> to vector<256x128xf32>
    %77 = arith.truncf %76 : vector<256x128xf32> to vector<256x128xbf16>
    %c1_49 = arith.constant 1 : index
    %c0_50 = arith.constant 0 : index
    %c0_51 = arith.constant 0 : index
    %78 = vector.load %arg4[%c1_49, %c0_50, %c0_51] : memref<9x128x128xbf16, #tpu.memory_space<vmem>>, vector<1x128x128xbf16>
    %79 = vector.shape_cast %78 : vector<1x128x128xbf16> to vector<128x128xbf16>
    %cst_52 = arith.constant dense<0.000000e+00> : vector<256x128xf32>
    %80 = tpu.matmul %77, %79, %cst_52 {dimension_numbers = #tpu.dot_dimension_numbers<[1], [0], [0], [1], [0, 0, 1, 1], [], []>} : vector<256x128xbf16>, vector<128x128xbf16>, vector<256x128xf32> -> vector<256x128xf32>
    %81 = arith.addf %74, %80 : vector<256x128xf32>
    %82 = vector.extract_strided_slice %66 {offsets = [0, 9, 0], sizes = [16, 16, 128], strides = [1, 1, 1]} : vector<18x32x128xf32> to vector<16x16x128xf32>
    %83 = vector.shape_cast %82 : vector<16x16x128xf32> to vector<256x128xf32>
    %84 = arith.truncf %83 : vector<256x128xf32> to vector<256x128xbf16>
    %c2_53 = arith.constant 2 : index
    %c0_54 = arith.constant 0 : index
    %c0_55 = arith.constant 0 : index
    %85 = vector.load %arg4[%c2_53, %c0_54, %c0_55] : memref<9x128x128xbf16, #tpu.memory_space<vmem>>, vector<1x128x128xbf16>
    %86 = vector.shape_cast %85 : vector<1x128x128xbf16> to vector<128x128xbf16>
    %cst_56 = arith.constant dense<0.000000e+00> : vector<256x128xf32>
    %87 = tpu.matmul %84, %86, %cst_56 {dimension_numbers = #tpu.dot_dimension_numbers<[1], [0], [0], [1], [0, 0, 1, 1], [], []>} : vector<256x128xbf16>, vector<128x128xbf16>, vector<256x128xf32> -> vector<256x128xf32>
    %88 = arith.addf %81, %87 : vector<256x128xf32>
    %89 = vector.extract_strided_slice %66 {offsets = [1, 7, 0], sizes = [16, 16, 128], strides = [1, 1, 1]} : vector<18x32x128xf32> to vector<16x16x128xf32>
    %90 = vector.shape_cast %89 : vector<16x16x128xf32> to vector<256x128xf32>
    %91 = arith.truncf %90 : vector<256x128xf32> to vector<256x128xbf16>
    %c3_57 = arith.constant 3 : index
    %c0_58 = arith.constant 0 : index
    %c0_59 = arith.constant 0 : index
    %92 = vector.load %arg4[%c3_57, %c0_58, %c0_59] : memref<9x128x128xbf16, #tpu.memory_space<vmem>>, vector<1x128x128xbf16>
    %93 = vector.shape_cast %92 : vector<1x128x128xbf16> to vector<128x128xbf16>
    %cst_60 = arith.constant dense<0.000000e+00> : vector<256x128xf32>
    %94 = tpu.matmul %91, %93, %cst_60 {dimension_numbers = #tpu.dot_dimension_numbers<[1], [0], [0], [1], [0, 0, 1, 1], [], []>} : vector<256x128xbf16>, vector<128x128xbf16>, vector<256x128xf32> -> vector<256x128xf32>
    %95 = arith.addf %88, %94 : vector<256x128xf32>
    %96 = vector.extract_strided_slice %66 {offsets = [1, 8, 0], sizes = [16, 16, 128], strides = [1, 1, 1]} : vector<18x32x128xf32> to vector<16x16x128xf32>
    %97 = vector.shape_cast %96 : vector<16x16x128xf32> to vector<256x128xf32>
    %98 = arith.truncf %97 : vector<256x128xf32> to vector<256x128xbf16>
    %c4_61 = arith.constant 4 : index
    %c0_62 = arith.constant 0 : index
    %c0_63 = arith.constant 0 : index
    %99 = vector.load %arg4[%c4_61, %c0_62, %c0_63] : memref<9x128x128xbf16, #tpu.memory_space<vmem>>, vector<1x128x128xbf16>
    %100 = vector.shape_cast %99 : vector<1x128x128xbf16> to vector<128x128xbf16>
    %cst_64 = arith.constant dense<0.000000e+00> : vector<256x128xf32>
    %101 = tpu.matmul %98, %100, %cst_64 {dimension_numbers = #tpu.dot_dimension_numbers<[1], [0], [0], [1], [0, 0, 1, 1], [], []>} : vector<256x128xbf16>, vector<128x128xbf16>, vector<256x128xf32> -> vector<256x128xf32>
    %102 = arith.addf %95, %101 : vector<256x128xf32>
    %103 = vector.extract_strided_slice %66 {offsets = [1, 9, 0], sizes = [16, 16, 128], strides = [1, 1, 1]} : vector<18x32x128xf32> to vector<16x16x128xf32>
    %104 = vector.shape_cast %103 : vector<16x16x128xf32> to vector<256x128xf32>
    %105 = arith.truncf %104 : vector<256x128xf32> to vector<256x128xbf16>
    %c5_65 = arith.constant 5 : index
    %c0_66 = arith.constant 0 : index
    %c0_67 = arith.constant 0 : index
    %106 = vector.load %arg4[%c5_65, %c0_66, %c0_67] : memref<9x128x128xbf16, #tpu.memory_space<vmem>>, vector<1x128x128xbf16>
    %107 = vector.shape_cast %106 : vector<1x128x128xbf16> to vector<128x128xbf16>
    %cst_68 = arith.constant dense<0.000000e+00> : vector<256x128xf32>
    %108 = tpu.matmul %105, %107, %cst_68 {dimension_numbers = #tpu.dot_dimension_numbers<[1], [0], [0], [1], [0, 0, 1, 1], [], []>} : vector<256x128xbf16>, vector<128x128xbf16>, vector<256x128xf32> -> vector<256x128xf32>
    %109 = arith.addf %102, %108 : vector<256x128xf32>
    %110 = vector.extract_strided_slice %66 {offsets = [2, 7, 0], sizes = [16, 16, 128], strides = [1, 1, 1]} : vector<18x32x128xf32> to vector<16x16x128xf32>
    %111 = vector.shape_cast %110 : vector<16x16x128xf32> to vector<256x128xf32>
    %112 = arith.truncf %111 : vector<256x128xf32> to vector<256x128xbf16>
    %c6_69 = arith.constant 6 : index
    %c0_70 = arith.constant 0 : index
    %c0_71 = arith.constant 0 : index
    %113 = vector.load %arg4[%c6_69, %c0_70, %c0_71] : memref<9x128x128xbf16, #tpu.memory_space<vmem>>, vector<1x128x128xbf16>
    %114 = vector.shape_cast %113 : vector<1x128x128xbf16> to vector<128x128xbf16>
    %cst_72 = arith.constant dense<0.000000e+00> : vector<256x128xf32>
    %115 = tpu.matmul %112, %114, %cst_72 {dimension_numbers = #tpu.dot_dimension_numbers<[1], [0], [0], [1], [0, 0, 1, 1], [], []>} : vector<256x128xbf16>, vector<128x128xbf16>, vector<256x128xf32> -> vector<256x128xf32>
    %116 = arith.addf %109, %115 : vector<256x128xf32>
    %117 = vector.extract_strided_slice %66 {offsets = [2, 8, 0], sizes = [16, 16, 128], strides = [1, 1, 1]} : vector<18x32x128xf32> to vector<16x16x128xf32>
    %118 = vector.shape_cast %117 : vector<16x16x128xf32> to vector<256x128xf32>
    %119 = arith.truncf %118 : vector<256x128xf32> to vector<256x128xbf16>
    %c7_73 = arith.constant 7 : index
    %c0_74 = arith.constant 0 : index
    %c0_75 = arith.constant 0 : index
    %120 = vector.load %arg4[%c7_73, %c0_74, %c0_75] : memref<9x128x128xbf16, #tpu.memory_space<vmem>>, vector<1x128x128xbf16>
    %121 = vector.shape_cast %120 : vector<1x128x128xbf16> to vector<128x128xbf16>
    %cst_76 = arith.constant dense<0.000000e+00> : vector<256x128xf32>
    %122 = tpu.matmul %119, %121, %cst_76 {dimension_numbers = #tpu.dot_dimension_numbers<[1], [0], [0], [1], [0, 0, 1, 1], [], []>} : vector<256x128xbf16>, vector<128x128xbf16>, vector<256x128xf32> -> vector<256x128xf32>
    %123 = arith.addf %116, %122 : vector<256x128xf32>
    %124 = vector.extract_strided_slice %66 {offsets = [2, 9, 0], sizes = [16, 16, 128], strides = [1, 1, 1]} : vector<18x32x128xf32> to vector<16x16x128xf32>
    %125 = vector.shape_cast %124 : vector<16x16x128xf32> to vector<256x128xf32>
    %126 = arith.truncf %125 : vector<256x128xf32> to vector<256x128xbf16>
    %c8_77 = arith.constant 8 : index
    %c0_78 = arith.constant 0 : index
    %c0_79 = arith.constant 0 : index
    %127 = vector.load %arg4[%c8_77, %c0_78, %c0_79] : memref<9x128x128xbf16, #tpu.memory_space<vmem>>, vector<1x128x128xbf16>
    %128 = vector.shape_cast %127 : vector<1x128x128xbf16> to vector<128x128xbf16>
    %cst_80 = arith.constant dense<0.000000e+00> : vector<256x128xf32>
    %129 = tpu.matmul %126, %128, %cst_80 {dimension_numbers = #tpu.dot_dimension_numbers<[1], [0], [0], [1], [0, 0, 1, 1], [], []>} : vector<256x128xbf16>, vector<128x128xbf16>, vector<256x128xf32> -> vector<256x128xf32>
    %130 = arith.addf %123, %129 : vector<256x128xf32>
    %c0_81 = arith.constant 0 : index
    %c0_82 = arith.constant 0 : index
    %131 = vector.load %arg5[%c0_81, %c0_82] : memref<1x128xf32, #tpu.memory_space<vmem>>, vector<1x128xf32>
    %132 = vector.broadcast %131 : vector<1x128xf32> to vector<256x128xf32>
    %133 = arith.addf %130, %132 : vector<256x128xf32>
    %cst_83 = arith.constant 0.000000e+00 : f32
    %134 = vector.broadcast %cst_83 : f32 to vector<256x128xf32>
    %135 = arith.maximumf %133, %134 : vector<256x128xf32>
    %136 = vector.shape_cast %135 : vector<256x128xf32> to vector<1x16x16x128xf32>
    %c0_84 = arith.constant 0 : index
    %c0_85 = arith.constant 0 : index
    %c0_86 = arith.constant 0 : index
    %c0_87 = arith.constant 0 : index
    %137 = vector.load %arg6[%c0_84, %c0_85, %c0_86, %c0_87] : memref<1x16x16x128xf32, #tpu.memory_space<vmem>>, vector<1x16x16x128xf32>
    tpu.vector_store %arg6[%c0_84, %c0_85, %c0_86, %c0_87], %136 {strides = array<i32>} : memref<1x16x16x128xf32, #tpu.memory_space<vmem>>, vector<1x16x16x128xf32>,
    return
  }
  func.func @transform_0(%arg0: i32) -> (i32, i32, i32, i32) {
    %c0_i32 = arith.constant 0 : i32
    %c0_i32_0 = arith.constant 0 : i32
    %c0_i32_1 = arith.constant 0 : i32
    %c0_i32_2 = arith.constant 0 : i32
    return %arg0, %c0_i32, %c0_i32_0, %c0_i32_1 : i32, i32, i32, i32
  }
  func.func @transform_1(%arg0: i32) -> (i32, i32, i32) {
    %c0_i32 = arith.constant 0 : i32
    %c0_i32_0 = arith.constant 0 : i32
    %c0_i32_1 = arith.constant 0 : i32
    %c0_i32_2 = arith.constant 0 : i32
    return %c0_i32, %c0_i32_0, %c0_i32_1 : i32, i32, i32
  }
  func.func @transform_2(%arg0: i32) -> (i32, i32) {
    %c0_i32 = arith.constant 0 : i32
    %c0_i32_0 = arith.constant 0 : i32
    %c0_i32_1 = arith.constant 0 : i32
    return %c0_i32, %c0_i32_0 : i32, i32
  }
  func.func @transform_3(%arg0: i32) -> (i32, i32, i32) {
    %c0_i32 = arith.constant 0 : i32
    %c0_i32_0 = arith.constant 0 : i32
    %c0_i32_1 = arith.constant 0 : i32
    %c0_i32_2 = arith.constant 0 : i32
    return %c0_i32, %c0_i32_0, %c0_i32_1 : i32, i32, i32
  }
  func.func @transform_4(%arg0: i32) -> (i32, i32) {
    %c0_i32 = arith.constant 0 : i32
    %c0_i32_0 = arith.constant 0 : i32
    %c0_i32_1 = arith.constant 0 : i32
    return %c0_i32, %c0_i32_0 : i32, i32
  }
  func.func @transform_5(%arg0: i32) -> (i32, i32, i32, i32) {
    %c0_i32 = arith.constant 0 : i32
    %c0_i32_0 = arith.constant 0 : i32
    %c0_i32_1 = arith.constant 0 : i32
    %c0_i32_2 = arith.constant 0 : i32
    return %arg0, %c0_i32, %c0_i32_0, %c0_i32_1 : i32, i32, i32, i32
  }
}

</mosaic_0001>

<bundles_post_ra>
// kernel: tpu_custom_call.1
= control target key start
LH: loop header
LB: loop body
LE: loop exit
PB: predicated region body
PF: predicated region fallthrough
CT: control target
= control target key end

     0   :  { %10 = vsyncpa [#allocation4], 0  ;;  %s7537_s0 = inlined_call_operand.vmem [shape: bf16[2,18,18,4], index: 0, kind: input, shape index: {}]   ;;  %s7538_s1 = inlined_call_operand.vmem [shape: bf16[9,4,128], index: 1, kind: input, shape index: {}]   ;;  %s7539_s2 = inlined_call_operand.vmem [shape: f32[1,128], index: 2, kind: input, shape index: {}]   ;;  %s7540_s3 = inlined_call_operand.hbm [shape: bf16[9,128,128], index: 3, kind: input, shape index: {}]   ;;  %s7541_s4 = inlined_call_operand.vmem [shape: f32[1,128], index: 4, kind: input, shape index: {}]   ;;  %s7542_s5 = inlined_call_operand.hbm [shape: f32[2,16,16,128], index: 5, kind: output, shape index: {}]  }
   0x1   :  { %11 = vsyncpa [#allocation5], 0 }
   0x2   :  { %13 = vsyncpa [#allocation5 + $0x1], 0  ;;  %s5588_s18 = smov 0   ;;  %s5590_s19 = smov 0  }
   0x3   :  { %s5592_s20 = smov 0   ;;  %s5594_s21 = smov 0  }
   0x4 LB: > { %s5609_s22 = sadd.s32 4294967295, %s5549_s21   ;;  %s4732_s23 = sadd.s32 4294967294, %s5549_s21   ;;  %s5549_s21 = sphi %s5594_s21, %s7833_s21   ;;  %s5545_s20 = sphi %s5592_s20, %s7832_s20   ;;  %s5541_s19 = sphi %s5590_s19, %s7831_s19   ;;  %s5537_s18 = sphi %s5588_s18, %s7830_s18  }
   0x5   : > { %s5613_s24 = sadd.s32 1, %s5549_s21   ;;  %s136_s25 = sadd.s32 1, %s5545_s20 }
   0x6   : > { %s133_s26 = ssub.s32 %s5549_s21, %s5613_s24  ;;  %p146_p0 = scmp.ne.s32.totalorder %s5545_s20, %s5541_s19 }
   0x7   : > { %p134_p1 = scmp.eq.s32.totalorder %s133_s26, 0  ;;  %p147_p2 = scmp.eq.s32.totalorder %s5609_s22, 1 }
   0x8   : > { %p152_p3 = scmp.ne.s32.totalorder %s5541_s19, %s5537_s18  ;;  %p153_p4 = scmp.eq.s32.totalorder %s4732_s23, 1 }
   0x9   : > { %s5624_s27 = scalar_select %p134_p1, %s5545_s20, %s136_s25  }
   0xa   : > { %p5626_p5 = por %p147_p2, %p146_p0  ;;  %p5630_p6 = por %p153_p4, %p152_p3 }
   0xb   : > { %p4733_p7 = scmp.ge.s32.totalorder %s5549_s21, 1  ;;  %p160_p8 = scmp.lt.s32.totalorder %s5549_s21, 3 }
   0xc   : > { %p5383_p9 = scmp.eq.s32.totalorder %s5609_s22, 0  ;;  %s177_s7 = sshll.u32 %s7540_s3, 4  ;;  %s178_s7 = int_to_ptr.hbm [resolvable:$true] %s177_s7 }
   0xd   : > { %p161_p10 = pnand %p4733_p7, %p160_p8  ;;  %s5551_s8 = smov [#allocation3]  }
   0xe   : > { %s179_s9 = sshll.u32 %s5551_s8, 4  ;;  %s5552_s10 = smov 64   ;;  %s180_s9 = int_to_ptr.vmem [resolvable:$true] %s179_s9 }
   0xf   : > { %p5375_p11 = pneg %p161_p10  ;;  %s5553_s11 = smov 4  }
  0x10   : > { %206 = sbr.rel (%p161_p10) target bundleno = 1463 (0x5b7), region = 40 }
  0x11   : > { %p5376_p12 = pnand %p5383_p9, %p5375_p11 }
  0x13   : > { %5378 = dma.hbm_to_vmem [thread:$0]  (!%p5376_p12), %s178_s7, 9216, %s180_s9, [#allocation4], %s5552_s10, %s5552_s10, %s5553_s11  }
  0x15   : > { %5528 = dma.done.wait (%p5383_p9), [#allocation4], 9216  }
  0x16   : > { %5530 = vsyncadd (%p5383_p9), [#allocation4], 4294958080  ;;  %p235_p13 = scmp.lt.s32.totalorder %s5609_s22, 1  ;;  %vm782_vm0 = vcmask 1041408   ;;  %vm296_vm1 = vsmask.f32 3328 }
  0x17   : > { %vm297_vm2 = vsmask.f32 7440  ;;  %v295_v0 = vld [vmem:[%s7538_s1] sm:$0x3]  ;;  %vm733_vm3 = vcmask 31744   ;;  %vm1111_vm5 = vcmask 1042432  }
  0x18   : > { %s236_s12 = scalar_select %p235_p13, %s5609_s22, 1  ;;  %v4740_v2 = vld [vmem:[%s7538_s1 + $0x2] sm:$0x3]  ;;  %v1004_v3 = vsel %vm782_vm0, %v295_v0, 0  ;;  %v4853_v24 = vld [vmem:[%s7538_s1 + $0x4] sm:$0x3]  ;;  %vm5689_vm4 = vmor %vm296_vm1, %vm297_vm2 }
  0x19   : > { %v784_v4 = vsel %vm782_vm0, %v4740_v2, 0  ;;  %5367 = vmatpush.bf16.msra.mxu3 %v1004_v3  ;;  %1013 = vmatpush.bf16.msra.mxu1 %v1004_v3  ;;  %v4870_v30 = vld [vmem:[%s7538_s1 + $0x6] sm:$0x3]  ;;  %v4891_v35 = vld [vmem:[%s7538_s1 + $0x8] sm:$0x3]  ;;  %v1325_v42 = vsel %vm782_vm0, %v4853_v24, 0 }
  0x1a   : > { %s5368_s13 = smul.u32 216, %s236_s12  ;;  %793 = vmatpush.bf16.msra.mxu0 %v784_v4  ;;  %5366 = vmatpush.bf16.msra.mxu2 %v784_v4  ;;  %v1459_v43 = vsel %vm782_vm0, %v4870_v30, 0  ;;  %v1615_v44 = vsel %vm782_vm0, %v4891_v35, 0  ;;  %vm1112_vm6 = vcmask 1046532   ;;  %vm2601_vm8 = vcmask 1040384   ;;  %s232_s7 = sand.u32 1, %s5541_s19  }
  0x1b   : > { %vm6068_vm7 = vmor %vm1111_vm5, %vm1112_vm6  ;;  %vm3069_vm9 = vcmask 1046528   ;;  %s4738_s10 = sshll.u32 %s232_s7, 8  ;;  %s5365_s12 = sshll.u32 %s5609_s22, 8 }
  0x1c   : > { %s5651_s16 = scalar_lea.vmem %s7537_s0, %s5368_s13  ;;  %s7400_s11 = scalar_lea.vmem [#allocation6], %s4738_s10 }
  0x1d   : > { %v5283_v1 = vld [vmem:[%s5651_s16 + $0x60] sm:$0xff]  ;;  %v5669_v7 = vld [vmem:[%s5651_s16 + $0x8] sm:$0x1]  ;;  %v5698_v40 = vld [vmem:[%s5651_s16 + $0xc] sm:$0xf]  ;;  %1468 = vmatpush.bf16.msrb.mxu3 %v1459_v43  ;;  %s4654_s15 = scalar_lea.hbm %s7542_s5, %s5365_s12  ;;  %s4655_s17 = sshll.u32 %s7400_s11, 4  ;;  %s4656_s17 = int_to_ptr.vmem [resolvable:$true] %s4655_s17 }
  0x1e   : > { %v5663_v5 = vld [vmem:[%s5651_s16] sm:$0xf]  ;;  %v5666_v6 = vld [vmem:[%s5651_s16 + $0x4] sm:$0xf]  ;;  %v319_v12 = vshll.u32 %v5669_v7, 16  ;;  %4829 = vmatmul.msk.bf16.vlgmr.msra.gmra.mxu3 %vm733_vm3, %v5283_v1  ;;  %1334 = vmatpush.bf16.msrb.mxu2 %v1325_v42  ;;  %v324_v50 = vshrl.u32 %v5698_v40, 16 }
  0x1f   : > { %v300_v8 = vshrl.u32 %v5663_v5, 16  ;;  %v303_v9 = vshll.u32 %v5663_v5, 16  ;;  %v309_v10 = vshll.u32 %v5666_v6, 16  ;;  %v313_v11 = vshrl.u32 %v5666_v6, 16  ;;  %v265_v13 = vld [vmem:[%s5651_s16 + $0x60] sm:$0xf]  ;;  %1624 = vmatpush.bf16.msrb.mxu0 %v1615_v44 }
  0x20   : > { %v266_v14 = vld [vmem:[%s5651_s16 + $0x64] sm:$0xf]  ;;  %v267_v19 = vld [vmem:[%s5651_s16 + $0x68] sm:$0x1]  ;;  %v321_v20 = vrot.slane %v319_v12, 5  ;;  %v492_v21 = vshrl.u32 %v265_v13, 16 }
  0x21   : > { %v302_v15 = vrot.slane %v300_v8, 4  ;;  %v305_v16 = vrot.slane %v303_v9, 5  ;;  %v311_v17 = vrot.slane %v309_v10, 5  ;;  %v315_v18 = vrot.slane %v313_v11, 4  ;;  %v5275_v29 = vld [vmem:[%s5651_s16] sm:$0xff]  ;;  %s4657_s23 = sshll.u32 %s4654_s15, 4  ;;  %s4658_s23 = int_to_ptr.hbm [resolvable:$true] %s4657_s23 }
  0x22   : > { %v495_v22 = vshll.u32 %v265_v13, 16  ;;  %v501_v23 = vshll.u32 %v266_v14, 16  ;;  %v505_v27 = vshrl.u32 %v266_v14, 16  ;;  %v511_v28 = vshll.u32 %v267_v19, 16  ;;  %4821 = vmatmul.msk.bf16.vlgmr.msra.gmra.mxu1 %vm733_vm3, %v5275_v29  ;;  %v5704_v45 = vld [vmem:[%s5651_s16 + $0x10] sm:$0xf] }
  0x23   : > { %v306_v25 = vor.u32 %v305_v16, %v302_v15  ;;  %v316_v26 = vor.u32 %v315_v18, %v311_v17  ;;  %v494_v32 = vrot.slane %v492_v21, 4  ;;  %v5711_v49 = vld [vmem:[%s5651_s16 + $0x14] sm:$0x1]  ;;  %v327_v54 = vshll.u32 %v5698_v40, 16  ;;  %v268_v63 = vld [vmem:[%s5651_s16 + $0x6c] sm:$0xf] }
  0x24   : > { %v497_v33 = vrot.slane %v495_v22, 5  ;;  %v503_v34 = vrot.slane %v501_v23, 5  ;;  %v507_v38 = vrot.slane %v505_v27, 4  ;;  %v513_v39 = vrot.slane %v511_v28, 5  ;;  %v269_v0 = vld [vmem:[%s5651_s16 + $0x70] sm:$0xf] }
  0x25   : > { %v307_v36 = vrot.slane %v306_v25, 4  ;;  %v317_v37 = vrot.slane %v316_v26, 4  ;;  %v326_v56 = vrot.slane %v324_v50, 4  ;;  %v333_v57 = vshll.u32 %v5704_v45, 16  ;;  %v270_v8 = vld [vmem:[%s5651_s16 + $0x74] sm:$0x1] }
  0x26   : > { %v498_v41 = vor.u32 %v497_v33, %v494_v32  ;;  %v508_v48 = vor.u32 %v507_v38, %v503_v34  ;;  %v337_v58 = vshrl.u32 %v5704_v45, 16  ;;  %v329_v61 = vrot.slane %v327_v54, 5  ;;  %v5730_v21 = vld [vmem:[%s5651_s16 + $0x18] sm:$0xf]  ;;  %v5733_v26 = vld [vmem:[%s5651_s16 + $0x1c] sm:$0xf] }
  0x27   : > { %v312_v46 = vsel %vm5689_vm4, %v307_v36, %v311_v17  ;;  %v322_v47 = vsel %vm5689_vm4, %v317_v37, %v321_v20  ;;  %v343_v62 = vshll.u32 %v5711_v49, 16  ;;  %v335_v3 = vrot.slane %v333_v57, 5  ;;  %v5284_v17 = vld [vmem:[%s5651_s16 + $0x6c] sm:$0xff]  ;;  %v5750_v43 = vld [vmem:[%s5651_s16 + $0x20] sm:$0x1]  ;;  %s4643_s22 = scalar_lea.sflag [#allocation5], %s232_s7 }
  0x28   : > { %v685_v51 = vunpack.c.l.b16 %v312_v46  ;;  %v686_v52 = vunpack.c.l.b16 %v322_v47  ;;  %v499_v53 = vrot.slane %v498_v41, 4  ;;  %v509_v55 = vrot.slane %v508_v48, 4  ;;  %v5742_v33 = vld [vmem:[%s5651_s16 + $0xc] sm:$0xff]  ;;  %s5497_s25 = sshra.s32 %s4658_s23, 4  ;;  %s5503_s6 = scalar_lea.hbm %s7542_s5, 512  ;;  %s5498_s25 = int_to_ptr.hbm [resolvable:$true] %s5497_s25 }
  0x29   : > { %v339_v4 = vrot.slane %v337_v58, 4  ;;  %v330_v10 = vor.u32 %v329_v61, %v326_v56  ;;  %v345_v11 = vrot.slane %v343_v62, 5  ;;  %v516_v13 = vshrl.u32 %v268_v63, 16  ;;  %v273_v61 = vld [vmem:[%s5651_s16 + $0x80] sm:$0x1]  ;;  %s5499_s26 = scalar_lea.hbm %s5498_s25, 256  ;;  %p5504_p3 = scmp.lt.s32.totalorder %s5498_s25, %s7542_s5 }
  0x2a   : > { %v717_v59 = vpack.c.b16 %v686_v52, %v685_v51  ;;  %v504_v60 = vsel %vm5689_vm4, %v499_v53, %v503_v34  ;;  %v514_v1 = vsel %vm5689_vm4, %v509_v55, %v513_v39  ;;  %v519_v14 = vshll.u32 %v268_v63, 16  ;;  %v271_v39 = vld [vmem:[%s5651_s16 + $0x78] sm:$0xf]  ;;  %v272_v51 = vld [vmem:[%s5651_s16 + $0x7c] sm:$0xf]  ;;  %p5500_p0 = scmp.ne.s32.totalorder %s5498_s25, %s5499_s26  ;;  %p5505_p4 = scmp.lt.s32.totalorder %s5503_s6, %s5499_s26 }
  0x2b   : > { %v701_v2 = vunpack.c.l.b16 %v504_v60  ;;  %v702_v9 = vunpack.c.l.b16 %v514_v1  ;;  %v340_v12 = vor.u32 %v339_v4, %v335_v3  ;;  %v525_v15 = vshll.u32 %v269_v0, 16 }
  0x2c   : > { %4741 = vmatmul.msk.bf16.vlgmr.msra.gmra.mxu0 %vm733_vm3, %v717_v59  ;;  %v331_v18 = vrot.slane %v330_v10, 4  ;;  %v529_v19 = vshrl.u32 %v269_v0, 16  ;;  %v535_v20 = vshll.u32 %v270_v8, 16  ;;  %v518_v23 = vrot.slane %v516_v13, 4  ;;  %p5501_p1 = pnand %p5500_p0, %p5626_p5  ;;  %p5506_p7 = por %p5505_p4, %p5504_p3 }
  0x2d   : > { %v5726_v16 = vpack.c.b16 %v702_v9, %v701_v2  ;;  %v341_v22 = vrot.slane %v340_v12, 4  ;;  %v521_v24 = vrot.slane %v519_v14, 5  ;;  %v527_v25 = vrot.slane %v525_v15, 5  ;;  %v5765_v14 = vld [vmem:[%s5651_s16 + $0x24] sm:$0xf] }
  0x2e   : > { %v336_v27 = vsel %vm5689_vm4, %v331_v18, %v335_v3  ;;  %v531_v28 = vrot.slane %v529_v19, 4  ;;  %v537_v32 = vrot.slane %v535_v20, 5  ;;  %v348_v34 = vshrl.u32 %v5730_v21, 16  ;;  %4830 = vmatmul.msk.bf16.gmra.mxu3 %vm733_vm3, %v5284_v17  ;;  %v5772_v18 = vld [vmem:[%s5651_s16 + $0x28] sm:$0xf]  ;;  %v5285_v20 = vld [vmem:[%s5651_s16 + $0x78] sm:$0xff]  ;;  %p5502_p2 = pneg %p5501_p1 }
  0x2f   : > { %7636 = vst [vmem:[#allocation9_spill] sm:$0xff] %v5726_v16  ;;  %4749 = vmatmul.msk.bf16.vlgmr.msra.gmra.mxu2 %vm733_vm3, %v5726_v16  ;;  %v346_v29 = vsel %vm5689_vm4, %v341_v22, %v345_v11  ;;  %v522_v30 = vor.u32 %v521_v24, %v518_v23  ;;  %v687_v35 = vunpack.c.l.b16 %v336_v27  ;;  %v351_v37 = vshll.u32 %v5730_v21, 16 }
  0x30   : > { %v532_v36 = vor.u32 %v531_v28, %v527_v25  ;;  %v357_v38 = vshll.u32 %v5733_v26, 16  ;;  %v688_v41 = vunpack.c.l.b16 %v346_v29  ;;  %v350_v44 = vrot.slane %v348_v34, 4  ;;  %v274_v34 = vld [vmem:[%s5651_s16 + $0x84] sm:$0xf]  ;;  %p5507_p8 = pnand %p5506_p7, %p5502_p2 }
  0x31   : > { %v523_v42 = vrot.slane %v522_v30, 4  ;;  %v361_v46 = vshrl.u32 %v5733_v26, 16  ;;  %v353_v48 = vrot.slane %v351_v37, 5  ;;  %v540_v54 = vshrl.u32 %v271_v39, 16 }
  0x32   : > { %v533_v47 = vrot.slane %v532_v36, 4  ;;  %v359_v50 = vrot.slane %v357_v38, 5  ;;  %4822 = vmatmul.msk.bf16.gmra.mxu1 %vm733_vm3, %v5742_v33  ;;  %v367_v57 = vshll.u32 %v5750_v43, 16  ;;  %v543_v58 = vshll.u32 %v271_v39, 16 }
  0x33   : > { %v528_v52 = vsel %vm5689_vm4, %v523_v42, %v527_v25  ;;  %v363_v53 = vrot.slane %v361_v46, 4  ;;  %v354_v56 = vor.u32 %v353_v48, %v350_v44  ;;  %v5761_v59 = vpack.c.b16 %v688_v41, %v687_v35  ;;  %v275_v35 = vld [vmem:[%s5651_s16 + $0x88] sm:$0xf]  ;;  %v5796_v44 = vld [vmem:[%s5651_s16 + $0x2c] sm:$0x1] }
  0x34   : > { %v538_v55 = vsel %vm5689_vm4, %v533_v47, %v537_v32  ;;  %v542_v62 = vrot.slane %v540_v54, 4  ;;  %v549_v63 = vshll.u32 %v272_v51, 16  ;;  %v703_v0 = vunpack.c.l.b16 %v528_v52  ;;  %v5786_v32 = vld [vmem:[%s5651_s16 + $0x18] sm:$0xff] }
  0x35   : > { %v364_v60 = vor.u32 %v363_v53, %v359_v50  ;;  %v704_v1 = vunpack.c.l.b16 %v538_v55  ;;  %v545_v2 = vrot.slane %v543_v58, 5  ;;  %v553_v3 = vshrl.u32 %v272_v51, 16 }
  0x36   : > { %v355_v4 = vrot.slane %v354_v56, 4  ;;  %v551_v8 = vrot.slane %v549_v63, 5  ;;  %v369_v10 = vrot.slane %v367_v57, 5  ;;  %v559_v12 = vshll.u32 %v273_v61, 16 }
  0x37   : > { %v365_v9 = vrot.slane %v364_v60, 4  ;;  %v555_v11 = vrot.slane %v553_v3, 4  ;;  %v546_v13 = vor.u32 %v545_v2, %v542_v62  ;;  %v5769_v15 = vpack.c.b16 %v704_v1, %v703_v0  ;;  %v5804_v60 = vld [vmem:[%s5651_s16 + $0x8c] sm:$0x1] }
  0x38   : > { %v360_v19 = vsel %vm5689_vm4, %v355_v4, %v359_v50  ;;  %v561_v23 = vrot.slane %v559_v12, 5  ;;  %v372_v24 = vshrl.u32 %v5765_v14, 16  ;;  %v375_v25 = vshll.u32 %v5765_v14, 16  ;;  %v5815_v12 = vld [vmem:[%s5651_s16 + $0x34] sm:$0xf] }
  0x39   : > { %7637 = vst [vmem:[#allocation10_spill] sm:$0xff] %v5769_v15  ;;  %v556_v17 = vor.u32 %v555_v11, %v551_v8  ;;  %v370_v22 = vsel %vm5689_vm4, %v365_v9, %v369_v10  ;;  %v547_v27 = vrot.slane %v546_v13, 4  ;;  %v381_v29 = vshll.u32 %v5772_v18, 16  ;;  %v5812_v11 = vld [vmem:[%s5651_s16 + $0x30] sm:$0xf]  ;;  %v5818_v13 = vld [vmem:[%s5651_s16 + $0x84] sm:$0xff] }
  0x3a   : > { %v385_v30 = vshrl.u32 %v5772_v18, 16  ;;  %v689_v36 = vunpack.c.l.b16 %v360_v19  ;;  %v690_v37 = vunpack.c.l.b16 %v370_v22  ;;  %v374_v38 = vrot.slane %v372_v24, 4  ;;  %7638 = vst [vmem:[#allocation11_spill] sm:$0xff] %v5818_v13 }
  0x3b   : > { %v557_v28 = vrot.slane %v556_v17, 4  ;;  %v377_v39 = vrot.slane %v375_v25, 5  ;;  %v552_v41 = vsel %vm5689_vm4, %v547_v27, %v551_v8  ;;  %v383_v46 = vrot.slane %v381_v29, 5  ;;  %v5831_v29 = vld [vmem:[%s5651_s16 + $0x24] sm:$0xff] }
  0x3c   : > { %4742 = vmatmul.msk.bf16.gmra.mxu0 %vm733_vm3, %v5761_v59  ;;  %v387_v47 = vrot.slane %v385_v30, 4  ;;  %v564_v48 = vshrl.u32 %v274_v34, 16  ;;  %v567_v50 = vshll.u32 %v274_v34, 16  ;;  %v573_v51 = vshll.u32 %v275_v35, 16  ;;  %v5836_v30 = vld [vmem:[%s5651_s16 + $0x90] sm:$0xf] }
  0x3d   : > { %v562_v42 = vsel %vm5689_vm4, %v557_v28, %v561_v23  ;;  %v577_v52 = vshrl.u32 %v275_v35, 16  ;;  %v378_v53 = vor.u32 %v377_v39, %v374_v38  ;;  %v391_v54 = vshll.u32 %v5796_v44, 16  ;;  %7639 = vst [vmem:[#allocation12_spill] sm:$0xff] %v5836_v30  ;;  %v5839_v34 = vld [vmem:[%s5651_s16 + $0x94] sm:$0xf] }
  0x3e   : > { %4831 = vmatmul.msk.bf16.gmra.mxu3 %vm733_vm3, %v5285_v20  ;;  %v5801_v55 = vpack.c.b16 %v690_v37, %v689_v36  ;;  %v705_v56 = vunpack.c.l.b16 %v552_v41  ;;  %v706_v57 = vunpack.c.l.b16 %v562_v42  ;;  %v388_v58 = vor.u32 %v387_v47, %v383_v46  ;;  %7640 = vst [vmem:[#allocation13_spill] sm:$0xff] %v5839_v34  ;;  %v5846_v42 = vld [vmem:[%s5651_s16 + $0x38] sm:$0x1] }
  0x3f   : > { %4750 = vmatmul.msk.bf16.gmra.mxu2 %vm733_vm3, %v5769_v15  ;;  %v566_v61 = vrot.slane %v564_v48, 4  ;;  %v569_v62 = vrot.slane %v567_v50, 5  ;;  %v575_v63 = vrot.slane %v573_v51, 5  ;;  %v579_v0 = vrot.slane %v577_v52, 4 }
  0x40   : > { %v379_v1 = vrot.slane %v378_v53, 4  ;;  %v389_v2 = vrot.slane %v388_v58, 4  ;;  %v393_v3 = vrot.slane %v391_v54, 5  ;;  %v583_v4 = vshll.u32 %v5804_v60, 16 }
  0x41   : > { %v5809_v8 = vpack.c.b16 %v706_v57, %v705_v56  ;;  %v570_v9 = vor.u32 %v569_v62, %v566_v61  ;;  %v580_v10 = vor.u32 %v579_v0, %v575_v63  ;;  %v396_v22 = vshrl.u32 %v5812_v11, 16 }
  0x42   : > { %4823 = vmatmul.msk.bf16.gmra.mxu1 %vm733_vm3, %v5786_v32  ;;  %v384_v17 = vsel %vm5689_vm4, %v379_v1, %v383_v46  ;;  %v394_v19 = vsel %vm5689_vm4, %v389_v2, %v393_v3  ;;  %v585_v20 = vrot.slane %v583_v4, 5  ;;  %v399_v23 = vshll.u32 %v5812_v11, 16  ;;  %v5858_v2 = vld [vmem:[%s5651_s16 + $0x98] sm:$0x1] }
  0x43   : > { %v571_v24 = vrot.slane %v570_v9, 4  ;;  %v581_v25 = vrot.slane %v580_v10, 4  ;;  %v405_v27 = vshll.u32 %v5815_v12, 16  ;;  %v409_v28 = vshrl.u32 %v5815_v12, 16  ;;  %7641 = vst [vmem:[#allocation14_spill] sm:$0xff] %v5858_v2 }
  0x44   : > { %v691_v35 = vunpack.c.l.b16 %v384_v17  ;;  %v692_v36 = vunpack.c.l.b16 %v394_v19  ;;  %v398_v37 = vrot.slane %v396_v22, 4  ;;  %v401_v38 = vrot.slane %v399_v23, 5  ;;  %v5865_v10 = vld [vmem:[%s5651_s16 + $0x3c] sm:$0xf]  ;;  %v5868_v17 = vld [vmem:[%s5651_s16 + $0x40] sm:$0xf] }
  0x45   : > { %v576_v39 = vsel %vm5689_vm4, %v571_v24, %v575_v63  ;;  %v586_v41 = vsel %vm5689_vm4, %v581_v25, %v585_v20  ;;  %v407_v46 = vrot.slane %v405_v27, 5  ;;  %v411_v47 = vrot.slane %v409_v28, 4  ;;  %v5872_v24 = vld [vmem:[%s5651_s16 + $0x90] sm:$0xff] }
  0x46   : > { %v588_v48 = vshrl.u32 %v5836_v30, 16  ;;  %v591_v50 = vshll.u32 %v5836_v30, 16  ;;  %v597_v51 = vshll.u32 %v5839_v34, 16  ;;  %v601_v52 = vshrl.u32 %v5839_v34, 16  ;;  %7643 = vst [vmem:[#allocation16_spill] sm:$0xff] %v5872_v24 }
  0x47   : > { %v5854_v53 = vpack.c.b16 %v692_v36, %v691_v35  ;;  %v415_v54 = vshll.u32 %v5846_v42, 16  ;;  %v707_v56 = vunpack.c.l.b16 %v576_v39  ;;  %v708_v57 = vunpack.c.l.b16 %v586_v41  ;;  %v5879_v36 = vld [vmem:[%s5651_s16 + $0x9c] sm:$0xf] }
  0x48   : > { %v402_v58 = vor.u32 %v401_v38, %v398_v37  ;;  %v412_v61 = vor.u32 %v411_v47, %v407_v46  ;;  %v590_v62 = vrot.slane %v588_v48, 4  ;;  %v593_v63 = vrot.slane %v591_v50, 5  ;;  %7644 = vst [vmem:[#allocation17_spill] sm:$0xff] %v5879_v36  ;;  %v5888_v48 = vld [vmem:[%s5651_s16 + $0x30] sm:$0xff]  ;;  %v5893_v50 = vld [vmem:[%s5651_s16 + $0xa0] sm:$0xf] }
  0x49   : > { %v599_v0 = vrot.slane %v597_v51, 5  ;;  %v603_v1 = vrot.slane %v601_v52, 4  ;;  %v5862_v3 = vpack.c.b16 %v708_v57, %v707_v56  ;;  %v417_v9 = vrot.slane %v415_v54, 5  ;;  %7645 = vst [vmem:[#allocation18_spill] sm:$0xff] %v5893_v50 }
  0x4a   : > { %v403_v4 = vrot.slane %v402_v58, 4  ;;  %v413_v19 = vrot.slane %v412_v61, 4  ;;  %v594_v20 = vor.u32 %v593_v63, %v590_v62  ;;  %v607_v23 = vshll.u32 %v5858_v2, 16  ;;  %v5898_v62 = vld [vmem:[%s5651_s16 + $0x44] sm:$0x1] }
  0x4b   : > { %7642 = vst [vmem:[#allocation15_spill] sm:$0xff] %v5862_v3  ;;  %v604_v22 = vor.u32 %v603_v1, %v599_v0  ;;  %v420_v25 = vshrl.u32 %v5865_v10, 16  ;;  %v423_v27 = vshll.u32 %v5865_v10, 16  ;;  %v429_v28 = vshll.u32 %v5868_v17, 16 }
  0x4c   : > { %4743 = vmatmul.msk.bf16.gmra.mxu0 %vm733_vm3, %v5801_v55  ;;  %v433_v35 = vshrl.u32 %v5868_v17, 16  ;;  %v408_v37 = vsel %vm5689_vm4, %v403_v4, %v407_v46  ;;  %v418_v38 = vsel %vm5689_vm4, %v413_v19, %v417_v9  ;;  %v595_v39 = vrot.slane %v594_v20, 4 }
  0x4d   : > { %v605_v41 = vrot.slane %v604_v22, 4  ;;  %v609_v47 = vrot.slane %v607_v23, 5  ;;  %v612_v51 = vshrl.u32 %v5879_v36, 16  ;;  %v615_v52 = vshll.u32 %v5879_v36, 16 }
  0x4e   : > { %4832 = vmatmul.msk.bf16.gmra.mxu3 %vm733_vm3, %v5818_v13  ;;  %v422_v54 = vrot.slane %v420_v25, 4  ;;  %v425_v46 = vrot.slane %v423_v27, 5  ;;  %v431_v56 = vrot.slane %v429_v28, 5  ;;  %v435_v57 = vrot.slane %v433_v35, 4  ;;  %v6020_v13 = vld [vmem:[%s5651_s16 + $0xbc] sm:$0x1] }
  0x4f   : > { %4751 = vmatmul.msk.bf16.gmra.mxu2 %vm733_vm3, %v5809_v8  ;;  %v693_v58 = vunpack.c.l.b16 %v408_v37  ;;  %v694_v61 = vunpack.c.l.b16 %v418_v38  ;;  %v600_v63 = vsel %vm5689_vm4, %v595_v39, %v599_v0  ;;  %v610_v1 = vsel %vm5689_vm4, %v605_v41, %v609_v47  ;;  %v5912_v38 = vld [vmem:[%s5651_s16 + $0xa4] sm:$0x1] }
  0x50   : > { %v621_v4 = vshll.u32 %v5893_v50, 16  ;;  %v625_v9 = vshrl.u32 %v5893_v50, 16  ;;  %v614_v19 = vrot.slane %v612_v51, 4  ;;  %v617_v20 = vrot.slane %v615_v52, 5  ;;  %7646 = vst [vmem:[#allocation19_spill] sm:$0xff] %v5912_v38 }
  0x51   : > { %v426_v22 = vor.u32 %v425_v46, %v422_v54  ;;  %v436_v23 = vor.u32 %v435_v57, %v431_v56  ;;  %v439_v25 = vshll.u32 %v5898_v62, 16  ;;  %v5909_v27 = vpack.c.b16 %v694_v61, %v693_v58  ;;  %v5919_v54 = vld [vmem:[%s5651_s16 + $0x48] sm:$0xf]  ;;  %v5923_v58 = vld [vmem:[%s5651_s16 + $0x4c] sm:$0xf]  ;;  %v5926_v61 = vld [vmem:[%s5651_s16 + $0x9c] sm:$0xff] }
  0x52   : > { %4824 = vmatmul.msk.bf16.gmra.mxu1 %vm733_vm3, %v5831_v29  ;;  %v709_v0 = vunpack.c.l.b16 %v600_v63  ;;  %v710_v28 = vunpack.c.l.b16 %v610_v1  ;;  %v623_v35 = vrot.slane %v621_v4, 5  ;;  %v627_v37 = vrot.slane %v625_v9, 4  ;;  %7648 = vst [vmem:[#allocation21_spill] sm:$0xff] %v5926_v61 }
  0x53   : > { %v618_v39 = vor.u32 %v617_v20, %v614_v19  ;;  %v427_v41 = vrot.slane %v426_v22, 4  ;;  %v437_v47 = vrot.slane %v436_v23, 4  ;;  %v441_v51 = vrot.slane %v439_v25, 5  ;;  %v5939_v23 = vld [vmem:[%s5651_s16 + $0xa8] sm:$0xf] }
  0x54   : > { %v5916_v52 = vpack.c.b16 %v710_v28, %v709_v0  ;;  %v628_v46 = vor.u32 %v627_v37, %v623_v35  ;;  %v631_v57 = vshll.u32 %v5912_v38, 16  ;;  %v444_v9 = vshrl.u32 %v5919_v54, 16  ;;  %7649 = vst [vmem:[#allocation22_spill] sm:$0xff] %v5939_v23  ;;  %v5942_v25 = vld [vmem:[%s5651_s16 + $0xac] sm:$0xf]  ;;  %v5945_v28 = vld [vmem:[%s5651_s16 + $0x3c] sm:$0xff] }
  0x55   : > { %v619_v63 = vrot.slane %v618_v39, 4  ;;  %v432_v1 = vsel %vm5689_vm4, %v427_v41, %v431_v56  ;;  %v442_v4 = vsel %vm5689_vm4, %v437_v47, %v441_v51  ;;  %v447_v19 = vshll.u32 %v5919_v54, 16  ;;  %7650 = vst [vmem:[#allocation23_spill] sm:$0xff] %v5942_v25 }
  0x56   : > { %7647 = vst [vmem:[#allocation20_spill] sm:$0xff] %v5916_v52  ;;  %v453_v20 = vshll.u32 %v5923_v58, 16  ;;  %v457_v22 = vshrl.u32 %v5923_v58, 16  ;;  %v629_v0 = vrot.slane %v628_v46, 4  ;;  %v633_v56 = vrot.slane %v631_v57, 5 }
  0x57   : > { %v695_v37 = vunpack.c.l.b16 %v432_v1  ;;  %v696_v39 = vunpack.c.l.b16 %v442_v4  ;;  %v624_v41 = vsel %vm5689_vm4, %v619_v63, %v623_v35  ;;  %v636_v47 = vshrl.u32 %v5939_v23, 16  ;;  %v5960_v35 = vld [vmem:[%s5651_s16 + $0x50] sm:$0x1] }
  0x58   : > { %v639_v51 = vshll.u32 %v5939_v23, 16  ;;  %v649_v46 = vshrl.u32 %v5942_v25, 16  ;;  %v446_v57 = vrot.slane %v444_v9, 4  ;;  %v449_v36 = vrot.slane %v447_v19, 5 }
  0x59   : > { %v455_v38 = vrot.slane %v453_v20, 5  ;;  %v459_v50 = vrot.slane %v457_v22, 4  ;;  %v634_v1 = vsel %vm5689_vm4, %v629_v0, %v633_v56  ;;  %v5962_v63 = vpack.c.b16 %v696_v39, %v695_v37  ;;  %v5966_v56 = vld [vmem:[%s5651_s16 + $0xb0] sm:$0x1] }
  0x5a   : > { %v711_v4 = vunpack.c.l.b16 %v624_v41  ;;  %v638_v23 = vrot.slane %v636_v47, 4  ;;  %v651_v9 = vrot.slane %v649_v46, 4  ;;  %v712_v19 = vunpack.c.l.b16 %v634_v1  ;;  %7651 = vst [vmem:[#allocation24_spill] sm:$0xff] %v5966_v56 }
  0x5b   : > { %v450_v20 = vor.u32 %v449_v36, %v446_v57  ;;  %v460_v22 = vor.u32 %v459_v50, %v455_v38  ;;  %v463_v0 = vshll.u32 %v5960_v35, 16  ;;  %v655_v37 = vshll.u32 %v5966_v56, 16  ;;  %v5974_v36 = vld [vmem:[%s5651_s16 + $0x54] sm:$0xf]  ;;  %v5977_v50 = vld [vmem:[%s5651_s16 + $0xa8] sm:$0xff] }
  0x5c   : > { %4744 = vmatmul.msk.bf16.gmra.mxu0 %vm733_vm3, %v5854_v53  ;;  %v5971_v39 = vpack.c.b16 %v712_v19, %v711_v4  ;;  %7653 = vst [vmem:[#allocation26_spill] sm:$0xff] %v5977_v50  ;;  %v468_v4 = vshrl.u32 %v5974_v36, 16  ;;  %v5991_v19 = vld [vmem:[%s5651_s16 + $0x48] sm:$0xff] }
  0x5d   : > { %v461_v41 = vrot.slane %v460_v22, 4  ;;  %v465_v47 = vrot.slane %v463_v0, 5  ;;  %v657_v46 = vrot.slane %v655_v37, 5 }
  0x5e   : > { %4833 = vmatmul.msk.bf16.gmra.mxu3 %vm733_vm3, %v5872_v24  ;;  %7652 = vst [vmem:[#allocation25_spill] sm:$0xff] %v5971_v39 }
  0x5f   : > { %4752 = vmatmul.msk.bf16.gmra.mxu2 %vm733_vm3, %v5862_v3  ;;  %v466_v1 = vsel %vm5689_vm4, %v461_v41, %v465_v47  ;;  %v470_v41 = vrot.slane %v468_v4, 4 }
  0x60   : > { %v698_v0 = vunpack.c.l.b16 %v466_v1 }
  0x62   : > { %4825 = vmatmul.msk.bf16.gmra.mxu1 %vm733_vm3, %v5888_v48 }
  0x6c   : > { %4745 = vmatmul.msk.bf16.gmra.mxu0 %vm733_vm3, %v5909_v27 }
  0x6e   : > { %4834 = vmatmul.msk.bf16.gmra.mxu3 %vm733_vm3, %v5926_v61  ;;  %v641_v61 = vrot.slane %v639_v51, 5  ;;  %v5980_v51 = vld [vmem:[%s5651_s16 + $0x58] sm:$0xf] }
  0x6f   : > { %4753 = vmatmul.msk.bf16.gmra.mxu2 %vm733_vm3, %v5916_v52  ;;  %v645_v52 = vshll.u32 %v5942_v25, 16 }
  0x70   : > { %v642_v24 = vor.u32 %v641_v61, %v638_v23 }
  0x71   : > { %v647_v25 = vrot.slane %v645_v52, 5  ;;  %v451_v52 = vrot.slane %v450_v20, 4  ;;  %v477_v20 = vshll.u32 %v5980_v51, 16 }
  0x72   : > { %4826 = vmatmul.msk.bf16.gmra.mxu1 %vm733_vm3, %v5945_v28  ;;  %v643_v61 = vrot.slane %v642_v24, 4  ;;  %v5996_v24 = vld [vmem:[%s5651_s16 + $0xb4] sm:$0xf] }
  0x73   : > { %v652_v3 = vor.u32 %v651_v9, %v647_v25  ;;  %v456_v57 = vsel %vm5689_vm4, %v451_v52, %v455_v38  ;;  %v471_v9 = vshll.u32 %v5974_v36, 16  ;;  %7654 = vst [vmem:[#allocation27_spill] sm:$0xff] %v5996_v24  ;;  %v6001_v38 = vld [vmem:[%s5651_s16 + $0xb8] sm:$0xf]  ;;  %v663_v56 = vshll.u32 %v5996_v24, 16 }
  0x74   : > { %7655 = vst [vmem:[#allocation28_spill] sm:$0xff] %v6001_v38  ;;  %v697_v22 = vunpack.c.l.b16 %v456_v57  ;;  %v648_v37 = vsel %vm5689_vm4, %v643_v61, %v647_v25  ;;  %v669_v57 = vshll.u32 %v6001_v38, 16  ;;  %v673_v1 = vshrl.u32 %v6001_v38, 16  ;;  %v6014_v25 = vld [vmem:[%s5651_s16 + $0x5c] sm:$0x1] }
  0x75   : > { %v653_v23 = vrot.slane %v652_v3, 4  ;;  %v481_v3 = vshrl.u32 %v5980_v51, 16  ;;  %v473_v47 = vrot.slane %v471_v9, 5  ;;  %v665_v2 = vrot.slane %v663_v56, 5 }
  0x76   : > { %v6016_v61 = vpack.c.b16 %v698_v0, %v697_v22  ;;  %v487_v34 = vshll.u32 %v6014_v25, 16 }
  0x77   : > { %v658_v52 = vsel %vm5689_vm4, %v653_v23, %v657_v46  ;;  %v483_v30 = vrot.slane %v481_v3, 4  ;;  %v713_v23 = vunpack.c.l.b16 %v648_v37  ;;  %v474_v4 = vor.u32 %v473_v47, %v470_v41 }
  0x78   : > { %v714_v46 = vunpack.c.l.b16 %v658_v52  ;;  %v675_v3 = vrot.slane %v673_v1, 4  ;;  %v679_v37 = vshll.u32 %v6020_v13, 16  ;;  %v4926_v1 = vld [vmem:[%s7538_s1 + $0xc] sm:$0x3] }
  0x79   : > { %v475_v22 = vrot.slane %v474_v4, 4  ;;  %v1123_v4 = vrot.slane %v5704_v45, 5 }
  0x7a   : > { %v6024_v38 = vpack.c.b16 %v714_v46, %v713_v23  ;;  %v6043_v23 = vld [vmem:[%s5651_s16 + $0x54] sm:$0xff]  ;;  %v1889_v46 = vsel %vm782_vm0, %v4926_v1, 0 }
  0x7b   : > { %1898 = vmatpush.bf16.msra.mxu2 %v1889_v46 }
  0x7c   : > { %4746 = vmatmul.msk.bf16.gmra.mxu0 %vm733_vm3, %v5962_v63  ;;  %7656 = vst [vmem:[#allocation29_spill] sm:$0xff] %v6024_v38 }
  0x7e   : > { %4835 = vmatmul.msk.bf16.gmra.mxu3 %vm733_vm3, %v5977_v50  ;;  %v479_v50 = vrot.slane %v477_v20, 5  ;;  %v671_v20 = vrot.slane %v669_v57, 5  ;;  %v681_v57 = vrot.slane %v679_v37, 5 }
  0x7f   : > { %4754 = vmatmul.msk.bf16.gmra.mxu2 %vm733_vm3, %v5971_v39  ;;  %v660_v39 = vshrl.u32 %v5996_v24, 16 }
  0x80   : > { %v484_v24 = vor.u32 %v483_v30, %v479_v50  ;;  %v676_v56 = vor.u32 %v675_v3, %v671_v20  ;;  %v6028_v30 = vld [vmem:[%s5651_s16 + $0xb4] sm:$0xff]  ;;  %v480_v41 = vsel %vm5689_vm4, %v475_v22, %v479_v50 }
  0x81   : > { %v662_v9 = vrot.slane %v660_v39, 4  ;;  %v489_v39 = vrot.slane %v487_v34, 5  ;;  %v699_v3 = vunpack.c.l.b16 %v480_v41 }
  0x82   : > { %4827 = vmatmul.msk.bf16.gmra.mxu1 %vm733_vm3, %v5991_v19  ;;  %v485_v52 = vrot.slane %v484_v24, 4  ;;  %v677_v24 = vrot.slane %v676_v56, 4  ;;  %v4838_v56 = vrot.slane %v5698_v40, 9 }
  0x83   : > { %v666_v0 = vor.u32 %v665_v2, %v662_v9  ;;  %v4947_v2 = vld [vmem:[%s7538_s1 + $0xe] sm:$0x3]  ;;  %v1126_v9 = vrot.slane %v5711_v49, 5  ;;  %v4965_v49 = vld [vmem:[%s7538_s1 + $0x10] sm:$0x3] }
  0x84   : > { %v490_v34 = vsel %vm5689_vm4, %v485_v52, %v489_v39  ;;  %v2045_v50 = vsel %vm782_vm0, %v4947_v2, 0  ;;  %v682_v52 = vsel %vm5689_vm4, %v677_v24, %v681_v57  ;;  %v2185_v39 = vsel %vm782_vm0, %v4965_v49, 0 }
  0x85   : > { %v667_v47 = vrot.slane %v666_v0, 4  ;;  %2054 = vmatpush.bf16.msra.mxu3 %v2045_v50  ;;  %v700_v22 = vunpack.c.l.b16 %v490_v34  ;;  %v4909_v0 = vld [vmem:[%s7538_s1 + $0xa] sm:$0x3]  ;;  %2194 = vmatpush.bf16.msra.mxu0 %v2185_v39  ;;  %v716_v57 = vunpack.c.l.b16 %v682_v52  ;;  %v1124_v2 = vsel %vm6068_vm7, %v4838_v56, %v1123_v4 }
  0x86   : > { %v1755_v45 = vsel %vm782_vm0, %v4909_v0, 0  ;;  %v1116_v24 = vrot.slane %v5666_v6, 5  ;;  %v1230_v46 = vunpack.c.l.b16 %v1124_v2  ;;  %v1133_v49 = vrot.slane %v5750_v43, 5 }
  0x87   : > { %v672_v37 = vsel %vm5689_vm4, %v667_v47, %v671_v20  ;;  %1764 = vmatpush.bf16.msrb.mxu1 %v1755_v45  ;;  %v1125_v20 = vrot.slane %v1123_v4, 4  ;;  %v6066_v41 = vpack.c.b16 %v700_v22, %v699_v3  ;;  %v1119_v3 = vrot.slane %v5669_v7, 5 }
  0x88   : > { %v715_v47 = vunpack.c.l.b16 %v672_v37  ;;  %v4837_v22 = vrot.slane %v5663_v5, 9  ;;  %v1118_v4 = vrot.slane %v1116_v24, 4  ;;  %v1130_v37 = vrot.slane %v5733_v26, 5 }
  0x89   : > { %7657 = vst [vmem:[#allocation30_spill] sm:$0xff] %v6066_v41  ;;  %v1127_v34 = vsel %vm6068_vm7, %v1125_v20, %v1126_v9  ;;  %v4839_v7 = vrot.slane %v5730_v21, 9 }
  0x8a   : > { %v6078_v40 = vpack.c.b16 %v716_v57, %v715_v47  ;;  %v1231_v50 = vunpack.c.l.b16 %v1127_v34  ;;  %v1117_v6 = vsel %vm6068_vm7, %v4837_v22, %v1116_v24  ;;  %v1120_v45 = vsel %vm6068_vm7, %v1118_v4, %v1119_v3 }
  0x8b   : > { %v1132_v5 = vrot.slane %v1130_v37, 4  ;;  %v1228_v39 = vunpack.c.l.b16 %v1117_v6  ;;  %v1229_v56 = vunpack.c.l.b16 %v1120_v45  ;;  %v1131_v47 = vsel %vm6068_vm7, %v4839_v7, %v1130_v37 }
  0x8c   : > { %4747 = vmatmul.msk.bf16.gmra.mxu0 %vm733_vm3, %v6016_v61  ;;  %v1261_v0 = vpack.c.b16 %v1231_v50, %v1230_v46  ;;  %v1232_v34 = vunpack.c.l.b16 %v1131_v47  ;;  %v1137_v4 = vrot.slane %v5772_v18, 5  ;;  %v4840_v37 = vrot.slane %v5765_v14, 9 }
  0x8d   : > { %v1134_v57 = vsel %vm6068_vm7, %v1132_v5, %v1133_v49  ;;  %v1260_v2 = vpack.c.b16 %v1229_v56, %v1228_v39  ;;  %v1140_v45 = vrot.slane %v5796_v44, 5 }
  0x8e   : > { %4836 = vmatmul.msk.bf16.gmra.mxu3 %vm733_vm3, %v6028_v30  ;;  %v1233_v24 = vunpack.c.l.b16 %v1134_v57  ;;  %v1139_v6 = vrot.slane %v1137_v4, 4 }
  0x8f   : > { %4755 = vmatmul.msk.bf16.gmra.mxu2 %vm733_vm3, %v6024_v38 }
  0x90   : > { %v6104_v46 = vpack.c.b16 %v1233_v24, %v1232_v34  ;;  %v1141_v18 = vsel %vm6068_vm7, %v1139_v6, %v1140_v45 }
  0x92   : > { %4828 = vmatmul.msk.bf16.gmra.mxu1 %vm733_vm3, %v6043_v23 }
  0x9c   : > { %4748 = vmatmul.msk.bf16.gmra.mxu0 %vm733_vm3, %v6066_v41 }
  0x9e   : > { %4875 = vmatmul.msk.bf16.vlgmr.msrb.gmra.mxu3 %vm733_vm3, %v5742_v33 }
  0x9f   : > { %4756 = vmatmul.msk.bf16.gmra.mxu2 %vm733_vm3, %v6078_v40  ;;  %v1015_v9 = vpop.f32.mrf.mxu1 }
  0xa1   : > { %v1055_v52 = vpop.f32.mrf.mxu3 }
  0xa2   : > { %4910 = vmatmul.msk.bf16.vlgmr.msrb.gmra.mxu1 %vm733_vm3, %v1261_v0 }
  0xa7   : > { %v1017_v26 = vpop.f32.mrf.mxu1 }
  0xa9   : > { %v795_v33 = vpop.f32.mrf.mxu0  ;;  %v1057_v21 = vpop.f32.mrf.mxu3 }
  0xaa   : > { %v6095_v20 = vadd.f32 %v1015_v9, %v795_v33  ;;  %v1235_v33 = vunpack.c.l.b16 %v1141_v18 }
  0xac   : > { %4892 = vmatmul.msk.bf16.vlgmr.msrb.gmra.mxu0 %vm733_vm3, %v5761_v59 }
  0xae   : > { %4876 = vmatmul.msk.bf16.gmra.mxu3 %vm733_vm3, %v5786_v32  ;;  %v1138_v32 = vsel %vm6068_vm7, %v4840_v37, %v1137_v4 }
  0xaf   : > { %4854 = vmatmul.msk.bf16.vlgmr.msrb.gmra.mxu2 %vm733_vm3, %v1260_v2  ;;  %v1020_v3 = vpop.f32.mrf.mxu1  ;;  %v1234_v56 = vunpack.c.l.b16 %v1138_v32 }
  0xb1   : > { %v797_v43 = vpop.f32.mrf.mxu0  ;;  %v1060_v59 = vpop.f32.mrf.mxu3 }
  0xb2   : > { %v6106_v50 = vadd.f32 %v1017_v26, %v797_v43  ;;  %v835_v22 = vpop.f32.mrf.mxu2  ;;  %4911 = vmatmul.msk.bf16.gmra.mxu1 %vm733_vm3, %v6104_v46  ;;  %v6128_v26 = vpack.c.b16 %v1235_v33, %v1234_v56 }
  0xb3   : > { %v6111_v9 = vadd.f32 %v1055_v52, %v835_v22 }
  0xb7   : > { %v1022_v49 = vpop.f32.mrf.mxu1 }
  0xb9   : > { %v800_v7 = vpop.f32.mrf.mxu0  ;;  %v1062_v14 = vpop.f32.mrf.mxu3 }
  0xba   : > { %v6117_v5 = vadd.f32 %v1020_v3, %v800_v7  ;;  %v837_v52 = vpop.f32.mrf.mxu2  ;;  %v1147_v3 = vrot.slane %v5846_v42, 5 }
  0xbb   : > { %v6123_v39 = vadd.f32 %v1057_v21, %v837_v52  ;;  %v1144_v21 = vrot.slane %v5815_v12, 5 }
  0xbc   : > { %4893 = vmatmul.msk.bf16.gmra.mxu0 %vm733_vm3, %v5801_v55 }
  0xbd   : > { %v1146_v43 = vrot.slane %v1144_v21, 4 }
  0xbe   : > { %4877 = vmatmul.msk.bf16.gmra.mxu3 %vm733_vm3, %v5831_v29 }
  0xbf   : > { %4855 = vmatmul.msk.bf16.gmra.mxu2 %vm733_vm3, %v1261_v0  ;;  %v1025_v57 = vpop.f32.mrf.mxu1  ;;  %v4841_v0 = vrot.slane %v5812_v11, 9  ;;  %v1148_v12 = vsel %vm6068_vm7, %v1146_v43, %v1147_v3 }
  0xc0   : > { %v1237_v7 = vunpack.c.l.b16 %v1148_v12 }
  0xc1   : > { %v802_v44 = vpop.f32.mrf.mxu0  ;;  %v1065_v24 = vpop.f32.mrf.mxu3  ;;  %v1145_v29 = vsel %vm6068_vm7, %v4841_v0, %v1144_v21 }
  0xc2   : > { %v6130_v47 = vadd.f32 %v1022_v49, %v802_v44  ;;  %v840_v2 = vpop.f32.mrf.mxu2  ;;  %4912 = vmatmul.msk.bf16.gmra.mxu1 %vm733_vm3, %v6128_v26  ;;  %v1236_v45 = vunpack.c.l.b16 %v1145_v29  ;;  %v1154_v44 = vrot.slane %v5898_v62, 5 }
  0xc3   : > { %v6135_v34 = vadd.f32 %v1060_v59, %v840_v2 }
  0xc4   : > { %v6153_v49 = vpack.c.b16 %v1237_v7, %v1236_v45  ;;  %v1158_v45 = vrot.slane %v5923_v58, 5 }
  0xc7   : > { %v1027_v37 = vpop.f32.mrf.mxu1 }
  0xc9   : > { %v805_v22 = vpop.f32.mrf.mxu0  ;;  %v1067_v11 = vpop.f32.mrf.mxu3 }
  0xca   : > { %v6141_v4 = vadd.f32 %v1025_v57, %v805_v22  ;;  %v842_v59 = vpop.f32.mrf.mxu2  ;;  %v4842_v57 = vrot.slane %v5865_v10, 9 }
  0xcb   : > { %v6147_v6 = vadd.f32 %v1062_v14, %v842_v59  ;;  %v1151_v14 = vrot.slane %v5868_v17, 5 }
  0xcc   : > { %4894 = vmatmul.msk.bf16.gmra.mxu0 %vm733_vm3, %v5854_v53 }
  0xcd   : > { %v1153_v2 = vrot.slane %v1151_v14, 4 }
  0xce   : > { %4878 = vmatmul.msk.bf16.gmra.mxu3 %vm733_vm3, %v5888_v48  ;;  %v1152_v48 = vsel %vm6068_vm7, %v4842_v57, %v1151_v14  ;;  %v1160_v14 = vrot.slane %v1158_v45, 4 }
  0xcf   : > { %4856 = vmatmul.msk.bf16.gmra.mxu2 %vm733_vm3, %v6104_v46  ;;  %v1030_v18 = vpop.f32.mrf.mxu1  ;;  %v1155_v17 = vsel %vm6068_vm7, %v1153_v2, %v1154_v44  ;;  %v1238_v22 = vunpack.c.l.b16 %v1152_v48 }
  0xd0   : > { %v1239_v10 = vunpack.c.l.b16 %v1155_v17 }
  0xd1   : > { %v807_v42 = vpop.f32.mrf.mxu0  ;;  %v1070_v33 = vpop.f32.mrf.mxu3 }
  0xd2   : > { %v6155_v32 = vadd.f32 %v1027_v37, %v807_v42  ;;  %v845_v52 = vpop.f32.mrf.mxu2  ;;  %4913 = vmatmul.msk.bf16.gmra.mxu1 %vm733_vm3, %v6153_v49  ;;  %v6178_v29 = vpack.c.b16 %v1239_v10, %v1238_v22  ;;  %v1165_v10 = vrot.slane %v5980_v51, 5 }
  0xd3   : > { %v6160_v56 = vadd.f32 %v1065_v24, %v845_v52  ;;  %v4843_v52 = vrot.slane %v5919_v54, 9 }
  0xd7   : > { %v1032_v43 = vpop.f32.mrf.mxu1 }
  0xd9   : > { %v810_v21 = vpop.f32.mrf.mxu0  ;;  %v1072_v62 = vpop.f32.mrf.mxu3 }
  0xda   : > { %v6166_v0 = vadd.f32 %v1030_v18, %v810_v21  ;;  %v847_v24 = vpop.f32.mrf.mxu2  ;;  %v1161_v18 = vrot.slane %v5960_v35, 5 }
  0xdb   : > { %v6172_v3 = vadd.f32 %v1067_v11, %v847_v24 }
  0xdc   : > { %4895 = vmatmul.msk.bf16.gmra.mxu0 %vm733_vm3, %v5909_v27  ;;  %v1162_v58 = vsel %vm6068_vm7, %v1160_v14, %v1161_v18  ;;  %v1167_v18 = vrot.slane %v1165_v10, 4 }
  0xdd   : > { %v1241_v54 = vunpack.c.l.b16 %v1162_v58 }
  0xde   : > { %4879 = vmatmul.msk.bf16.gmra.mxu3 %vm733_vm3, %v5945_v28  ;;  %v1159_v28 = vsel %vm6068_vm7, %v4843_v52, %v1158_v45  ;;  %v4844_v45 = vrot.slane %v5974_v36, 9 }
  0xdf   : > { %4857 = vmatmul.msk.bf16.gmra.mxu2 %vm733_vm3, %v6128_v26  ;;  %v1035_v59 = vpop.f32.mrf.mxu1 }
  0xe1   : > { %v812_v37 = vpop.f32.mrf.mxu0  ;;  %v1075_v42 = vpop.f32.mrf.mxu3 }
  0xe2   : > { %v6180_v12 = vadd.f32 %v1032_v43, %v812_v37  ;;  %v850_v11 = vpop.f32.mrf.mxu2  ;;  %4914 = vmatmul.msk.bf16.gmra.mxu1 %vm733_vm3, %v6178_v29  ;;  %v1240_v43 = vunpack.c.l.b16 %v1159_v28 }
  0xe3   : > { %v6185_v7 = vadd.f32 %v1070_v33, %v850_v11  ;;  %v1168_v11 = vrot.slane %v6014_v25, 5 }
  0xe4   : > { %v6203_v17 = vpack.c.b16 %v1241_v54, %v1240_v43 }
  0xe5   : > { %v1169_v51 = vsel %vm6068_vm7, %v1167_v18, %v1168_v11  ;;  %v5428_v11 = vld [vmem:[%s5651_s16 + $0x68] sm:$0x1]  ;;  %v5429_v18 = vld [vmem:[%s5651_s16 + $0x60] sm:$0xf] }
  0xe6   : > { %7661 = vst [vmem:[#allocation32_spill] sm:$0xff] %v6203_v17  ;;  %v1243_v28 = vunpack.c.l.b16 %v1169_v51 }
  0xe7   : > { %v1037_v2 = vpop.f32.mrf.mxu1 }
  0xe9   : > { %v815_v44 = vpop.f32.mrf.mxu0  ;;  %v1077_v35 = vpop.f32.mrf.mxu3 }
  0xea   : > { %v6191_v57 = vadd.f32 %v1035_v59, %v815_v44  ;;  %v852_v33 = vpop.f32.mrf.mxu2 }
  0xeb   : > { %v6197_v21 = vadd.f32 %v1072_v62, %v852_v33 }
  0xec   : > { %4896 = vmatmul.msk.bf16.gmra.mxu0 %vm733_vm3, %v5962_v63 }
  0xed   : > { %7660 = vst [vmem:[#allocation31_spill] sm:$0xff] %v6197_v21 }
  0xee   : > { %4880 = vmatmul.msk.bf16.gmra.mxu3 %vm733_vm3, %v5991_v19  ;;  %v1166_v19 = vsel %vm6068_vm7, %v4844_v45, %v1165_v10  ;;  %v1175_v45 = vrot.slane %v5428_v11, 5 }
  0xef   : > { %4858 = vmatmul.msk.bf16.gmra.mxu2 %vm733_vm3, %v6153_v49  ;;  %v1040_v22 = vpop.f32.mrf.mxu1  ;;  %v1242_v25 = vunpack.c.l.b16 %v1166_v19 }
  0xf1   : > { %v817_v48 = vpop.f32.mrf.mxu0  ;;  %v1080_v59 = vpop.f32.mrf.mxu3  ;;  %v6228_v33 = vpack.c.b16 %v1243_v28, %v1242_v25 }
  0xf2   : > { %v6205_v24 = vadd.f32 %v1037_v2, %v817_v48  ;;  %v855_v62 = vpop.f32.mrf.mxu2  ;;  %4915 = vmatmul.msk.bf16.gmra.mxu1 %vm733_vm3, %v6203_v17  ;;  %v5427_v48 = vld [vmem:[%s5651_s16 + $0x64] sm:$0xf] }
  0xf3   : > { %v6210_v37 = vadd.f32 %v1075_v42, %v855_v62  ;;  %7664 = vst [vmem:[#allocation35_spill] sm:$0xff] %v6228_v33 }
  0xf5   : > { %7662 = vst [vmem:[#allocation33_spill] sm:$0xff] %v6210_v37 }
  0xf7   : > { %v1042_v44 = vpop.f32.mrf.mxu1 }
  0xf9   : > { %v820_v52 = vpop.f32.mrf.mxu0  ;;  %v1082_v36 = vpop.f32.mrf.mxu3 }
  0xfa   : > { %v6216_v14 = vadd.f32 %v1040_v22, %v820_v52  ;;  %v857_v42 = vpop.f32.mrf.mxu2  ;;  %v1172_v22 = vrot.slane %v5427_v48, 5  ;;  %v4845_v52 = vrot.slane %v5429_v18, 9 }
  0xfb   : > { %v6222_v2 = vadd.f32 %v1077_v35, %v857_v42 }
  0xfc   : > { %4897 = vmatmul.msk.bf16.gmra.mxu0 %vm733_vm3, %v6016_v61  ;;  %v1174_v19 = vrot.slane %v1172_v22, 4  ;;  %v1173_v42 = vsel %vm6068_vm7, %v4845_v52, %v1172_v22  ;;  %v5431_v52 = vld [vmem:[%s5651_s16 + $0x70] sm:$0xf] }
  0xfd   : > { %7663 = vst [vmem:[#allocation34_spill] sm:$0xff] %v6222_v2 }
  0xfe   : > { %4881 = vmatmul.msk.bf16.gmra.mxu3 %vm733_vm3, %v6043_v23 }
  0xff   : > { %4859 = vmatmul.msk.bf16.gmra.mxu2 %vm733_vm3, %v6178_v29  ;;  %v1045_v35 = vpop.f32.mrf.mxu1 }
 0x101   : > { %v822_v58 = vpop.f32.mrf.mxu0  ;;  %v1085_v10 = vpop.f32.mrf.mxu3 }
 0x102   : > { %v6230_v43 = vadd.f32 %v1042_v44, %v822_v58  ;;  %v860_v54 = vpop.f32.mrf.mxu2  ;;  %4916 = vmatmul.msk.bf16.gmra.mxu1 %vm733_vm3, %v6228_v33 }
 0x103   : > { %v6235_v62 = vadd.f32 %v1080_v59, %v860_v54  ;;  %v1176_v59 = vsel %vm6068_vm7, %v1174_v19, %v1175_v45  ;;  %v1244_v54 = vunpack.c.l.b16 %v1173_v42  ;;  %v6258_v45 = vld [vmem:[%s5651_s16 + $0x60] sm:$0xff]  ;;  %v1179_v19 = vrot.slane %v5431_v52, 5 }
 0x104   : > { %v1245_v48 = vunpack.c.l.b16 %v1176_v59  ;;  %7668 = vst [vmem:[#allocation39_spill] sm:$0xff] %v6258_v45  ;;  %v5432_v59 = vld [vmem:[%s5651_s16 + $0x74] sm:$0x1] }
 0x105   : > { %7665 = vst [vmem:[#allocation36_spill] sm:$0xff] %v6235_v62 }
 0x106   : > { %v6253_v22 = vpack.c.b16 %v1245_v48, %v1244_v54  ;;  %v5308_v54 = vld [vmem:[#allocation3 + $0x78] sm:$0xff] }
 0x107   : > { %v1047_v23 = vpop.f32.mrf.mxu1  ;;  %2827 = vmatpush.bf16.msra.mxu1 %v5308_v54 }
 0x108   : > { %7667 = vst [vmem:[#allocation38_spill] sm:$0xff] %v6253_v22 }
 0x109   : > { %v825_v44 = vpop.f32.mrf.mxu0  ;;  %v1087_v58 = vpop.f32.mrf.mxu3 }
 0x10a   : > { %v6241_v51 = vadd.f32 %v1045_v35, %v825_v44  ;;  %v862_v25 = vpop.f32.mrf.mxu2 }
 0x10b   : > { %v6247_v28 = vadd.f32 %v1082_v36, %v862_v25  ;;  %v1182_v25 = vrot.slane %v5432_v59, 5 }
 0x10c   : > { %4898 = vmatmul.msk.bf16.gmra.mxu0 %vm733_vm3, %v6066_v41 }
 0x10d   : > { %7666 = vst [vmem:[#allocation37_spill] sm:$0xff] %v6247_v28 }
 0x10e   : > { %4882 = vmatmul.msk.bf16.gmra.mxu3 %vm733_vm3, %v6258_v45 }
 0x10f   : > { %4860 = vmatmul.msk.bf16.gmra.mxu2 %vm733_vm3, %v6203_v17  ;;  %v1050_v36 = vpop.f32.mrf.mxu1 }
 0x111   : > { %v827_v35 = vpop.f32.mrf.mxu0  ;;  %v1090_v42 = vpop.f32.mrf.mxu3 }
 0x112   : > { %v6255_v11 = vadd.f32 %v1047_v23, %v827_v35  ;;  %v865_v18 = vpop.f32.mrf.mxu2  ;;  %4917 = vmatmul.msk.bf16.gmra.mxu1 %vm733_vm3, %v6253_v22  ;;  %v5433_v23 = vld [vmem:[%s5651_s16 + $0x6c] sm:$0xf]  ;;  %v1181_v35 = vrot.slane %v1179_v19, 4 }
 0x113   : > { %v6263_v44 = vadd.f32 %v1085_v10, %v865_v18  ;;  %v4846_v48 = vrot.slane %v5433_v23, 9 }
 0x114   : > { %v1183_v18 = vsel %vm6068_vm7, %v1181_v35, %v1182_v25  ;;  %v6286_v25 = vld [vmem:[%s5651_s16 + $0x6c] sm:$0xff]  ;;  %v5435_v35 = vld [vmem:[%s5651_s16 + $0x7c] sm:$0xf] }
 0x115   : > { %7669 = vst [vmem:[#allocation40_spill] sm:$0xff] %v6263_v44  ;;  %v1180_v10 = vsel %vm6068_vm7, %v4846_v48, %v1179_v19  ;;  %v1247_v23 = vunpack.c.l.b16 %v1183_v18 }
 0x116   : > { %v1246_v54 = vunpack.c.l.b16 %v1180_v10  ;;  %7671 = vst [vmem:[#allocation42_spill] sm:$0xff] %v6286_v25 }
 0x117   : > { %v1052_v62 = vpop.f32.mrf.mxu1 }
 0x119   : > { %v830_v28 = vpop.f32.mrf.mxu0  ;;  %v1092_v59 = vpop.f32.mrf.mxu3 }
 0x11a   : > { %v6269_v45 = vadd.f32 %v1050_v36, %v830_v28  ;;  %v867_v52 = vpop.f32.mrf.mxu2  ;;  %v6281_v36 = vpack.c.b16 %v1247_v23, %v1246_v54  ;;  %v5437_v23 = vld [vmem:[%s5651_s16 + $0x78] sm:$0xf] }
 0x11b   : > { %v6275_v44 = vadd.f32 %v1087_v58, %v867_v52  ;;  %v1186_v52 = vrot.slane %v5435_v35, 5 }
 0x11c   : > { %4899 = vmatmul.msk.bf16.gmra.mxu0 %vm733_vm3, %v5726_v16 }
 0x11d   : > { %7670 = vst [vmem:[#allocation41_spill] sm:$0xff] %v6275_v44  ;;  %v5436_v44 = vld [vmem:[%s5651_s16 + $0x80] sm:$0x1] }
 0x11e   : > { %4883 = vmatmul.msk.bf16.gmra.mxu3 %vm733_vm3, %v6286_v25  ;;  %v1189_v54 = vrot.slane %v5436_v44, 5 }
 0x11f   : > { %4861 = vmatmul.msk.bf16.gmra.mxu2 %vm733_vm3, %v6228_v33  ;;  %v1766_v58 = vpop.f32.mrf.mxu1 }
 0x121   : > { %v832_v28 = vpop.f32.mrf.mxu0  ;;  %v1470_v18 = vpop.f32.mrf.mxu3 }
 0x122   : > { %v6283_v19 = vadd.f32 %v1052_v62, %v832_v28  ;;  %v870_v48 = vpop.f32.mrf.mxu2  ;;  %4918 = vmatmul.msk.bf16.gmra.mxu1 %vm733_vm3, %v6281_v36  ;;  %v4847_v62 = vrot.slane %v5437_v23, 9  ;;  %v1188_v28 = vrot.slane %v1186_v52, 4 }
 0x123   : > { %v6291_v10 = vadd.f32 %v1090_v42, %v870_v48 }
 0x124   : > { %v1187_v25 = vsel %vm6068_vm7, %v4847_v62, %v1186_v52  ;;  %v1190_v42 = vsel %vm6068_vm7, %v1188_v28, %v1189_v54  ;;  %v6310_v52 = vld [vmem:[%s5651_s16 + $0x78] sm:$0xff]  ;;  %v5439_v62 = vld [vmem:[%s5651_s16 + $0x88] sm:$0xf] }
 0x125   : > { %7672 = vst [vmem:[#allocation43_spill] sm:$0xff] %v6291_v10  ;;  %v1248_v10 = vunpack.c.l.b16 %v1187_v25  ;;  %v1249_v2 = vunpack.c.l.b16 %v1190_v42  ;;  %v1193_v28 = vrot.slane %v5439_v62, 5  ;;  %v1196_v42 = vrot.slane %v5804_v60, 5 }
 0x126   : > { %7674 = vst [vmem:[#allocation45_spill] sm:$0xff] %v6310_v52 }
 0x127   : > { %v1768_v33 = vpop.f32.mrf.mxu1  ;;  %v6307_v37 = vpack.c.b16 %v1249_v2, %v1248_v10  ;;  %v5307_v2 = vld [vmem:[#allocation3 + $0x70] sm:$0xff]  ;;  %v5440_v10 = vld [vmem:[%s5651_s16 + $0x84] sm:$0xf] }
 0x128   : > { %2828 = vmatpush.bf16.msra.mxu1 %v5307_v2 }
 0x129   : > { %v1626_v16 = vpop.f32.mrf.mxu0  ;;  %v1472_v44 = vpop.f32.mrf.mxu3 }
 0x12a   : > { %v872_v48 = vpop.f32.mrf.mxu2 }
 0x12b   : > { %v6301_v35 = vadd.f32 %v1092_v59, %v872_v48 }
 0x12c   : > { %4900 = vmatmul.msk.bf16.gmra.mxu0 %vm733_vm3, %v5769_v15  ;;  %v4848_v15 = vrot.slane %v5440_v10, 9 }
 0x12d   : > { %7673 = vst [vmem:[#allocation44_spill] sm:$0xff] %v6301_v35 }
 0x12e   : > { %4884 = vmatmul.msk.bf16.gmra.mxu3 %vm733_vm3, %v6310_v52 }
 0x12f   : > { %4862 = vmatmul.msk.bf16.gmra.mxu2 %vm733_vm3, %v6253_v22  ;;  %v1771_v59 = vpop.f32.mrf.mxu1  ;;  %v1195_v22 = vrot.slane %v1193_v28, 4 }
 0x131   : > { %v1628_v23 = vpop.f32.mrf.mxu0  ;;  %v1475_v25 = vpop.f32.mrf.mxu3 }
 0x132   : > { %v1336_v54 = vpop.f32.mrf.mxu2  ;;  %4919 = vmatmul.msk.bf16.gmra.mxu1 %vm733_vm3, %v6307_v37 }
 0x133   : > { %v1416_v48 = vadd.f32 %v1336_v54, %v6095_v20  ;;  %v1194_v20 = vsel %vm6068_vm7, %v4848_v15, %v1193_v28  ;;  %v1197_v54 = vsel %vm6068_vm7, %v1195_v22, %v1196_v42  ;;  %v7677_v22 = vld [vmem:[#allocation11_spill] sm:$0xff]  ;;  %v7678_v42 = vld [vmem:[#allocation13_spill] sm:$0xff] }
 0x134   : > { %v1200_v10 = vrot.slane %v7678_v42, 5 }
 0x135   : > { %v1550_v35 = vadd.f32 %v1470_v18, %v1416_v48  ;;  %v1250_v48 = vunpack.c.l.b16 %v1194_v20 }
 0x137   : > { %v1706_v41 = vadd.f32 %v1626_v16, %v1550_v35  ;;  %v1773_v21 = vpop.f32.mrf.mxu1  ;;  %v1251_v16 = vunpack.c.l.b16 %v1197_v54 }
 0x139   : > { %v1631_v52 = vpop.f32.mrf.mxu0  ;;  %v6320_v17 = vadd.f32 %v1766_v58, %v1706_v41  ;;  %v1477_v18 = vpop.f32.mrf.mxu3  ;;  %v6331_v2 = vpack.c.b16 %v1251_v16, %v1250_v48 }
 0x13a   : > { %v1338_v62 = vpop.f32.mrf.mxu2 }
 0x13b   : > { %7675 = vst [vmem:[#allocation46_spill] sm:$0xff] %v6320_v17  ;;  %v1417_v60 = vadd.f32 %v1338_v62, %v6106_v50  ;;  %v7681_v17 = vld [vmem:[#allocation15_spill] sm:$0xff] }
 0x13c   : > { %4901 = vmatmul.msk.bf16.gmra.mxu0 %vm733_vm3, %v5809_v8 }
 0x13d   : > { %v1551_v35 = vadd.f32 %v1472_v44, %v1417_v60  ;;  %v7679_v44 = vld [vmem:[#allocation14_spill] sm:$0xff]  ;;  %v7680_v60 = vld [vmem:[#allocation12_spill] sm:$0xff] }
 0x13e   : > { %4885 = vmatmul.msk.bf16.gmra.mxu3 %vm733_vm3, %v7677_v22  ;;  %v4849_v48 = vrot.slane %v7680_v60, 9 }
 0x13f   : > { %4863 = vmatmul.msk.bf16.gmra.mxu2 %vm733_vm3, %v6281_v36  ;;  %v1707_v41 = vadd.f32 %v1628_v23, %v1551_v35  ;;  %v1776_v50 = vpop.f32.mrf.mxu1  ;;  %v1203_v23 = vrot.slane %v7679_v44, 5 }
 0x140   : > { %v1201_v42 = vsel %vm6068_vm7, %v4849_v48, %v1200_v10 }
 0x141   : > { %v1633_v58 = vpop.f32.mrf.mxu0  ;;  %v6333_v15 = vadd.f32 %v1768_v33, %v1707_v41  ;;  %v1480_v54 = vpop.f32.mrf.mxu3  ;;  %v1202_v33 = vrot.slane %v1200_v10, 4 }
 0x142   : > { %v1341_v28 = vpop.f32.mrf.mxu2  ;;  %4920 = vmatmul.msk.bf16.gmra.mxu1 %vm733_vm3, %v6331_v2 }
 0x143   : > { %7676 = vst [vmem:[#allocation47_spill] sm:$0xff] %v6333_v15  ;;  %v1418_v20 = vadd.f32 %v1341_v28, %v6117_v5  ;;  %v1204_v5 = vsel %vm6068_vm7, %v1202_v33, %v1203_v23  ;;  %v7683_v23 = vld [vmem:[#allocation16_spill] sm:$0xff]  ;;  %v7684_v33 = vld [vmem:[#allocation18_spill] sm:$0xff] }
 0x144   : > { %v1253_v44 = vunpack.c.l.b16 %v1204_v5 }
 0x145   : > { %v1552_v62 = vadd.f32 %v1475_v25, %v1418_v20  ;;  %v1252_v20 = vunpack.c.l.b16 %v1201_v42 }
 0x147   : > { %v1708_v16 = vadd.f32 %v1631_v52, %v1552_v62  ;;  %v1778_v22 = vpop.f32.mrf.mxu1  ;;  %v6354_v60 = vpack.c.b16 %v1253_v44, %v1252_v20  ;;  %v7686_v20 = vld [vmem:[#allocation17_spill] sm:$0xff] }
 0x149   : > { %v1636_v35 = vpop.f32.mrf.mxu0  ;;  %v6343_v41 = vadd.f32 %v1771_v59, %v1708_v16  ;;  %v1482_v25 = vpop.f32.mrf.mxu3  ;;  %v1207_v16 = vrot.slane %v7684_v33, 5 }
 0x14a   : > { %v1343_v28 = vpop.f32.mrf.mxu2 }
 0x14b   : > { %v1419_v15 = vadd.f32 %v1343_v28, %v6130_v47  ;;  %v5306_v28 = vld [vmem:[#allocation3 + $0x68] sm:$0xff]  ;;  %v1209_v44 = vrot.slane %v1207_v16, 4 }
 0x14c   : > { %4902 = vmatmul.msk.bf16.gmra.mxu0 %vm733_vm3, %v7681_v17  ;;  %2829 = vmatpush.bf16.msra.mxu1 %v5306_v28 }
 0x14d   : > { %v1553_v52 = vadd.f32 %v1477_v18, %v1419_v15  ;;  %v7685_v18 = vld [vmem:[#allocation19_spill] sm:$0xff] }
 0x14e   : > { %4886 = vmatmul.msk.bf16.gmra.mxu3 %vm733_vm3, %v7683_v23 }
 0x14f   : > { %4864 = vmatmul.msk.bf16.gmra.mxu2 %vm733_vm3, %v6307_v37  ;;  %v1709_v59 = vadd.f32 %v1633_v58, %v1553_v52  ;;  %v1781_v47 = vpop.f32.mrf.mxu1  ;;  %v1210_v58 = vrot.slane %v7685_v18, 5 }
 0x151   : > { %v1638_v62 = vpop.f32.mrf.mxu0  ;;  %v6356_v10 = vadd.f32 %v1773_v21, %v1709_v59  ;;  %v1485_v5 = vpop.f32.mrf.mxu3  ;;  %v4850_v21 = vrot.slane %v7686_v20, 9 }
 0x152   : > { %v1346_v48 = vpop.f32.mrf.mxu2  ;;  %4921 = vmatmul.msk.bf16.gmra.mxu1 %vm733_vm3, %v6354_v60 }
 0x153   : > { %7682 = vst [vmem:[#allocation11_spill] sm:$0xff] %v6356_v10  ;;  %v1420_v42 = vadd.f32 %v1346_v48, %v6141_v4  ;;  %v1208_v4 = vsel %vm6068_vm7, %v4850_v21, %v1207_v16  ;;  %v1211_v48 = vsel %vm6068_vm7, %v1209_v44, %v1210_v58  ;;  %v7691_v58 = vld [vmem:[#allocation21_spill] sm:$0xff]  ;;  %v7692_v44 = vld [vmem:[#allocation23_spill] sm:$0xff] }
 0x154   : > { %v1254_v20 = vunpack.c.l.b16 %v1208_v4 }
 0x155   : > { %v1554_v15 = vadd.f32 %v1480_v54, %v1420_v42  ;;  %v7688_v54 = vld [vmem:[#allocation20_spill] sm:$0xff] }
 0x157   : > { %v1710_v52 = vadd.f32 %v1636_v35, %v1554_v15  ;;  %v1783_v10 = vpop.f32.mrf.mxu1  ;;  %v1255_v35 = vunpack.c.l.b16 %v1211_v48 }
 0x159   : > { %v1641_v59 = vpop.f32.mrf.mxu0  ;;  %v6366_v23 = vadd.f32 %v1776_v50, %v1710_v52  ;;  %v1487_v42 = vpop.f32.mrf.mxu3  ;;  %v6377_v52 = vpack.c.b16 %v1255_v35, %v1254_v20  ;;  %v7694_v20 = vld [vmem:[#allocation22_spill] sm:$0xff] }
 0x15a   : > { %v1348_v33 = vpop.f32.mrf.mxu2  ;;  %v4851_v35 = vrot.slane %v7694_v20, 9 }
 0x15b   : > { %7687 = vst [vmem:[#allocation13_spill] sm:$0xff] %v6366_v23  ;;  %v1421_v18 = vadd.f32 %v1348_v33, %v6155_v32  ;;  %v1214_v33 = vrot.slane %v7692_v44, 5 }
 0x15c   : > { %4903 = vmatmul.msk.bf16.gmra.mxu0 %vm733_vm3, %v7688_v54  ;;  %7689 = vst [vmem:[#allocation14_spill] sm:$0xff] %v6377_v52 }
 0x15d   : > { %v1555_v15 = vadd.f32 %v1482_v25, %v1421_v18  ;;  %v7693_v25 = vld [vmem:[#allocation24_spill] sm:$0xff]  ;;  %v1215_v44 = vsel %vm6068_vm7, %v4851_v35, %v1214_v33 }
 0x15e   : > { %4887 = vmatmul.msk.bf16.gmra.mxu3 %vm733_vm3, %v7691_v58 }
 0x15f   : > { %4865 = vmatmul.msk.bf16.gmra.mxu2 %vm733_vm3, %v6331_v2  ;;  %v1711_v50 = vadd.f32 %v1638_v62, %v1555_v15  ;;  %v1786_v32 = vpop.f32.mrf.mxu1  ;;  %v1217_v62 = vrot.slane %v7693_v25, 5  ;;  %v7697_v25 = vld [vmem:[#allocation25_spill] sm:$0xff] }
 0x161   : > { %v1643_v28 = vpop.f32.mrf.mxu0  ;;  %v6379_v16 = vadd.f32 %v1778_v22, %v1711_v50  ;;  %v1490_v48 = vpop.f32.mrf.mxu3  ;;  %v1216_v22 = vrot.slane %v1214_v33, 4 }
 0x162   : > { %v1351_v21 = vpop.f32.mrf.mxu2  ;;  %4922 = vmatmul.msk.bf16.gmra.mxu1 %vm733_vm3, %v6377_v52 }
 0x163   : > { %7690 = vst [vmem:[#allocation12_spill] sm:$0xff] %v6379_v16  ;;  %v1422_v4 = vadd.f32 %v1351_v21, %v6166_v0  ;;  %v1218_v0 = vsel %vm6068_vm7, %v1216_v22, %v1217_v62  ;;  %v7699_v62 = vld [vmem:[#allocation26_spill] sm:$0xff]  ;;  %v7700_v22 = vld [vmem:[#allocation28_spill] sm:$0xff] }
 0x165   : > { %v1556_v18 = vadd.f32 %v1485_v5, %v1422_v4  ;;  %v1256_v4 = vunpack.c.l.b16 %v1215_v44 }
 0x167   : > { %v1712_v15 = vadd.f32 %v1641_v59, %v1556_v18  ;;  %v6391_v58 = vpop.f32.mrf.mxu1  ;;  %v1257_v59 = vunpack.c.l.b16 %v1218_v0 }
 0x168   : > { %7696 = vst [vmem:[#allocation16_spill] sm:$0xff] %v6391_v58 }
 0x169   : > { %v1646_v50 = vpop.f32.mrf.mxu0  ;;  %v6389_v16 = vadd.f32 %v1781_v47, %v1712_v15  ;;  %v1492_v5 = vpop.f32.mrf.mxu3  ;;  %v6402_v15 = vpack.c.b16 %v1257_v59, %v1256_v4  ;;  %v7701_v4 = vld [vmem:[#allocation27_spill] sm:$0xff] }
 0x16a   : > { %v1353_v21 = vpop.f32.mrf.mxu2 }
 0x16b   : > { %7695 = vst [vmem:[#allocation15_spill] sm:$0xff] %v6389_v16  ;;  %v1423_v23 = vadd.f32 %v1353_v21, %v6180_v12  ;;  %v1221_v21 = vrot.slane %v7700_v22, 5 }
 0x16c   : > { %4904 = vmatmul.msk.bf16.gmra.mxu0 %vm733_vm3, %v7697_v25 }
 0x16d   : > { %v1557_v18 = vadd.f32 %v1487_v42, %v1423_v23  ;;  %v1224_v23 = vrot.slane %v6020_v13, 5  ;;  %v1223_v59 = vrot.slane %v1221_v21, 4 }
 0x16e   : > { %4888 = vmatmul.msk.bf16.gmra.mxu3 %vm733_vm3, %v7699_v62 }
 0x16f   : > { %4866 = vmatmul.msk.bf16.gmra.mxu2 %vm733_vm3, %v6354_v60  ;;  %v1713_v47 = vadd.f32 %v1643_v28, %v1557_v18  ;;  %v1791_v12 = vpop.f32.mrf.mxu1  ;;  %v5305_v28 = vld [vmem:[#allocation3 + $0x60] sm:$0xff]  ;;  %v1225_v13 = vsel %vm6068_vm7, %v1223_v59, %v1224_v23 }
 0x170   : > { %2830 = vmatpush.bf16.msra.mxu1 %v5305_v28  ;;  %v289_v28 = vld [vmem:[%s5651_s16 + $0xc0] sm:$0xf] }
 0x171   : > { %v1648_v20 = vpop.f32.mrf.mxu0  ;;  %v6404_v33 = vadd.f32 %v1783_v10, %v1713_v47  ;;  %v1495_v0 = vpop.f32.mrf.mxu3  ;;  %v4852_v10 = vrot.slane %v7701_v4, 9  ;;  %v290_v4 = vld [vmem:[%s5651_s16 + $0xc4] sm:$0xf]  ;;  %v1586_v23 = vshll.u32 %v289_v28, 16 }
 0x172   : > { %v1356_v35 = vpop.f32.mrf.mxu2  ;;  %4923 = vmatmul.msk.bf16.gmra.mxu1 %vm733_vm3, %v6402_v15 }
 0x173   : > { %7698 = vst [vmem:[#allocation18_spill] sm:$0xff] %v6404_v33  ;;  %v1424_v44 = vadd.f32 %v1356_v35, %v6191_v57  ;;  %v1222_v57 = vsel %vm6068_vm7, %v4852_v10, %v1221_v21  ;;  %v1583_v21 = vshrl.u32 %v289_v28, 16  ;;  %v1588_v58 = vrot.slane %v1586_v23, 5 }
 0x175   : > { %v1558_v42 = vadd.f32 %v1490_v48, %v1424_v44 }
 0x177   : > { %v1714_v18 = vadd.f32 %v1646_v50, %v1558_v42  ;;  %v6416_v22 = vpop.f32.mrf.mxu1  ;;  %v1258_v50 = vunpack.c.l.b16 %v1222_v57  ;;  %v1259_v42 = vunpack.c.l.b16 %v1225_v13 }
 0x178   : > { %7703 = vst [vmem:[#allocation17_spill] sm:$0xff] %v6416_v22  ;;  %v1585_v22 = vrot.slane %v1583_v21, 4 }
 0x179   : > { %v1651_v47 = vpop.f32.mrf.mxu0  ;;  %v6414_v62 = vadd.f32 %v1786_v32, %v1714_v18  ;;  %v1497_v44 = vpop.f32.mrf.mxu3  ;;  %v6431_v59 = vpack.c.b16 %v1259_v42, %v1258_v50 }
 0x17a   : > { %v1358_v48 = vpop.f32.mrf.mxu2 }
 0x17b   : > { %7702 = vst [vmem:[#allocation19_spill] sm:$0xff] %v6414_v62  ;;  %v1425_v35 = vadd.f32 %v1358_v48, %v6205_v24  ;;  %v1592_v24 = vshll.u32 %v290_v4, 16  ;;  %v1596_v48 = vshrl.u32 %v290_v4, 16  ;;  %v4908_v62 = vrot.slane %v289_v28, 9 }
 0x17c   : > { %4905 = vmatmul.msk.bf16.gmra.mxu0 %vm733_vm3, %v6024_v38 }
 0x17d   : > { %v1559_v32 = vadd.f32 %v1492_v5, %v1425_v35  ;;  %v1741_v5 = vrot.slane %v290_v4, 5  ;;  %v1598_v50 = vrot.slane %v1596_v48, 4 }
 0x17e   : > { %4889 = vmatmul.msk.bf16.gmra.mxu3 %vm733_vm3, %v6028_v30  ;;  %v1589_v30 = vor.u32 %v1588_v58, %v1585_v22 }
 0x17f   : > { %4867 = vmatmul.msk.bf16.gmra.mxu2 %vm733_vm3, %v6377_v52  ;;  %v6429_v18 = vadd.f32 %v1648_v20, %v1559_v32  ;;  %v1796_v57 = vpop.f32.mrf.mxu1  ;;  %v291_v32 = vld [vmem:[%s5651_s16 + $0xc8] sm:$0x1]  ;;  %v1743_v33 = vrot.slane %v1741_v5, 4  ;;  %v1742_v23 = vsel %vm6068_vm7, %v4908_v62, %v1741_v5 }
 0x180   : > { %v1744_v16 = vrot.slane %v291_v32, 5  ;;  %v1602_v4 = vshll.u32 %v291_v32, 16  ;;  %v1590_v58 = vrot.slane %v1589_v30, 4 }
 0x181   : > { %7704 = vst [vmem:[#allocation20_spill] sm:$0xff] %v6429_v18  ;;  %v1653_v10 = vpop.f32.mrf.mxu0  ;;  %v1500_v20 = vpop.f32.mrf.mxu3  ;;  %v1594_v18 = vrot.slane %v1592_v24, 5 }
 0x182   : > { %v1361_v13 = vpop.f32.mrf.mxu2  ;;  %4924 = vmatmul.msk.bf16.gmra.mxu1 %vm733_vm3, %v6431_v59  ;;  %v1745_v24 = vsel %vm6068_vm7, %v1743_v33, %v1744_v16  ;;  %v1604_v48 = vrot.slane %v1602_v4, 5 }
 0x183   : > { %v1426_v35 = vadd.f32 %v1361_v13, %v6216_v14  ;;  %v1599_v25 = vor.u32 %v1598_v50, %v1594_v18 }
 0x185   : > { %v1560_v42 = vadd.f32 %v1495_v0, %v1426_v35  ;;  %v1600_v22 = vrot.slane %v1599_v25, 4  ;;  %v6451_v35 = vld [vmem:[%s5651_s16 + $0xc0] sm:$0xff] }
 0x187   : > { %v1716_v38 = vadd.f32 %v1651_v47, %v1560_v42  ;;  %v6441_v21 = vpop.f32.mrf.mxu1  ;;  %v1605_v33 = vsel %vm5689_vm4, %v1600_v22, %v1604_v48 }
 0x188   : > { %v1609_v42 = vunpack.c.l.b16 %v1605_v33 }
 0x189   : > { %v1656_v52 = vpop.f32.mrf.mxu0  ;;  %v6439_v14 = vadd.f32 %v1791_v12, %v1716_v38  ;;  %v1502_v47 = vpop.f32.mrf.mxu3  ;;  %v1748_v38 = vunpack.c.l.b16 %v1742_v23  ;;  %v1749_v12 = vunpack.c.l.b16 %v1745_v24 }
 0x18a   : > { %v1363_v0 = vpop.f32.mrf.mxu2 }
 0x18b   : > { %v1427_v28 = vadd.f32 %v1363_v0, %v6230_v43  ;;  %v1595_v43 = vsel %vm5689_vm4, %v1590_v58, %v1594_v18  ;;  %v6461_v5 = vpack.c.b16 %v1749_v12, %v1748_v38  ;;  %v5304_v18 = vld [vmem:[#allocation3 + $0x58] sm:$0xff] }
 0x18c   : > { %4906 = vmatmul.msk.bf16.gmra.mxu0 %vm733_vm3, %v6078_v40  ;;  %v1608_v50 = vunpack.c.l.b16 %v1595_v43  ;;  %2831 = vmatpush.bf16.msra.mxu1 %v5304_v18 }
 0x18d   : > { %v1561_v13 = vadd.f32 %v1497_v44, %v1427_v28 }
 0x18e   : > { %4890 = vmatmul.msk.bf16.gmra.mxu3 %vm733_vm3, %v6451_v35  ;;  %v6468_v23 = vpack.c.b16 %v1609_v42, %v1608_v50  ;;  %v5441_v42 = vld [vmem:[%s5651_s16 + $0x18] sm:$0xff] }
 0x18f   : > { %4868 = vmatmul.msk.bf16.gmra.mxu2 %vm733_vm3, %v6402_v15  ;;  %v6455_v62 = vadd.f32 %v1653_v10, %v1561_v13  ;;  %v1801_v25 = vpop.f32.mrf.mxu1 }
 0x191   : > { %v1658_v16 = vpop.f32.mrf.mxu0  ;;  %v1505_v10 = vpop.f32.mrf.mxu3 }
 0x192   : > { %v1366_v44 = vpop.f32.mrf.mxu2  ;;  %4925 = vmatmul.msk.bf16.gmra.mxu1 %vm733_vm3, %v6461_v5 }
 0x193   : > { %v1428_v32 = vadd.f32 %v1366_v44, %v6241_v51 }
 0x195   : > { %v1562_v30 = vadd.f32 %v1500_v20, %v1428_v32 }
 0x197   : > { %v1718_v4 = vadd.f32 %v1656_v52, %v1562_v30  ;;  %v6472_v28 = vpop.f32.mrf.mxu1 }
 0x199   : > { %v1661_v24 = vpop.f32.mrf.mxu0  ;;  %v6470_v0 = vadd.f32 %v1796_v57, %v1718_v4  ;;  %v1507_v22 = vpop.f32.mrf.mxu3 }
 0x19a   : > { %v1368_v58 = vpop.f32.mrf.mxu2 }
 0x19b   : > { %v1429_v51 = vadd.f32 %v1368_v58, %v6255_v11 }
 0x19c   : > { %4907 = vmatmul.msk.bf16.gmra.mxu0 %vm733_vm3, %v6468_v23 }
 0x19d   : > { %v1563_v48 = vadd.f32 %v1502_v47, %v1429_v51 }
 0x19e   : > { %4948 = vmatmul.msk.bf16.vlgmr.msra.gmra.mxu3 %vm733_vm3, %v5801_v55 }
 0x19f   : > { %4869 = vmatmul.msk.bf16.gmra.mxu2 %vm733_vm3, %v6431_v59  ;;  %v6479_v52 = vadd.f32 %v1658_v16, %v1563_v48  ;;  %v1806_v57 = vpop.f32.mrf.mxu1 }
 0x1a1   : > { %v1663_v20 = vpop.f32.mrf.mxu0  ;;  %v1510_v11 = vpop.f32.mrf.mxu3 }
 0x1a2   : > { %v1371_v38 = vpop.f32.mrf.mxu2 }
 0x1a3   : > { %v1430_v12 = vadd.f32 %v1371_v38, %v6269_v45 }
 0x1a5   : > { %v1564_v13 = vadd.f32 %v1505_v10, %v1430_v12  ;;  %v5442_v12 = vld [vmem:[%s5651_s16 + $0x24] sm:$0xff] }
 0x1a7   : > { %v1720_v43 = vadd.f32 %v1661_v24, %v1564_v13  ;;  %v6486_v47 = vpop.f32.mrf.mxu1  ;;  %v5303_v24 = vld [vmem:[#allocation3 + $0x50] sm:$0xff] }
 0x1a8   : > { %2832 = vmatpush.bf16.msra.mxu1 %v5303_v24 }
 0x1a9   : > { %v1666_v33 = vpop.f32.mrf.mxu0  ;;  %v6484_v44 = vadd.f32 %v1801_v25, %v1720_v43  ;;  %v1512_v50 = vpop.f32.mrf.mxu3 }
 0x1aa   : > { %v1373_v32 = vpop.f32.mrf.mxu2 }
 0x1ab   : > { %v1431_v16 = vadd.f32 %v1373_v32, %v6283_v19 }
 0x1ac   : > { %4966 = vmatmul.msk.bf16.vlgmr.msra.gmra.mxu0 %vm733_vm3, %v6104_v46 }
 0x1ad   : > { %v1565_v55 = vadd.f32 %v1507_v22, %v1431_v16 }
 0x1ae   : > { %4949 = vmatmul.msk.bf16.gmra.mxu3 %vm733_vm3, %v5854_v53 }
 0x1af   : > { %4931 = vmatmul.msk.bf16.vlgmr.msra.gmra.mxu2 %vm733_vm3, %v5441_v42  ;;  %v6493_v45 = vadd.f32 %v1663_v20, %v1565_v55  ;;  %v1811_v25 = vpop.f32.mrf.mxu1 }
 0x1b1   : > { %v1668_v10 = vpop.f32.mrf.mxu0  ;;  %v1515_v19 = vpop.f32.mrf.mxu3 }
 0x1b2   : > { %v1376_v30 = vpop.f32.mrf.mxu2 }
 0x1b3   : > { %v1432_v18 = vadd.f32 %v1376_v30, %v6111_v9  ;;  %v5443_v30 = vld [vmem:[%s5651_s16 + $0x30] sm:$0xff] }
 0x1b5   : > { %v1566_v4 = vadd.f32 %v1510_v11, %v1432_v18 }
 0x1b7   : > { %v1722_v46 = vadd.f32 %v1666_v33, %v1566_v4  ;;  %v6500_v22 = vpop.f32.mrf.mxu1 }
 0x1b9   : > { %v1671_v58 = vpop.f32.mrf.mxu0  ;;  %v6498_v51 = vadd.f32 %v1806_v57, %v1722_v46  ;;  %v1517_v53 = vpop.f32.mrf.mxu3 }
 0x1ba   : > { %v1378_v48 = vpop.f32.mrf.mxu2 }
 0x1bb   : > { %v1433_v20 = vadd.f32 %v1378_v48, %v6123_v39 }
 0x1bc   : > { %4967 = vmatmul.msk.bf16.gmra.mxu0 %vm733_vm3, %v6128_v26 }
 0x1bd   : > { %v1567_v38 = vadd.f32 %v1512_v50, %v1433_v20 }
 0x1be   : > { %4950 = vmatmul.msk.bf16.gmra.mxu3 %vm733_vm3, %v5909_v27 }
 0x1bf   : > { %4932 = vmatmul.msk.bf16.gmra.mxu2 %vm733_vm3, %v5442_v12  ;;  %v6507_v9 = vadd.f32 %v1668_v10, %v1567_v38  ;;  %v1816_v13 = vpop.f32.mrf.mxu1  ;;  %v5444_v12 = vld [vmem:[%s5651_s16 + $0x3c] sm:$0xff] }
 0x1c1   : > { %v1673_v11 = vpop.f32.mrf.mxu0  ;;  %v1520_v39 = vpop.f32.mrf.mxu3 }
 0x1c2   : > { %v1381_v57 = vpop.f32.mrf.mxu2 }
 0x1c3   : > { %v1434_v43 = vadd.f32 %v1381_v57, %v6135_v34 }
 0x1c5   : > { %v1568_v33 = vadd.f32 %v1515_v19, %v1434_v43 }
 0x1c7   : > { %v1724_v32 = vadd.f32 %v1671_v58, %v1568_v33  ;;  %v6517_v10 = vpop.f32.mrf.mxu1 }
 0x1c9   : > { %v1676_v26 = vpop.f32.mrf.mxu0  ;;  %v6512_v16 = vadd.f32 %v1811_v25, %v1724_v32  ;;  %v1522_v42 = vpop.f32.mrf.mxu3 }
 0x1ca   : > { %v1383_v50 = vpop.f32.mrf.mxu2 }
 0x1cb   : > { %v1435_v55 = vadd.f32 %v1383_v50, %v6147_v6 }
 0x1cc   : > { %4968 = vmatmul.msk.bf16.gmra.mxu0 %vm733_vm3, %v6153_v49  ;;  %v5302_v49 = vld [vmem:[#allocation3 + $0x48] sm:$0xff] }
 0x1cd   : > { %v1569_v27 = vadd.f32 %v1517_v53, %v1435_v55  ;;  %2833 = vmatpush.bf16.msra.mxu1 %v5302_v49  ;;  %v7705_v55 = vld [vmem:[#allocation31_spill] sm:$0xff] }
 0x1ce   : > { %4951 = vmatmul.msk.bf16.gmra.mxu3 %vm733_vm3, %v5962_v63 }
 0x1cf   : > { %4933 = vmatmul.msk.bf16.gmra.mxu2 %vm733_vm3, %v5443_v30  ;;  %v6521_v34 = vadd.f32 %v1673_v11, %v1569_v27  ;;  %v1821_v24 = vpop.f32.mrf.mxu1  ;;  %v7706_v27 = vld [vmem:[#allocation32_spill] sm:$0xff] }
 0x1d1   : > { %v1678_v18 = vpop.f32.mrf.mxu0  ;;  %v1525_v19 = vpop.f32.mrf.mxu3 }
 0x1d2   : > { %v1386_v25 = vpop.f32.mrf.mxu2 }
 0x1d3   : > { %v1436_v6 = vadd.f32 %v1386_v25, %v6160_v56  ;;  %v5445_v25 = vld [vmem:[%s5651_s16 + $0x48] sm:$0xff] }
 0x1d5   : > { %v1570_v4 = vadd.f32 %v1520_v39, %v1436_v6  ;;  %v7707_v6 = vld [vmem:[#allocation30_spill] sm:$0xff] }
 0x1d7   : > { %v1726_v46 = vadd.f32 %v1676_v26, %v1570_v4  ;;  %v6535_v57 = vpop.f32.mrf.mxu1  ;;  %v7708_v4 = vld [vmem:[#allocation33_spill] sm:$0xff] }
 0x1d9   : > { %v1681_v58 = vpop.f32.mrf.mxu0  ;;  %v6526_v48 = vadd.f32 %v1816_v13, %v1726_v46  ;;  %v1527_v63 = vpop.f32.mrf.mxu3 }
 0x1da   : > { %v1388_v20 = vpop.f32.mrf.mxu2 }
 0x1db   : > { %v1437_v53 = vadd.f32 %v1388_v20, %v6172_v3  ;;  %v5301_v20 = vld [vmem:[#allocation3 + $0x40] sm:$0xff] }
 0x1dc   : > { %4969 = vmatmul.msk.bf16.gmra.mxu0 %vm733_vm3, %v6178_v29  ;;  %2834 = vmatpush.bf16.msra.mxu1 %v5301_v20  ;;  %v7718_v20 = vld [vmem:[#allocation37_spill] sm:$0xff] }
 0x1dd   : > { %v1571_v38 = vadd.f32 %v1522_v42, %v1437_v53 }
 0x1de   : > { %4952 = vmatmul.msk.bf16.gmra.mxu3 %vm733_vm3, %v6016_v61 }
 0x1df   : > { %4934 = vmatmul.msk.bf16.gmra.mxu2 %vm733_vm3, %v5444_v12  ;;  %v6533_v56 = vadd.f32 %v1678_v18, %v1571_v38  ;;  %v1826_v50 = vpop.f32.mrf.mxu1 }
 0x1e1   : > { %v1683_v11 = vpop.f32.mrf.mxu0  ;;  %v1530_v43 = vpop.f32.mrf.mxu3 }
 0x1e2   : > { %v1391_v13 = vpop.f32.mrf.mxu2 }
 0x1e3   : > { %v1438_v3 = vadd.f32 %v1391_v13, %v6185_v7 }
 0x1e5   : > { %v1572_v39 = vadd.f32 %v1525_v19, %v1438_v3  ;;  %v7712_v3 = vld [vmem:[#allocation35_spill] sm:$0xff] }
 0x1e7   : > { %v1728_v29 = vadd.f32 %v1681_v58, %v1572_v39  ;;  %v6552_v46 = vpop.f32.mrf.mxu1 }
 0x1e8   : > { %7709 = vst [vmem:[#allocation21_spill] sm:$0xff] %v6552_v46 }
 0x1e9   : > { %v1686_v33 = vpop.f32.mrf.mxu0  ;;  %v6540_v32 = vadd.f32 %v1821_v24, %v1728_v29  ;;  %v1532_v30 = vpop.f32.mrf.mxu3 }
 0x1ea   : > { %v1393_v26 = vpop.f32.mrf.mxu2 }
 0x1eb   : > { %v1439_v42 = vadd.f32 %v1393_v26, %v7705_v55  ;;  %v5446_v55 = vld [vmem:[%s5651_s16 + $0x54] sm:$0xff] }
 0x1ec   : > { %4970 = vmatmul.msk.bf16.gmra.mxu0 %vm733_vm3, %v7706_v27  ;;  %v7715_v27 = vld [vmem:[#allocation36_spill] sm:$0xff] }
 0x1ed   : > { %v1573_v18 = vadd.f32 %v1527_v63, %v1439_v42 }
 0x1ee   : > { %4953 = vmatmul.msk.bf16.gmra.mxu3 %vm733_vm3, %v7707_v6 }
 0x1ef   : > { %4935 = vmatmul.msk.bf16.gmra.mxu2 %vm733_vm3, %v5445_v25  ;;  %v6547_v61 = vadd.f32 %v1683_v11, %v1573_v18  ;;  %v7711_v11 = vld [vmem:[#allocation34_spill] sm:$0xff]  ;;  %v1831_v26 = vpop.f32.mrf.mxu1 }
 0x1f1   : > { %v1688_v7 = vpop.f32.mrf.mxu0  ;;  %v1535_v24 = vpop.f32.mrf.mxu3 }
 0x1f2   : > { %v1396_v19 = vpop.f32.mrf.mxu2 }
 0x1f3   : > { %v1440_v49 = vadd.f32 %v1396_v19, %v7708_v4 }
 0x1f5   : > { %v1574_v58 = vadd.f32 %v1530_v43, %v1440_v49 }
 0x1f7   : > { %v1730_v53 = vadd.f32 %v1686_v33, %v1574_v58  ;;  %v7714_v33 = vld [vmem:[#allocation9_spill] sm:$0xff]  ;;  %v6566_v49 = vpop.f32.mrf.mxu1 }
 0x1f8   : > { %7716 = vst [vmem:[#allocation22_spill] sm:$0xff] %v6566_v49  ;;  %v7751_v49 = vld [vmem:[#allocation16_spill] sm:$0xff] }
 0x1f9   : > { %v1691_v63 = vpop.f32.mrf.mxu0  ;;  %v6554_v38 = vadd.f32 %v1826_v50, %v1730_v53  ;;  %v1537_v39 = vpop.f32.mrf.mxu3 }
 0x1fa   : > { %v1398_v12 = vpop.f32.mrf.mxu2 }
 0x1fb   : > { %7710 = vst [vmem:[#allocation23_spill] sm:$0xff] %v6554_v38  ;;  %v1441_v13 = vadd.f32 %v1398_v12, %v7711_v11 }
 0x1fc   : > { %4971 = vmatmul.msk.bf16.gmra.mxu0 %vm733_vm3, %v7712_v3  ;;  %v5316_v3 = vld [vmem:[#allocation3 + $0xb8] sm:$0xff] }
 0x1fd   : > { %v1575_v29 = vadd.f32 %v1532_v30, %v1441_v13  ;;  %v5300_v13 = vld [vmem:[#allocation3 + $0x38] sm:$0xff]  ;;  %3263 = vmatpush.bf16.msrb.mxu3 %v5316_v3 }
 0x1fe   : > { %4954 = vmatmul.msk.bf16.gmra.mxu3 %vm733_vm3, %v7714_v33  ;;  %2964 = vmatpush.bf16.msrb.mxu2 %v5300_v13 }
 0x1ff   : > { %4936 = vmatmul.msk.bf16.gmra.mxu2 %vm733_vm3, %v5446_v55  ;;  %v6561_v42 = vadd.f32 %v1688_v7, %v1575_v29  ;;  %v7719_v7 = vld [vmem:[#allocation38_spill] sm:$0xff]  ;;  %v7720_v29 = vld [vmem:[#allocation39_spill] sm:$0xff] }
 0x200   : > { %v7722_v55 = vld [vmem:[#allocation10_spill] sm:$0xff] }
 0x201   : > { %7713 = vst [vmem:[#allocation24_spill] sm:$0xff] %v6561_v42  ;;  %v1693_v43 = vpop.f32.mrf.mxu0  ;;  %v1540_v25 = vpop.f32.mrf.mxu3 }
 0x202   : > { %v1401_v50 = vpop.f32.mrf.mxu2 }
 0x203   : > { %v1442_v18 = vadd.f32 %v1401_v50, %v7715_v27  ;;  %v1836_v50 = vpop.f32.mrf.mxu1  ;;  %v7723_v27 = vld [vmem:[#allocation40_spill] sm:$0xff] }
 0x205   : > { %v1576_v6 = vadd.f32 %v1535_v24, %v1442_v18 }
 0x207   : > { %v1732_v19 = vadd.f32 %v1691_v63, %v1576_v6 }
 0x209   : > { %v1696_v4 = vpop.f32.mrf.mxu0  ;;  %v6568_v30 = vadd.f32 %v1831_v26, %v1732_v19  ;;  %v1542_v12 = vpop.f32.mrf.mxu3  ;;  %v7575_v26 = vmov 0.0|0.0  }
 0x20a   : > { %v1403_v58 = vpop.f32.mrf.mxu2  ;;  %2835 = vmatmul.bf16.vlgmr.msra.gmra.mxu1 %v7575_v26  ;;  %v7727_v26 = vld [vmem:[#allocation42_spill] sm:$0xff] }
 0x20b   : > { %7717 = vst [vmem:[#allocation26_spill] sm:$0xff] %v6568_v30  ;;  %v1443_v53 = vadd.f32 %v1403_v58, %v7718_v20 }
 0x20c   : > { %4972 = vmatmul.msk.bf16.gmra.mxu0 %vm733_vm3, %v7719_v7 }
 0x20d   : > { %v1577_v11 = vadd.f32 %v1537_v39, %v1443_v53  ;;  %v7725_v53 = vld [vmem:[#allocation41_spill] sm:$0xff] }
 0x20e   : > { %4955 = vmatmul.msk.bf16.gmra.mxu3 %vm733_vm3, %v7722_v55  ;;  %v5332_v55 = vld [vmem:[#allocation3 + $0x138] sm:$0xff] }
 0x20f   : > { %4937 = vmatmul.msk.bf16.gmra.mxu2 %vm733_vm3, %v7720_v29  ;;  %v6575_v24 = vadd.f32 %v1693_v43, %v1577_v11  ;;  %v6586_v11 = vpop.f32.mrf.mxu1  ;;  %v5324_v29 = vld [vmem:[#allocation3 + $0xf8] sm:$0xff]  ;;  %3647 = vmatpush.bf16.msrb.mxu1 %v5332_v55 }
 0x210   : > { %7726 = vst [vmem:[#allocation31_spill] sm:$0xff] %v6586_v11  ;;  %3460 = vmatpush.bf16.msrb.mxu0 %v5324_v29  ;;  %v7732_v29 = vld [vmem:[#allocation45_spill] sm:$0xff] }
 0x211   : > { %7721 = vst [vmem:[#allocation28_spill] sm:$0xff] %v6575_v24  ;;  %v1698_v63 = vpop.f32.mrf.mxu0  ;;  %v1545_v18 = vpop.f32.mrf.mxu3 }
 0x212   : > { %v1406_v33 = vpop.f32.mrf.mxu2 }
 0x213   : > { %v1444_v39 = vadd.f32 %v1406_v33, %v7723_v27 }
 0x215   : > { %v1578_v6 = vadd.f32 %v1540_v25, %v1444_v39 }
 0x217   : > { %v1734_v19 = vadd.f32 %v1696_v4, %v1578_v6  ;;  %v1841_v6 = vpop.f32.mrf.mxu1 }
 0x219   : > { %v1701_v58 = vpop.f32.mrf.mxu0  ;;  %v6581_v20 = vadd.f32 %v1836_v50, %v1734_v19  ;;  %v1547_v13 = vpop.f32.mrf.mxu3  ;;  %v7729_v50 = vld [vmem:[#allocation43_spill] sm:$0xff] }
 0x21a   : > { %v1408_v43 = vpop.f32.mrf.mxu2 }
 0x21b   : > { %7724 = vst [vmem:[#allocation27_spill] sm:$0xff] %v6581_v20  ;;  %v1445_v7 = vadd.f32 %v1408_v43, %v7725_v53 }
 0x21c   : > { %4973 = vmatmul.msk.bf16.gmra.mxu0 %vm733_vm3, %v6281_v36 }
 0x21d   : > { %v1579_v3 = vadd.f32 %v1542_v12, %v1445_v7 }
 0x21e   : > { %4956 = vmatmul.msk.bf16.gmra.mxu3 %vm733_vm3, %v5809_v8 }
 0x21f   : > { %4938 = vmatmul.msk.bf16.gmra.mxu2 %vm733_vm3, %v7727_v26  ;;  %v6590_v25 = vadd.f32 %v1698_v63, %v1579_v3  ;;  %v7731_v26 = vld [vmem:[#allocation44_spill] sm:$0xff] }
 0x221   : > { %7728 = vst [vmem:[#allocation32_spill] sm:$0xff] %v6590_v25  ;;  %v1703_v4 = vpop.f32.mrf.mxu0  ;;  %v2056_v27 = vpop.f32.mrf.mxu3 }
 0x222   : > { %v1411_v33 = vpop.f32.mrf.mxu2 }
 0x223   : > { %v1446_v36 = vadd.f32 %v1411_v33, %v7729_v50  ;;  %v5299_v50 = vld [vmem:[#allocation3 + $0x30] sm:$0xff] }
 0x224   : > { %2965 = vmatpush.bf16.msrb.mxu2 %v5299_v50 }
 0x225   : > { %v1580_v39 = vadd.f32 %v1545_v18, %v1446_v36  ;;  %v5315_v36 = vld [vmem:[#allocation3 + $0xb0] sm:$0xff] }
 0x226   : > { %3264 = vmatpush.bf16.msrb.mxu3 %v5315_v36 }
 0x227   : > { %v1736_v12 = vadd.f32 %v1701_v58, %v1580_v39  ;;  %v7734_v58 = vld [vmem:[#allocation46_spill] sm:$0xff] }
 0x229   : > { %v2196_v19 = vpop.f32.mrf.mxu0  ;;  %v6595_v43 = vadd.f32 %v1841_v6, %v1736_v12  ;;  %v2058_v7 = vpop.f32.mrf.mxu3 }
 0x22a   : > { %v1413_v53 = vpop.f32.mrf.mxu2 }
 0x22b   : > { %7730 = vst [vmem:[#allocation30_spill] sm:$0xff] %v6595_v43  ;;  %v1447_v63 = vadd.f32 %v1413_v53, %v7731_v26  ;;  %v7735_v53 = vld [vmem:[#allocation47_spill] sm:$0xff] }
 0x22c   : > { %4974 = vmatmul.msk.bf16.gmra.mxu0 %vm733_vm3, %v6307_v37  ;;  %v6610_v37 = vld [vmem:[%s7539_s2] ss:$0 sm:$0xff] }
 0x22d   : > { %v1581_v3 = vadd.f32 %v1547_v13, %v1447_v63  ;;  %v5323_v63 = vld [vmem:[#allocation3 + $0xf0] sm:$0xff] }
 0x22e   : > { %4957 = vmatmul.msk.bf16.gmra.mxu3 %vm733_vm3, %v7681_v17  ;;  %3461 = vmatpush.bf16.msrb.mxu0 %v5323_v63 }
 0x22f   : > { %4939 = vmatmul.msk.bf16.gmra.mxu2 %vm733_vm3, %v7732_v29  ;;  %v6602_v8 = vadd.f32 %v1703_v4, %v1581_v3 }
 0x231   : > { %7733 = vst [vmem:[#allocation33_spill] sm:$0xff] %v6602_v8  ;;  %v2198_v55 = vpop.f32.mrf.mxu0  ;;  %v2061_v39 = vpop.f32.mrf.mxu3  ;;  %v5298_v8 = vld [vmem:[#allocation3 + $0x28] sm:$0xff] }
 0x232   : > { %v1900_v18 = vpop.f32.mrf.mxu2  ;;  %2966 = vmatpush.bf16.msrb.mxu2 %v5298_v8 }
 0x233   : > { %v1980_v33 = vadd.f32 %v1900_v18, %v7734_v58 }
 0x235   : > { %v2136_v6 = vadd.f32 %v2056_v27, %v1980_v33  ;;  %v5331_v27 = vld [vmem:[#allocation3 + $0x130] sm:$0xff]  ;;  %v5447_v33 = vld [vmem:[%s5651_s16 + $0x84] sm:$0xff] }
 0x236   : > { %3648 = vmatpush.bf16.msrb.mxu1 %v5331_v27 }
 0x237   : > { %v2276_v13 = vadd.f32 %v2196_v19, %v2136_v6 }
 0x239   : > { %v2201_v4 = vpop.f32.mrf.mxu0  ;;  %v2312_v12 = vadd.f32 %v6610_v37, %v2276_v13  ;;  %v2063_v3 = vpop.f32.mrf.mxu3 }
 0x23a   : > { %v1902_v17 = vpop.f32.mrf.mxu2 }
 0x23b   : > { %v1981_v26 = vadd.f32 %v1902_v17, %v7735_v53  ;;  %v2344_v18 = vmax.f32 %v2312_v12, 0.0 }
 0x23c   : > { %4975 = vmatmul.msk.bf16.gmra.mxu0 %vm733_vm3, %v6331_v2  ;;  %v5555_v2 = vmov 0.0  }
 0x23d   : > { %v2137_v29 = vadd.f32 %v2058_v7, %v1981_v26  ;;  %v2608_v36 = vrot.slane %v2344_v18, 7  ;;  %v6621_v13 = vrot.slane %v5555_v2, 7  ;;  %v6624_v53 = vrot.slane %v5555_v2, 1 }
 0x23e   : > { %4958 = vmatmul.msk.bf16.gmra.mxu3 %vm733_vm3, %v7688_v54  ;;  %v3075_v12 = vrot.slane %v2344_v18, 1 }
 0x23f   : > { %v2277_v58 = vadd.f32 %v2198_v55, %v2137_v29  ;;  %4940 = vmatmul.msk.bf16.gmra.mxu2 %vm733_vm3, %v5447_v33  ;;  %v2609_v54 = vsel %vm2601_vm8, %v6621_v13, %v2608_v36 }
 0x241   : > { %v2203_v19 = vpop.f32.mrf.mxu0  ;;  %v2313_v50 = vadd.f32 %v6610_v37, %v2277_v58  ;;  %v2066_v55 = vpop.f32.mrf.mxu3 }
 0x242   : > { %v1905_v6 = vpop.f32.mrf.mxu2 }
 0x243   : > { %v2345_v17 = vmax.f32 %v2313_v50, 0.0  ;;  %v1982_v7 = vadd.f32 %v1905_v6, %v6343_v41 }
 0x245   : > { %v2610_v26 = vrot.slane %v2345_v17, 7  ;;  %v2138_v63 = vadd.f32 %v2061_v39, %v1982_v7  ;;  %v6626_v27 = vpack.c.bf16 %v2345_v17, %v2344_v18  ;;  %v3076_v29 = vrot.slane %v2345_v17, 1  ;;  %v7737_v7 = vld [vmem:[#allocation11_spill] sm:$0xff] }
 0x247   : > { %7736 = vst [vmem:[#allocation34_spill] sm:$0xff] %v6626_v27  ;;  %v2278_v58 = vadd.f32 %v2201_v4, %v2138_v63  ;;  %2840 = vmatmul.bf16.gmra.mxu1 %v6626_v27  ;;  %v2611_v41 = vsel %vm2601_vm8, %v2608_v36, %v2610_v26  ;;  %v3077_v33 = vsel %vm3069_vm9, %v3075_v12, %v3076_v29  ;;  %v5448_v27 = vld [vmem:[%s5651_s16 + $0x90] sm:$0xff] }
 0x248   : > { %v3079_v50 = vsel %vm3069_vm9, %v3076_v29, %v6624_v53  ;;  %v6635_v2 = vpack.c.bf16 %v2611_v41, %v2609_v54  ;;  %v7738_v41 = vld [vmem:[#allocation25_spill] sm:$0xff] }
 0x249   : > { %v2206_v6 = vpop.f32.mrf.mxu0  ;;  %v6637_v39 = vpack.c.bf16 %v3079_v50, %v3077_v33  ;;  %v2314_v18 = vadd.f32 %v6610_v37, %v2278_v58  ;;  %v2068_v63 = vpop.f32.mrf.mxu3 }
 0x24a   : > { %v1907_v17 = vpop.f32.mrf.mxu2 }
 0x24b   : > { %v1983_v4 = vadd.f32 %v1907_v17, %v7737_v7  ;;  %v2346_v26 = vmax.f32 %v2314_v18, 0.0  ;;  %v7739_v17 = vld [vmem:[#allocation13_spill] sm:$0xff] }
 0x24c   : > { %4976 = vmatmul.msk.bf16.gmra.mxu0 %vm733_vm3, %v6354_v60  ;;  %v5314_v60 = vld [vmem:[#allocation3 + $0xa8] sm:$0xff] }
 0x24d   : > { %v2139_v36 = vadd.f32 %v2063_v3, %v1983_v4  ;;  %v2613_v33 = vrot.slane %v2346_v26, 7  ;;  %v3080_v3 = vrot.slane %v2346_v26, 1  ;;  %3265 = vmatpush.bf16.msrb.mxu3 %v5314_v60  ;;  %v7742_v60 = vld [vmem:[#allocation14_spill] sm:$0xff] }
 0x24e   : > { %4959 = vmatmul.msk.bf16.gmra.mxu3 %vm733_vm3, %v7738_v41 }
 0x24f   : > { %v2279_v12 = vadd.f32 %v2203_v19, %v2139_v36  ;;  %4941 = vmatmul.msk.bf16.gmra.mxu2 %vm733_vm3, %v5448_v27  ;;  %v2614_v36 = vsel %vm2601_vm8, %v6621_v13, %v2613_v33 }
 0x251   : > { %v2208_v29 = vpop.f32.mrf.mxu0  ;;  %v2315_v54 = vadd.f32 %v6610_v37, %v2279_v12  ;;  %v2071_v43 = vpop.f32.mrf.mxu3 }
 0x252   : > { %v1910_v58 = vpop.f32.mrf.mxu2 }
 0x253   : > { %v2347_v50 = vmax.f32 %v2315_v54, 0.0  ;;  %v1984_v7 = vadd.f32 %v1910_v58, %v7739_v17 }
 0x255   : > { %v2140_v18 = vadd.f32 %v2066_v55, %v1984_v7  ;;  %v6649_v19 = vpack.c.bf16 %v2347_v50, %v2346_v26  ;;  %v2615_v27 = vrot.slane %v2347_v50, 7  ;;  %v3081_v4 = vrot.slane %v2347_v50, 1  ;;  %v7741_v7 = vld [vmem:[#allocation12_spill] sm:$0xff] }
 0x257   : > { %7740 = vst [vmem:[#allocation35_spill] sm:$0xff] %v6649_v19  ;;  %v2280_v12 = vadd.f32 %v2206_v6, %v2140_v18  ;;  %2845 = vmatmul.bf16.gmra.mxu1 %v6649_v19  ;;  %v2616_v54 = vsel %vm2601_vm8, %v2613_v33, %v2615_v27  ;;  %v3082_v41 = vsel %vm3069_vm9, %v3080_v3, %v3081_v4  ;;  %v5322_v33 = vld [vmem:[#allocation3 + $0xe8] sm:$0xff] }
 0x258   : > { %v3084_v58 = vsel %vm3069_vm9, %v3081_v4, %v6624_v53  ;;  %v6658_v26 = vpack.c.bf16 %v2616_v54, %v2614_v36  ;;  %v5330_v18 = vld [vmem:[#allocation3 + $0x128] sm:$0xff]  ;;  %3462 = vmatpush.bf16.msrb.mxu0 %v5322_v33  ;;  %v5449_v36 = vld [vmem:[%s5651_s16 + $0x9c] sm:$0xff] }
 0x259   : > { %v2211_v55 = vpop.f32.mrf.mxu0  ;;  %v6660_v8 = vpack.c.bf16 %v3084_v58, %v3082_v41  ;;  %v2316_v50 = vadd.f32 %v6610_v37, %v2280_v12  ;;  %v2073_v3 = vpop.f32.mrf.mxu3  ;;  %3649 = vmatpush.bf16.msrb.mxu1 %v5330_v18  ;;  %v7743_v41 = vld [vmem:[#allocation29_spill] sm:$0xff] }
 0x25a   : > { %v1912_v17 = vpop.f32.mrf.mxu2 }
 0x25b   : > { %v1985_v6 = vadd.f32 %v1912_v17, %v7741_v7  ;;  %v2348_v4 = vmax.f32 %v2316_v50, 0.0 }
 0x25c   : > { %4977 = vmatmul.msk.bf16.gmra.mxu0 %vm733_vm3, %v7742_v60  ;;  %v7744_v60 = vld [vmem:[#allocation15_spill] sm:$0xff] }
 0x25d   : > { %v2141_v27 = vadd.f32 %v2068_v63, %v1985_v6  ;;  %v2618_v17 = vrot.slane %v2348_v4, 7  ;;  %v3085_v63 = vrot.slane %v2348_v4, 1 }
 0x25e   : > { %4960 = vmatmul.msk.bf16.gmra.mxu3 %vm733_vm3, %v7743_v41 }
 0x25f   : > { %v2281_v19 = vadd.f32 %v2208_v29, %v2141_v27  ;;  %4942 = vmatmul.msk.bf16.gmra.mxu2 %vm733_vm3, %v5449_v36  ;;  %v2619_v18 = vsel %vm2601_vm8, %v6621_v13, %v2618_v17 }
 0x261   : > { %v2213_v54 = vpop.f32.mrf.mxu0  ;;  %v2317_v12 = vadd.f32 %v6610_v37, %v2281_v19  ;;  %v2076_v25 = vpop.f32.mrf.mxu3 }
 0x262   : > { %v1915_v58 = vpop.f32.mrf.mxu2 }
 0x263   : > { %v2349_v7 = vmax.f32 %v2317_v12, 0.0  ;;  %v1986_v11 = vadd.f32 %v1915_v58, %v7744_v60 }
 0x265   : > { %v2142_v6 = vadd.f32 %v2071_v43, %v1986_v11  ;;  %v6672_v33 = vpack.c.bf16 %v2349_v7, %v2348_v4  ;;  %v2620_v29 = vrot.slane %v2349_v7, 7  ;;  %v3086_v50 = vrot.slane %v2349_v7, 1 }
 0x267   : > { %7745 = vst [vmem:[#allocation9_spill] sm:$0xff] %v6672_v33  ;;  %v2282_v27 = vadd.f32 %v2211_v55, %v2142_v6  ;;  %2850 = vmatmul.bf16.gmra.mxu1 %v6672_v33  ;;  %v2621_v19 = vsel %vm2601_vm8, %v2618_v17, %v2620_v29  ;;  %v3087_v36 = vsel %vm3069_vm9, %v3085_v63, %v3086_v50  ;;  %v7747_v55 = vld [vmem:[#allocation18_spill] sm:$0xff] }
 0x268   : > { %v3089_v12 = vsel %vm3069_vm9, %v3086_v50, %v6624_v53  ;;  %v6681_v11 = vpack.c.bf16 %v2621_v19, %v2619_v18  ;;  %v5450_v29 = vld [vmem:[%s5651_s16 + $0xa8] sm:$0xff] }
 0x269   : > { %v2216_v41 = vpop.f32.mrf.mxu0  ;;  %v6683_v43 = vpack.c.bf16 %v3089_v12, %v3087_v36  ;;  %v2318_v58 = vadd.f32 %v6610_v37, %v2282_v27  ;;  %v2078_v17 = vpop.f32.mrf.mxu3  ;;  %v5313_v27 = vld [vmem:[#allocation3 + $0xa0] sm:$0xff]  ;;  %v6695_v19 = vld [vmem:[%s5651_s16 + $0xcc] sm:$0xf] }
 0x26a   : > { %v1917_v4 = vpop.f32.mrf.mxu2  ;;  %3266 = vmatpush.bf16.msrb.mxu3 %v5313_v27 }
 0x26b   : > { %7746 = vst [vmem:[#allocation36_spill] sm:$0xff] %v6683_v43  ;;  %v1987_v7 = vadd.f32 %v1917_v4, %v7747_v55  ;;  %v2350_v63 = vmax.f32 %v2318_v58, 0.0  ;;  %v5297_v55 = vld [vmem:[#allocation3 + $0x20] sm:$0xff] }
 0x26c   : > { %4978 = vmatmul.msk.bf16.gmra.mxu0 %vm733_vm3, %v6402_v15  ;;  %v7748_v15 = vld [vmem:[#allocation19_spill] sm:$0xff]  ;;  %2967 = vmatpush.bf16.msrb.mxu2 %v5297_v55  ;;  %v7750_v55 = vld [vmem:[#allocation20_spill] sm:$0xff] }
 0x26d   : > { %v2143_v60 = vadd.f32 %v2073_v3, %v1987_v7  ;;  %v6699_v3 = vld [vmem:[%s5651_s16 + $0xd0] sm:$0xf]  ;;  %v2013_v7 = vshrl.u32 %v6695_v19, 16  ;;  %v1855_v24 = vadd.f32 %v7751_v49, %v7750_v55 }
 0x26e   : > { %4961 = vmatmul.msk.bf16.gmra.mxu3 %vm733_vm3, %v6078_v40  ;;  %v2016_v40 = vshll.u32 %v6695_v19, 16 }
 0x26f   : > { %v2283_v6 = vadd.f32 %v2213_v54, %v2143_v60  ;;  %4943 = vmatmul.msk.bf16.gmra.mxu2 %vm733_vm3, %v5450_v29  ;;  %v2623_v54 = vrot.slane %v2350_v63, 7  ;;  %v5312_v29 = vld [vmem:[#allocation3 + $0x98] sm:$0xff]  ;;  %v2015_v42 = vrot.slane %v2013_v7, 4  ;;  %v5329_v7 = vld [vmem:[#allocation3 + $0x120] sm:$0xff] }
 0x270   : > { %3267 = vmatpush.bf16.msrb.mxu3 %v5312_v29  ;;  %3650 = vmatpush.bf16.msrb.mxu1 %v5329_v7 }
 0x271   : > { %v2218_v50 = vpop.f32.mrf.mxu0  ;;  %v2319_v18 = vadd.f32 %v6610_v37, %v2283_v6  ;;  %v6701_v58 = vpop.f32.mrf.mxu3  ;;  %v2624_v20 = vsel %vm2601_vm8, %v6621_v13, %v2623_v54 }
 0x272   : > { %v1920_v36 = vpop.f32.mrf.mxu2 }
 0x273   : > { %v2351_v12 = vmax.f32 %v2319_v18, 0.0  ;;  %v1988_v4 = vadd.f32 %v1920_v36, %v7748_v15  ;;  %v2022_v18 = vshll.u32 %v6699_v3, 16  ;;  %v2026_v36 = vshrl.u32 %v6699_v3, 16 }
 0x275   : > { %v2144_v60 = vadd.f32 %v2076_v25, %v1988_v4  ;;  %v6704_v6 = vpack.c.bf16 %v2351_v12, %v2350_v63  ;;  %v2625_v33 = vrot.slane %v2351_v12, 7  ;;  %v3091_v27 = vrot.slane %v2351_v12, 1 }
 0x276   : > { %v3090_v4 = vrot.slane %v2350_v63, 1  ;;  %v2018_v12 = vrot.slane %v2016_v40, 5  ;;  %v5321_v63 = vld [vmem:[#allocation3 + $0xe0] sm:$0xff]  ;;  %v2028_v49 = vrot.slane %v2026_v36, 4 }
 0x277   : > { %7749 = vst [vmem:[#allocation37_spill] sm:$0xff] %v6704_v6  ;;  %v2284_v15 = vadd.f32 %v2216_v41, %v2144_v60  ;;  %2855 = vmatmul.bf16.gmra.mxu1 %v6704_v6  ;;  %v2626_v25 = vsel %vm2601_vm8, %v2623_v54, %v2625_v33  ;;  %v5311_v41 = vld [vmem:[#allocation3 + $0x90] sm:$0xff]  ;;  %v3094_v29 = vsel %vm3069_vm9, %v3091_v27, %v6624_v53  ;;  %v6723_v54 = vrot.slane %v2022_v18, 5 }
 0x278   : > { %v6717_v46 = vpack.c.bf16 %v2626_v25, %v2624_v20  ;;  %v3092_v60 = vsel %vm3069_vm9, %v3090_v4, %v3091_v27  ;;  %v6730_v20 = vld [vmem:[%s5651_s16 + $0xd4] sm:$0x1]  ;;  %3268 = vmatpush.bf16.msrb.mxu3 %v5311_v41  ;;  %3463 = vmatpush.bf16.msrb.mxu0 %v5321_v63  ;;  %v2019_v25 = vor.u32 %v2018_v12, %v2015_v42  ;;  %v5296_v4 = vld [vmem:[#allocation3 + $0x18] sm:$0xff]  ;;  %v5309_v42 = vld [vmem:[#allocation3 + $0x80] sm:$0xff] }
 0x279   : > { %v6715_v30 = vpop.f32.mrf.mxu0  ;;  %v2320_v6 = vadd.f32 %v6610_v37, %v2284_v15  ;;  %v6725_v55 = vpack.c.bf16 %v3094_v29, %v3092_v60  ;;  %v6732_v40 = vpop.f32.mrf.mxu3  ;;  %v5310_v15 = vld [vmem:[#allocation3 + $0x88] sm:$0xff]  ;;  %v2029_v36 = vor.u32 %v2028_v49, %v6723_v54  ;;  %v5320_v60 = vld [vmem:[#allocation3 + $0xd8] sm:$0xff]  ;;  %2968 = vmatpush.bf16.msrb.mxu2 %v5296_v4  ;;  %v5295_v63 = vld [vmem:[#allocation3 + $0x10] sm:$0xff] }
 0x27a   : > { %v1922_v33 = vpop.f32.mrf.mxu2  ;;  %v5451_v29 = vld [vmem:[%s5651_s16 + $0xb4] sm:$0xff] }
 0x27b   : > { %7752 = vst [vmem:[#allocation38_spill] sm:$0xff] %v6725_v55  ;;  %v1989_v38 = vadd.f32 %v1922_v33, %v1855_v24  ;;  %v2352_v18 = vmax.f32 %v2320_v6, 0.0  ;;  %v2032_v24 = vshll.u32 %v6730_v20, 16  ;;  %v2020_v6 = vrot.slane %v2019_v25, 4  ;;  %v5319_v49 = vld [vmem:[#allocation3 + $0xd0] sm:$0xff] }
 0x27c   : > { %4979 = vmatmul.msk.bf16.gmra.mxu0 %vm733_vm3, %v6431_v59  ;;  %3269 = vmatpush.bf16.msrb.mxu3 %v5310_v15  ;;  %v2030_v12 = vrot.slane %v2029_v36, 4 }
 0x27d   : > { %v2145_v27 = vadd.f32 %v2078_v17, %v1989_v38  ;;  %3464 = vmatpush.bf16.msrb.mxu0 %v5320_v60  ;;  %v2034_v33 = vrot.slane %v2032_v24, 5  ;;  %2969 = vmatpush.bf16.msrb.mxu2 %v5295_v63  ;;  %v3095_v4 = vrot.slane %v2352_v18, 1  ;;  %v2025_v25 = vsel %vm5689_vm4, %v2020_v6, %v6723_v54  ;;  %v5294_v24 = vld [vmem:[#allocation3 + $0x8] sm:$0xff] }
 0x27e   : > { %4962 = vmatmul.msk.bf16.gmra.mxu3 %vm733_vm3, %v6468_v23 }
 0x27f   : > { %v2285_v59 = vadd.f32 %v2218_v50, %v2145_v27  ;;  %4944 = vmatmul.msk.bf16.gmra.mxu2 %vm733_vm3, %v5451_v29  ;;  %v2628_v50 = vrot.slane %v2352_v18, 7  ;;  %v2035_v36 = vsel %vm5689_vm4, %v2030_v12, %v2034_v33  ;;  %v7755_v12 = vld [vmem:[#allocation17_spill] sm:$0xff] }
 0x280   : > { %3270 = vmatpush.bf16.msrb.mxu3 %v5309_v42  ;;  %v1857_v33 = vadd.f32 %v7755_v12, %v6455_v62  ;;  %v2039_v63 = vunpack.c.l.b16 %v2035_v36 }
 0x281   : > { %v2223_v41 = vpop.f32.mrf.mxu0  ;;  %v2321_v38 = vadd.f32 %v6610_v37, %v2285_v59  ;;  %v2086_v15 = vpop.f32.mrf.mxu3  ;;  %3465 = vmatpush.bf16.msrb.mxu0 %v5319_v49  ;;  %v2629_v42 = vsel %vm2601_vm8, %v6621_v13, %v2628_v50  ;;  %2970 = vmatpush.bf16.msrb.mxu2 %v5294_v24 }
 0x282   : > { %v1925_v17 = vpop.f32.mrf.mxu2 }
 0x283   : > { %v2353_v7 = vmax.f32 %v2321_v38, 0.0  ;;  %v1990_v27 = vadd.f32 %v1925_v17, %v6439_v14  ;;  %v2171_v14 = vrot.slane %v6699_v3, 5  ;;  %v5318_v38 = vld [vmem:[#allocation3 + $0xc8] sm:$0xff] }
 0x285   : > { %v2146_v60 = vadd.f32 %v6701_v58, %v1990_v27  ;;  %v6743_v59 = vpack.c.bf16 %v2353_v7, %v2352_v18  ;;  %v2630_v23 = vrot.slane %v2353_v7, 7  ;;  %v3096_v29 = vrot.slane %v2353_v7, 1  ;;  %3466 = vmatpush.bf16.msrb.mxu0 %v5318_v38  ;;  %v5293_v7 = vld [vmem:[#allocation3] sm:$0xff] }
 0x286   : > { %v5317_v27 = vld [vmem:[#allocation3 + $0xc0] sm:$0xff]  ;;  %2971 = vmatpush.bf16.msrb.mxu2 %v5293_v7 }
 0x287   : > { %v2286_v58 = vadd.f32 %v6715_v30, %v2146_v60  ;;  %2860 = vmatmul.bf16.gmra.mxu1 %v6743_v59  ;;  %v2631_v18 = vsel %vm2601_vm8, %v2628_v50, %v2630_v23  ;;  %v3097_v17 = vsel %vm3069_vm9, %v3095_v4, %v3096_v29  ;;  %v3099_v54 = vsel %vm3069_vm9, %v3096_v29, %v6624_v53 }
 0x288   : > { %v6759_v3 = vpack.c.bf16 %v2631_v18, %v2629_v42  ;;  %v6761_v6 = vpack.c.bf16 %v3099_v54, %v3097_v17  ;;  %v2038_v30 = vunpack.c.l.b16 %v2025_v25  ;;  %v4964_v60 = vrot.slane %v6695_v19, 9 }
 0x289   : > { %v2226_v31 = vpop.f32.mrf.mxu0  ;;  %v2322_v49 = vadd.f32 %v6610_v37, %v2286_v58  ;;  %v2173_v23 = vrot.slane %v2171_v14, 4  ;;  %v2174_v29 = vrot.slane %v6730_v20, 5  ;;  %v2088_v24 = vpop.f32.mrf.mxu3  ;;  %3467 = vmatpush.bf16.msrb.mxu0 %v5317_v27 }
 0x28a   : > { %7753 = vst [vmem:[#allocation39_spill] sm:$0xff] %v6759_v3  ;;  %v1927_v50 = vpop.f32.mrf.mxu2  ;;  %v2040_v25 = vpack.c.b16 %v2039_v63, %v2038_v30  ;;  %v2172_v42 = vsel %vm6068_vm7, %v4964_v60, %v2171_v14 }
 0x28b   : > { %7754 = vst [vmem:[#allocation10_spill] sm:$0xff] %v6761_v6  ;;  %v1991_v4 = vadd.f32 %v1927_v50, %v1857_v33  ;;  %v2354_v36 = vmax.f32 %v2322_v49, 0.0  ;;  %v2178_v18 = vunpack.c.l.b16 %v2172_v42 }
 0x28c   : > { %4980 = vmatmul.msk.bf16.gmra.mxu0 %vm733_vm3, %v6461_v5  ;;  %v2175_v5 = vsel %vm6068_vm7, %v2173_v23, %v2174_v29  ;;  %v1859_v23 = vadd.f32 %v6441_v21, %v6479_v52 }
 0x28d   : > { %v2147_v62 = vadd.f32 %v6732_v40, %v1991_v4  ;;  %v2179_v40 = vunpack.c.l.b16 %v2175_v5  ;;  %v2633_v17 = vrot.slane %v2354_v36, 7  ;;  %v6800_v5 = vpack.c.bf16 %v6624_v53, %v6624_v53 }
 0x28e   : > { %4963 = vmatmul.msk.bf16.gmra.mxu3 %vm733_vm3, %v2040_v25  ;;  %v5292_v25 = vld [vmem:[%s5651_s16 + $0xcc] sm:$0xff] }
 0x28f   : > { %v2287_v38 = vadd.f32 %v2223_v41, %v2147_v62  ;;  %4945 = vmatmul.msk.bf16.gmra.mxu2 %vm733_vm3, %v6451_v35  ;;  %v3100_v35 = vrot.slane %v2354_v36, 1  ;;  %v2180_v63 = vpack.c.b16 %v2179_v40, %v2178_v18  ;;  %v2634_v49 = vsel %vm2601_vm8, %v6621_v13, %v2633_v17  ;;  %7758 = vst [vmem:[#allocation42_spill] sm:$0xff] %v6800_v5 }
 0x291   : > { %v2228_v19 = vpop.f32.mrf.mxu0  ;;  %v2323_v20 = vadd.f32 %v6610_v37, %v2287_v38  ;;  %v2091_v12 = vpop.f32.mrf.mxu3 }
 0x292   : > { %v1930_v58 = vpop.f32.mrf.mxu2 }
 0x293   : > { %v2355_v54 = vmax.f32 %v2323_v20, 0.0  ;;  %v1992_v41 = vadd.f32 %v1930_v58, %v6470_v0 }
 0x295   : > { %v2148_v33 = vadd.f32 %v2086_v15, %v1992_v41  ;;  %v6780_v30 = vpack.c.bf16 %v2355_v54, %v2354_v36  ;;  %v2635_v14 = vrot.slane %v2355_v54, 7  ;;  %v3101_v1 = vrot.slane %v2355_v54, 1  ;;  %v5328_v36 = vld [vmem:[#allocation3 + $0x118] sm:$0xff] }
 0x296   : > { %3651 = vmatpush.bf16.msrb.mxu1 %v5328_v36 }
 0x297   : > { %v2288_v50 = vadd.f32 %v2226_v31, %v2148_v33  ;;  %2865 = vmatmul.bf16.gmra.mxu1 %v6780_v30  ;;  %v2636_v7 = vsel %vm2601_vm8, %v2633_v17, %v2635_v14  ;;  %v3102_v27 = vsel %vm3069_vm9, %v3100_v35, %v3101_v1  ;;  %v3104_v0 = vsel %vm3069_vm9, %v3101_v1, %v6624_v53 }
 0x298   : > { %v6789_v4 = vpack.c.bf16 %v2636_v7, %v2634_v49  ;;  %v6791_v60 = vpack.c.bf16 %v3104_v0, %v3102_v27  ;;  %v1861_v0 = vadd.f32 %v6472_v28, %v6493_v45 }
 0x299   : > { %v2231_v15 = vpop.f32.mrf.mxu0  ;;  %v2324_v29 = vadd.f32 %v6610_v37, %v2288_v50  ;;  %v2093_v38 = vpop.f32.mrf.mxu3 }
 0x29a   : > { %7756 = vst [vmem:[#allocation40_spill] sm:$0xff] %v6789_v4  ;;  %v1932_v31 = vpop.f32.mrf.mxu2 }
 0x29b   : > { %7757 = vst [vmem:[#allocation41_spill] sm:$0xff] %v6791_v60  ;;  %v1993_v62 = vadd.f32 %v1932_v31, %v1859_v23  ;;  %v2356_v20 = vmax.f32 %v2324_v29, 0.0  ;;  %v6821_v23 = vpop.f32.mrf.mxu1 }
 0x29c   : > { %4981 = vmatmul.msk.bf16.gmra.mxu0 %vm733_vm3, %v2180_v63 }
 0x29d   : > { %v2149_v42 = vadd.f32 %v2088_v24, %v1993_v62  ;;  %v2638_v40 = vrot.slane %v2356_v20, 7  ;;  %v3105_v41 = vrot.slane %v2356_v20, 1  ;;  %v6826_v62 = vpack.c.bf16 %v6621_v13, %v6621_v13 }
 0x29e   : > { %3271 = vmatmul.bf16.vlgmr.msrb.gmra.mxu3 %v6800_v5 }
 0x29f   : > { %v2289_v58 = vadd.f32 %v2228_v19, %v2149_v42  ;;  %4946 = vmatmul.msk.bf16.gmra.mxu2 %vm733_vm3, %v5292_v25  ;;  %v2639_v19 = vsel %vm2601_vm8, %v6621_v13, %v2638_v40  ;;  %7761 = vst [vmem:[#allocation45_spill] sm:$0xff] %v6826_v62 }
 0x2a1   : > { %v2233_v21 = vpop.f32.mrf.mxu0  ;;  %v2325_v52 = vadd.f32 %v6610_v37, %v2289_v58  ;;  %v2096_v24 = vpop.f32.mrf.mxu3 }
 0x2a2   : > { %v1935_v18 = vpop.f32.mrf.mxu2 }
 0x2a3   : > { %v2357_v17 = vmax.f32 %v2325_v52, 0.0  ;;  %v1994_v54 = vadd.f32 %v1935_v18, %v6484_v44  ;;  %v6832_v45 = vpop.f32.mrf.mxu1 }
 0x2a5   : > { %v2150_v35 = vadd.f32 %v2091_v12, %v1994_v54  ;;  %v6806_v33 = vpack.c.bf16 %v2357_v17, %v2356_v20  ;;  %v2640_v14 = vrot.slane %v2357_v17, 7  ;;  %v3106_v1 = vrot.slane %v2357_v17, 1 }
 0x2a7   : > { %v2290_v63 = vadd.f32 %v2231_v15, %v2150_v35  ;;  %2870 = vmatmul.bf16.gmra.mxu1 %v6806_v33  ;;  %v2641_v49 = vsel %vm2601_vm8, %v2638_v40, %v2640_v14  ;;  %v3107_v50 = vsel %vm3069_vm9, %v3105_v41, %v3106_v1  ;;  %v3109_v44 = vsel %vm3069_vm9, %v3106_v1, %v6624_v53 }
 0x2a8   : > { %v6815_v27 = vpack.c.bf16 %v2641_v49, %v2639_v19  ;;  %v6817_v12 = vpack.c.bf16 %v3109_v44, %v3107_v50 }
 0x2a9   : > { %v2236_v7 = vpop.f32.mrf.mxu0  ;;  %v2326_v15 = vadd.f32 %v6610_v37, %v2290_v63  ;;  %v2098_v25 = vpop.f32.mrf.mxu3 }
 0x2aa   : > { %7759 = vst [vmem:[#allocation43_spill] sm:$0xff] %v6815_v27  ;;  %v1937_v29 = vpop.f32.mrf.mxu2 }
 0x2ab   : > { %7760 = vst [vmem:[#allocation44_spill] sm:$0xff] %v6817_v12  ;;  %v1995_v31 = vadd.f32 %v1937_v29, %v1861_v0  ;;  %v2358_v42 = vmax.f32 %v2326_v15, 0.0  ;;  %v1863_v0 = vadd.f32 %v6486_v47, %v6507_v9 }
 0x2ac   : > { %3468 = vmatmul.bf16.vlgmr.msrb.gmra.mxu0 %v6635_v2 }
 0x2ad   : > { %v2151_v36 = vadd.f32 %v2093_v38, %v1995_v31  ;;  %v2643_v18 = vrot.slane %v2358_v42, 7  ;;  %v3110_v41 = vrot.slane %v2358_v42, 1  ;;  %v5327_v31 = vld [vmem:[#allocation3 + $0x110] sm:$0xff] }
 0x2ae   : > { %3276 = vmatmul.bf16.gmra.mxu3 %v6637_v39  ;;  %3652 = vmatpush.bf16.msrb.mxu1 %v5327_v31 }
 0x2af   : > { %v2291_v20 = vadd.f32 %v2233_v21, %v2151_v36  ;;  %2972 = vmatmul.bf16.vlgmr.msrb.gmra.mxu2 %v6826_v62  ;;  %v2644_v1 = vsel %vm2601_vm8, %v6621_v13, %v2643_v18  ;;  %v6852_v36 = vpop.f32.mrf.mxu1 }
 0x2b1   : > { %v2238_v58 = vpop.f32.mrf.mxu0  ;;  %v2327_v28 = vadd.f32 %v6610_v37, %v2291_v20  ;;  %v2101_v54 = vpop.f32.mrf.mxu3 }
 0x2b2   : > { %v1940_v52 = vpop.f32.mrf.mxu2 }
 0x2b3   : > { %v2359_v40 = vmax.f32 %v2327_v28, 0.0  ;;  %v1996_v17 = vadd.f32 %v1940_v52, %v6498_v51 }
 0x2b5   : > { %v2152_v35 = vadd.f32 %v2096_v24, %v1996_v17  ;;  %v6835_v38 = vpack.c.bf16 %v2359_v40, %v2358_v42  ;;  %v2645_v21 = vrot.slane %v2359_v40, 7  ;;  %v3111_v14 = vrot.slane %v2359_v40, 1 }
 0x2b7   : > { %v2292_v19 = vadd.f32 %v2236_v7, %v2152_v35  ;;  %2875 = vmatmul.bf16.gmra.mxu1 %v6835_v38  ;;  %v2646_v63 = vsel %vm2601_vm8, %v2643_v18, %v2645_v21  ;;  %v3112_v49 = vsel %vm3069_vm9, %v3110_v41, %v3111_v14  ;;  %v3114_v51 = vsel %vm3069_vm9, %v3111_v14, %v6624_v53 }
 0x2b8   : > { %v6844_v44 = vpack.c.bf16 %v2646_v63, %v2644_v1  ;;  %v6846_v24 = vpack.c.bf16 %v3114_v51, %v3112_v49 }
 0x2b9   : > { %v2241_v50 = vpop.f32.mrf.mxu0  ;;  %v2328_v15 = vadd.f32 %v6610_v37, %v2292_v19  ;;  %v2103_v42 = vpop.f32.mrf.mxu3 }
 0x2ba   : > { %7762 = vst [vmem:[#allocation46_spill] sm:$0xff] %v6846_v24  ;;  %v1942_v7 = vpop.f32.mrf.mxu2 }
 0x2bb   : > { %v1997_v29 = vadd.f32 %v1942_v7, %v1863_v0  ;;  %v2360_v28 = vmax.f32 %v2328_v15, 0.0  ;;  %v1865_v7 = vadd.f32 %v6500_v22, %v6521_v34 }
 0x2bc   : > { %3473 = vmatmul.bf16.gmra.mxu0 %v6658_v26 }
 0x2bd   : > { %v2153_v20 = vadd.f32 %v2098_v25, %v1997_v29  ;;  %v2648_v9 = vrot.slane %v2360_v28, 7  ;;  %v3115_v14 = vrot.slane %v2360_v28, 1 }
 0x2be   : > { %3281 = vmatmul.bf16.gmra.mxu3 %v6660_v8 }
 0x2bf   : > { %v2293_v52 = vadd.f32 %v2238_v58, %v2153_v20  ;;  %2977 = vmatmul.bf16.gmra.mxu2 %v6635_v2  ;;  %v2649_v2 = vsel %vm2601_vm8, %v6621_v13, %v2648_v9 }
 0x2c1   : > { %v2243_v18 = vpop.f32.mrf.mxu0  ;;  %v2329_v40 = vadd.f32 %v6610_v37, %v2293_v52  ;;  %v2106_v21 = vpop.f32.mrf.mxu3 }
 0x2c2   : > { %v1945_v47 = vpop.f32.mrf.mxu2 }
 0x2c3   : > { %v2361_v17 = vmax.f32 %v2329_v40, 0.0  ;;  %v1998_v41 = vadd.f32 %v1945_v47, %v6512_v16 }
 0x2c4   : > { %v6858_v35 = vpop.f32.mrf.mxu1 }
 0x2c5   : > { %v2154_v25 = vadd.f32 %v2101_v54, %v1998_v41  ;;  %v6860_v1 = vpack.c.bf16 %v2361_v17, %v2360_v28  ;;  %v2650_v58 = vrot.slane %v2361_v17, 7  ;;  %v3116_v19 = vrot.slane %v2361_v17, 1 }
 0x2c7   : > { %v2294_v63 = vadd.f32 %v2241_v50, %v2154_v25  ;;  %2880 = vmatmul.bf16.gmra.mxu1 %v6860_v1  ;;  %v2651_v49 = vsel %vm2601_vm8, %v2648_v9, %v2650_v58  ;;  %v3117_v51 = vsel %vm3069_vm9, %v3115_v14, %v3116_v19  ;;  %v3119_v16 = vsel %vm3069_vm9, %v3116_v19, %v6624_v53 }
 0x2c8   : > { %v6869_v15 = vpack.c.bf16 %v2651_v49, %v2649_v2  ;;  %v6871_v54 = vpack.c.bf16 %v3119_v16, %v3117_v51 }
 0x2c9   : > { %v2246_v0 = vpop.f32.mrf.mxu0  ;;  %v2330_v29 = vadd.f32 %v6610_v37, %v2294_v63  ;;  %v2108_v28 = vpop.f32.mrf.mxu3 }
 0x2ca   : > { %7763 = vst [vmem:[#allocation47_spill] sm:$0xff] %v6871_v54  ;;  %v1947_v50 = vpop.f32.mrf.mxu2 }
 0x2cb   : > { %v1999_v31 = vadd.f32 %v1947_v50, %v1865_v7  ;;  %v2362_v40 = vmax.f32 %v2330_v29, 0.0 }
 0x2cc   : > { %3478 = vmatmul.bf16.gmra.mxu0 %v6681_v11  ;;  %v6877_v20 = vpop.f32.mrf.mxu1 }
 0x2cd   : > { %v2155_v52 = vadd.f32 %v2103_v42, %v1999_v31  ;;  %v2653_v34 = vrot.slane %v2362_v40, 7  ;;  %v3120_v19 = vrot.slane %v2362_v40, 1  ;;  %v1867_v31 = vadd.f32 %v6517_v10, %v6533_v56 }
 0x2ce   : > { %3286 = vmatmul.bf16.gmra.mxu3 %v6683_v43 }
 0x2cf   : > { %v2295_v47 = vadd.f32 %v2243_v18, %v2155_v52  ;;  %2982 = vmatmul.bf16.gmra.mxu2 %v6658_v26  ;;  %v2654_v49 = vsel %vm2601_vm8, %v6621_v13, %v2653_v34 }
 0x2d1   : > { %v2248_v9 = vpop.f32.mrf.mxu0  ;;  %v2331_v17 = vadd.f32 %v6610_v37, %v2295_v47  ;;  %v2111_v58 = vpop.f32.mrf.mxu3  ;;  %v5326_v47 = vld [vmem:[#allocation3 + $0x108] sm:$0xff] }
 0x2d2   : > { %v1950_v22 = vpop.f32.mrf.mxu2  ;;  %3653 = vmatpush.bf16.msrb.mxu1 %v5326_v47 }
 0x2d3   : > { %v2363_v41 = vmax.f32 %v2331_v17, 0.0  ;;  %v2000_v14 = vadd.f32 %v1950_v22, %v6526_v48 }
 0x2d4   : > { %v6883_v25 = vpop.f32.mrf.mxu1 }
 0x2d5   : > { %v2156_v2 = vadd.f32 %v2106_v21, %v2000_v14  ;;  %v6885_v42 = vpack.c.bf16 %v2363_v41, %v2362_v40  ;;  %v2655_v18 = vrot.slane %v2363_v41, 7  ;;  %v3121_v63 = vrot.slane %v2363_v41, 1 }
 0x2d7   : > { %7764 = vst [vmem:[#allocation11_spill] sm:$0xff] %v6885_v42  ;;  %v2296_v51 = vadd.f32 %v2246_v0, %v2156_v2  ;;  %2885 = vmatmul.bf16.gmra.mxu1 %v6885_v42  ;;  %v2656_v16 = vsel %vm2601_vm8, %v2653_v34, %v2655_v18  ;;  %v3122_v7 = vsel %vm3069_vm9, %v3120_v19, %v3121_v63 }
 0x2d8   : > { %v3124_v48 = vsel %vm3069_vm9, %v3121_v63, %v6624_v53  ;;  %v6894_v50 = vpack.c.bf16 %v2656_v16, %v2654_v49 }
 0x2d9   : > { %v2251_v29 = vpop.f32.mrf.mxu0  ;;  %v6896_v21 = vpack.c.bf16 %v3124_v48, %v3122_v7  ;;  %v2332_v52 = vadd.f32 %v6610_v37, %v2296_v51  ;;  %v2113_v22 = vpop.f32.mrf.mxu3 }
 0x2da   : > { %v1952_v0 = vpop.f32.mrf.mxu2 }
 0x2db   : > { %7765 = vst [vmem:[#allocation25_spill] sm:$0xff] %v6896_v21  ;;  %v2001_v40 = vadd.f32 %v1952_v0, %v1867_v31  ;;  %v2364_v41 = vmax.f32 %v2332_v52, 0.0 }
 0x2dc   : > { %3483 = vmatmul.bf16.gmra.mxu0 %v6717_v46  ;;  %v6902_v17 = vpop.f32.mrf.mxu1 }
 0x2dd   : > { %v2157_v34 = vadd.f32 %v2108_v28, %v2001_v40  ;;  %v2658_v56 = vrot.slane %v2364_v41, 7  ;;  %v3125_v16 = vrot.slane %v2364_v41, 1 }
 0x2de   : > { %3291 = vmatmul.bf16.gmra.mxu3 %v6725_v55  ;;  %v5348_v55 = vld [vmem:[#allocation3 + $0x1b8] sm:$0xff] }
 0x2df   : > { %v2297_v14 = vadd.f32 %v2248_v9, %v2157_v34  ;;  %2987 = vmatmul.bf16.gmra.mxu2 %v6681_v11  ;;  %v2659_v31 = vsel %vm2601_vm8, %v6621_v13, %v2658_v56  ;;  %4039 = vmatpush.bf16.msra.mxu3 %v5348_v55 }
 0x2e1   : > { %v2253_v19 = vpop.f32.mrf.mxu0  ;;  %v2333_v2 = vadd.f32 %v6610_v37, %v2297_v14  ;;  %v2116_v51 = vpop.f32.mrf.mxu3 }
 0x2e2   : > { %v1955_v10 = vpop.f32.mrf.mxu2 }
 0x2e3   : > { %v2365_v18 = vmax.f32 %v2333_v2, 0.0  ;;  %v2002_v63 = vadd.f32 %v1955_v10, %v6540_v32 }
 0x2e4   : > { %v6908_v49 = vpop.f32.mrf.mxu1 }
 0x2e5   : > { %v2158_v28 = vadd.f32 %v2111_v58, %v2002_v63  ;;  %v6910_v7 = vpack.c.bf16 %v2365_v18, %v2364_v41  ;;  %v2660_v9 = vrot.slane %v2365_v18, 7  ;;  %v3126_v48 = vrot.slane %v2365_v18, 1 }
 0x2e6   : > { %v1869_v41 = vadd.f32 %v6535_v57, %v6547_v61 }
 0x2e7   : > { %7766 = vst [vmem:[#allocation13_spill] sm:$0xff] %v6910_v7  ;;  %v2298_v52 = vadd.f32 %v2251_v29, %v2158_v28  ;;  %2890 = vmatmul.bf16.gmra.mxu1 %v6910_v7  ;;  %v2661_v0 = vsel %vm2601_vm8, %v2658_v56, %v2660_v9  ;;  %v3127_v40 = vsel %vm3069_vm9, %v3125_v16, %v3126_v48 }
 0x2e8   : > { %v3129_v32 = vsel %vm3069_vm9, %v3126_v48, %v6624_v53  ;;  %v6919_v34 = vpack.c.bf16 %v2661_v0, %v2659_v31  ;;  %v7769_v31 = vld [vmem:[#allocation23_spill] sm:$0xff] }
 0x2e9   : > { %v2256_v47 = vpop.f32.mrf.mxu0  ;;  %v6921_v58 = vpack.c.bf16 %v3129_v32, %v3127_v40  ;;  %v2334_v14 = vadd.f32 %v6610_v37, %v2298_v52  ;;  %v2118_v56 = vpop.f32.mrf.mxu3 }
 0x2ea   : > { %7767 = vst [vmem:[#allocation12_spill] sm:$0xff] %v6919_v34  ;;  %v1957_v29 = vpop.f32.mrf.mxu2 }
 0x2eb   : > { %7768 = vst [vmem:[#allocation14_spill] sm:$0xff] %v6921_v58  ;;  %v2003_v2 = vadd.f32 %v1957_v29, %v1869_v41  ;;  %v2366_v63 = vmax.f32 %v2334_v14, 0.0 }
 0x2ec   : > { %3488 = vmatmul.bf16.gmra.mxu0 %v6759_v3  ;;  %v6927_v10 = vpop.f32.mrf.mxu1 }
 0x2ed   : > { %v2159_v18 = vadd.f32 %v2113_v22, %v2003_v2  ;;  %v2663_v61 = vrot.slane %v2366_v63, 7  ;;  %v3130_v32 = vrot.slane %v2366_v63, 1 }
 0x2ee   : > { %3296 = vmatmul.bf16.gmra.mxu3 %v6761_v6 }
 0x2ef   : > { %v2299_v16 = vadd.f32 %v2253_v19, %v2159_v18  ;;  %2992 = vmatmul.bf16.gmra.mxu2 %v6717_v46  ;;  %v2664_v29 = vsel %vm2601_vm8, %v6621_v13, %v2663_v61 }
 0x2f1   : > { %v2258_v28 = vpop.f32.mrf.mxu0  ;;  %v2335_v9 = vadd.f32 %v6610_v37, %v2299_v16  ;;  %v2121_v40 = vpop.f32.mrf.mxu3 }
 0x2f2   : > { %v1960_v57 = vpop.f32.mrf.mxu2 }
 0x2f3   : > { %v2367_v48 = vmax.f32 %v2335_v9, 0.0  ;;  %v2004_v52 = vadd.f32 %v1960_v57, %v7769_v31 }
 0x2f4   : > { %v6933_v0 = vpop.f32.mrf.mxu1 }
 0x2f5   : > { %v2160_v41 = vadd.f32 %v2116_v51, %v2004_v52  ;;  %v6935_v22 = vpack.c.bf16 %v2367_v48, %v2366_v63  ;;  %v2665_v19 = vrot.slane %v2367_v48, 7  ;;  %v3131_v14 = vrot.slane %v2367_v48, 1  ;;  %v7773_v63 = vld [vmem:[#allocation24_spill] sm:$0xff]  ;;  %v7774_v48 = vld [vmem:[#allocation21_spill] sm:$0xff] }
 0x2f6   : > { %v1871_v52 = vadd.f32 %v7774_v48, %v7773_v63  ;;  %v7775_v48 = vld [vmem:[#allocation26_spill] sm:$0xff] }
 0x2f7   : > { %7770 = vst [vmem:[#allocation29_spill] sm:$0xff] %v6935_v22  ;;  %v2300_v2 = vadd.f32 %v2256_v47, %v2160_v41  ;;  %2895 = vmatmul.bf16.gmra.mxu1 %v6935_v22  ;;  %v2666_v18 = vsel %vm2601_vm8, %v2663_v61, %v2665_v19  ;;  %v3132_v16 = vsel %vm3069_vm9, %v3130_v32, %v3131_v14  ;;  %v5325_v61 = vld [vmem:[#allocation3 + $0x100] sm:$0xff] }
 0x2f8   : > { %v3134_v9 = vsel %vm3069_vm9, %v3131_v14, %v6624_v53  ;;  %v6944_v31 = vpack.c.bf16 %v2666_v18, %v2664_v29  ;;  %3654 = vmatpush.bf16.msrb.mxu1 %v5325_v61 }
 0x2f9   : > { %v2261_v57 = vpop.f32.mrf.mxu0  ;;  %v6946_v51 = vpack.c.bf16 %v3134_v9, %v3132_v16  ;;  %v2336_v5 = vadd.f32 %v6610_v37, %v2300_v2  ;;  %v2123_v32 = vpop.f32.mrf.mxu3 }
 0x2fa   : > { %7771 = vst [vmem:[#allocation15_spill] sm:$0xff] %v6944_v31  ;;  %v1962_v47 = vpop.f32.mrf.mxu2 }
 0x2fb   : > { %7772 = vst [vmem:[#allocation18_spill] sm:$0xff] %v6946_v51  ;;  %v2005_v41 = vadd.f32 %v1962_v47, %v1871_v52  ;;  %v2368_v14 = vmax.f32 %v2336_v5, 0.0 }
 0x2fc   : > { %3493 = vmatmul.bf16.gmra.mxu0 %v6789_v4  ;;  %v6952_v19 = vpop.f32.mrf.mxu1 }
 0x2fd   : > { %v2161_v62 = vadd.f32 %v2118_v56, %v2005_v41  ;;  %v2668_v9 = vrot.slane %v2368_v14, 7  ;;  %v3135_v22 = vrot.slane %v2368_v14, 1 }
 0x2fe   : > { %3301 = vmatmul.bf16.gmra.mxu3 %v6791_v60 }
 0x2ff   : > { %v2301_v29 = vadd.f32 %v2258_v28, %v2161_v62  ;;  %2997 = vmatmul.bf16.gmra.mxu2 %v6759_v3  ;;  %v2669_v28 = vsel %vm2601_vm8, %v6621_v13, %v2668_v9 }
 0x301   : > { %v2263_v18 = vpop.f32.mrf.mxu0  ;;  %v2337_v16 = vadd.f32 %v6610_v37, %v2301_v29  ;;  %v2126_v6 = vpop.f32.mrf.mxu3 }
 0x302   : > { %v1965_v2 = vpop.f32.mrf.mxu2 }
 0x303   : > { %v2369_v63 = vmax.f32 %v2337_v16, 0.0  ;;  %v2006_v52 = vadd.f32 %v1965_v2, %v7775_v48 }
 0x304   : > { %v6958_v47 = vpop.f32.mrf.mxu1 }
 0x305   : > { %v2162_v56 = vadd.f32 %v2121_v40, %v2006_v52  ;;  %v6960_v41 = vpack.c.bf16 %v2369_v63, %v2368_v14  ;;  %v2670_v5 = vrot.slane %v2369_v63, 7  ;;  %v3136_v62 = vrot.slane %v2369_v63, 1  ;;  %v7779_v14 = vld [vmem:[#allocation28_spill] sm:$0xff]  ;;  %v7780_v63 = vld [vmem:[#allocation22_spill] sm:$0xff] }
 0x306   : > { %v1873_v52 = vadd.f32 %v7780_v63, %v7779_v14 }
 0x307   : > { %7776 = vst [vmem:[#allocation19_spill] sm:$0xff] %v6960_v41  ;;  %v2302_v37 = vadd.f32 %v2261_v57, %v2162_v56  ;;  %2900 = vmatmul.bf16.gmra.mxu1 %v6960_v41  ;;  %v2671_v61 = vsel %vm2601_vm8, %v2668_v9, %v2670_v5  ;;  %v3137_v29 = vsel %vm3069_vm9, %v3135_v22, %v3136_v62  ;;  %v6978_v57 = vld [vmem:[%s7539_s2] ss:$0 sm:$0xff]  ;;  %v7781_v41 = vld [vmem:[#allocation27_spill] sm:$0xff] }
 0x308   : > { %v3139_v16 = vsel %vm3069_vm9, %v3136_v62, %v6624_v53  ;;  %v6969_v48 = vpack.c.bf16 %v2671_v61, %v2669_v28 }
 0x309   : > { %v2266_v2 = vpop.f32.mrf.mxu0  ;;  %v6971_v40 = vpack.c.bf16 %v3139_v16, %v3137_v29  ;;  %v2338_v9 = vadd.f32 %v6978_v57, %v2302_v37  ;;  %v2128_v62 = vpop.f32.mrf.mxu3 }
 0x30a   : > { %7777 = vst [vmem:[#allocation20_spill] sm:$0xff] %v6969_v48  ;;  %v1967_v56 = vpop.f32.mrf.mxu2 }
 0x30b   : > { %7778 = vst [vmem:[#allocation16_spill] sm:$0xff] %v6971_v40  ;;  %v2007_v22 = vadd.f32 %v1967_v56, %v1873_v52  ;;  %v2370_v61 = vmax.f32 %v2338_v9, 0.0  ;;  %v5340_v56 = vld [vmem:[#allocation3 + $0x178] sm:$0xff] }
 0x30c   : > { %3498 = vmatmul.bf16.gmra.mxu0 %v6815_v27  ;;  %v6982_v5 = vpop.f32.mrf.mxu1  ;;  %3842 = vmatpush.bf16.msra.mxu2 %v5340_v56 }
 0x30d   : > { %v2163_v28 = vadd.f32 %v2123_v32, %v2007_v22  ;;  %v2673_v60 = vrot.slane %v2370_v61, 7  ;;  %v3140_v32 = vrot.slane %v2370_v61, 1  ;;  %v5356_v22 = vld [vmem:[#allocation3 + $0x1f8] sm:$0xff] }
 0x30e   : > { %3306 = vmatmul.bf16.gmra.mxu3 %v6817_v12  ;;  %4226 = vmatpush.bf16.msra.mxu0 %v5356_v22 }
 0x30f   : > { %v2303_v29 = vadd.f32 %v2263_v18, %v2163_v28  ;;  %3002 = vmatmul.bf16.gmra.mxu2 %v6789_v4  ;;  %v2674_v12 = vsel %vm2601_vm8, %v6621_v13, %v2673_v60 }
 0x311   : > { %v2268_v16 = vpop.f32.mrf.mxu0  ;;  %v2339_v14 = vadd.f32 %v6978_v57, %v2303_v29  ;;  %v2131_v3 = vpop.f32.mrf.mxu3 }
 0x312   : > { %v1970_v63 = vpop.f32.mrf.mxu2 }
 0x313   : > { %v2371_v37 = vmax.f32 %v2339_v14, 0.0  ;;  %v2008_v52 = vadd.f32 %v1970_v63, %v7781_v41  ;;  %v5364_v41 = vld [vmem:[#allocation3 + $0x238] sm:$0xff] }
 0x314   : > { %v6988_v7 = vpop.f32.mrf.mxu1  ;;  %4421 = vmatpush.bf16.msra.mxu1 %v5364_v41 }
 0x315   : > { %v2164_v9 = vadd.f32 %v2126_v6, %v2008_v52  ;;  %v6990_v18 = vpack.c.bf16 %v2371_v37, %v2370_v61  ;;  %v2675_v28 = vrot.slane %v2371_v37, 7  ;;  %v3141_v29 = vrot.slane %v2371_v37, 1  ;;  %v7783_v52 = vld [vmem:[#allocation32_spill] sm:$0xff]  ;;  %v7784_v37 = vld [vmem:[#allocation31_spill] sm:$0xff] }
 0x316   : > { %v1875_v56 = vadd.f32 %v7784_v37, %v7783_v52 }
 0x317   : > { %7782 = vst [vmem:[#allocation17_spill] sm:$0xff] %v6990_v18  ;;  %v2304_v14 = vadd.f32 %v2266_v2, %v2164_v9  ;;  %2905 = vmatmul.bf16.gmra.mxu1 %v6990_v18  ;;  %v2676_v63 = vsel %vm2601_vm8, %v2673_v60, %v2675_v28  ;;  %v3142_v4 = vsel %vm3069_vm9, %v3140_v32, %v3141_v29 }
 0x318   : > { %v6997_v61 = vpack.c.bf16 %v2676_v63, %v2674_v12  ;;  %v3144_v55 = vsel %vm3069_vm9, %v3141_v29, %v6624_v53 }
 0x319   : > { %v2271_v6 = vpop.f32.mrf.mxu0  ;;  %v7003_v43 = vpack.c.bf16 %v3144_v55, %v3142_v4  ;;  %v2340_v2 = vadd.f32 %v6978_v57, %v2304_v14  ;;  %v2133_v32 = vpop.f32.mrf.mxu3  ;;  %v7786_v55 = vld [vmem:[#allocation30_spill] sm:$0xff] }
 0x31a   : > { %v1972_v9 = vpop.f32.mrf.mxu2 }
 0x31b   : > { %7785 = vst [vmem:[#allocation23_spill] sm:$0xff] %v7003_v43  ;;  %v2009_v22 = vadd.f32 %v1972_v9, %v1875_v56  ;;  %v2372_v28 = vmax.f32 %v2340_v2, 0.0 }
 0x31c   : > { %3503 = vmatmul.bf16.gmra.mxu0 %v6844_v44  ;;  %v7007_v60 = vpop.f32.mrf.mxu1 }
 0x31d   : > { %v2165_v12 = vadd.f32 %v2128_v62, %v2009_v22  ;;  %v2678_v41 = vrot.slane %v2372_v28, 7  ;;  %v3145_v18 = vrot.slane %v2372_v28, 1 }
 0x31e   : > { %3311 = vmatmul.bf16.gmra.mxu3 %v6846_v24 }
 0x31f   : > { %v2305_v63 = vadd.f32 %v2268_v16, %v2165_v12  ;;  %3007 = vmatmul.bf16.gmra.mxu2 %v6815_v27  ;;  %v2679_v22 = vsel %vm2601_vm8, %v6621_v13, %v2678_v41 }
 0x321   : > { %v2273_v29 = vpop.f32.mrf.mxu0  ;;  %v2341_v52 = vadd.f32 %v6978_v57, %v2305_v63  ;;  %v3272_v9 = vpop.f32.mrf.mxu3 }
 0x322   : > { %v1975_v4 = vpop.f32.mrf.mxu2 }
 0x323   : > { %v2373_v14 = vmax.f32 %v2341_v52, 0.0  ;;  %v2010_v37 = vadd.f32 %v1975_v4, %v7786_v55 }
 0x324   : > { %v7013_v56 = vpop.f32.mrf.mxu1 }
 0x325   : > { %v2166_v42 = vadd.f32 %v2131_v3, %v2010_v37  ;;  %v7015_v62 = vpack.c.bf16 %v2373_v14, %v2372_v28  ;;  %v2680_v16 = vrot.slane %v2373_v14, 7  ;;  %v3146_v2 = vrot.slane %v2373_v14, 1  ;;  %v7789_v28 = vld [vmem:[#allocation33_spill] sm:$0xff] }
 0x326   : > { %v1877_v14 = vadd.f32 %v6821_v23, %v7789_v28 }
 0x327   : > { %7787 = vst [vmem:[#allocation24_spill] sm:$0xff] %v7015_v62  ;;  %v2306_v12 = vadd.f32 %v2271_v6, %v2166_v42  ;;  %2910 = vmatmul.bf16.gmra.mxu1 %v7015_v62  ;;  %v2681_v63 = vsel %vm2601_vm8, %v2678_v41, %v2680_v16  ;;  %v3147_v52 = vsel %vm3069_vm9, %v3145_v18, %v3146_v2  ;;  %v5339_v62 = vld [vmem:[#allocation3 + $0x170] sm:$0xff] }
 0x328   : > { %v3149_v4 = vsel %vm3069_vm9, %v3146_v2, %v6624_v53  ;;  %v7024_v24 = vpack.c.bf16 %v2681_v63, %v2679_v22  ;;  %v5347_v2 = vld [vmem:[#allocation3 + $0x1b0] sm:$0xff]  ;;  %3843 = vmatpush.bf16.msra.mxu2 %v5339_v62  ;;  %v7791_v62 = vld [vmem:[#allocation34_spill] sm:$0xff] }
 0x329   : > { %v3469_v55 = vpop.f32.mrf.mxu0  ;;  %v7026_v3 = vpack.c.bf16 %v3149_v4, %v3147_v52  ;;  %v2342_v37 = vadd.f32 %v6978_v57, %v2306_v12  ;;  %v3274_v18 = vpop.f32.mrf.mxu3  ;;  %4040 = vmatpush.bf16.msra.mxu3 %v5347_v2 }
 0x32a   : > { %v1977_v42 = vpop.f32.mrf.mxu2 }
 0x32b   : > { %7788 = vst [vmem:[#allocation21_spill] sm:$0xff] %v7026_v3  ;;  %v2011_v6 = vadd.f32 %v1977_v42, %v1877_v14  ;;  %v2374_v27 = vmax.f32 %v2342_v37, 0.0 }
 0x32c   : > { %3508 = vmatmul.bf16.gmra.mxu0 %v6869_v15  ;;  %v7032_v41 = vpop.f32.mrf.mxu1 }
 0x32d   : > { %v2167_v16 = vadd.f32 %v2133_v32, %v2011_v6  ;;  %v3388_v52 = vrot.slane %v2374_v27, 7  ;;  %v3769_v42 = vrot.slane %v2374_v27, 1 }
 0x32e   : > { %3316 = vmatmul.bf16.gmra.mxu3 %v6871_v54 }
 0x32f   : > { %v2307_v22 = vadd.f32 %v2273_v29, %v2167_v16  ;;  %3012 = vmatmul.bf16.gmra.mxu2 %v6844_v44  ;;  %v5355_v29 = vld [vmem:[#allocation3 + $0x1f0] sm:$0xff] }
 0x330   : > { %4227 = vmatpush.bf16.msra.mxu0 %v5355_v29 }
 0x331   : > { %v3471_v63 = vpop.f32.mrf.mxu0  ;;  %v2343_v23 = vadd.f32 %v6978_v57, %v2307_v22  ;;  %v3277_v32 = vpop.f32.mrf.mxu3  ;;  %v3389_v57 = vsel %vm2601_vm8, %v6621_v13, %v3388_v52  ;;  %v5363_v22 = vld [vmem:[#allocation3 + $0x230] sm:$0xff] }
 0x332   : > { %v2973_v12 = vpop.f32.mrf.mxu2  ;;  %4422 = vmatpush.bf16.msra.mxu1 %v5363_v22 }
 0x333   : > { %v2375_v4 = vmax.f32 %v2343_v23, 0.0  ;;  %v2974_v28 = vadd.f32 %v2973_v12, %v6832_v45 }
 0x334   : > { %v7038_v14 = vpop.f32.mrf.mxu1 }
 0x335   : > { %v3352_v37 = vadd.f32 %v3272_v9, %v2974_v28  ;;  %v3390_v6 = vrot.slane %v2375_v4, 7  ;;  %v7040_v16 = vpack.c.bf16 %v2375_v4, %v2374_v27  ;;  %v3770_v2 = vrot.slane %v2375_v4, 1 }
 0x337   : > { %7790 = vst [vmem:[#allocation26_spill] sm:$0xff] %v7040_v16  ;;  %3655 = vmatmul.bf16.vlgmr.msrb.gmra.mxu1 %v7791_v62  ;;  %v3391_v23 = vsel %vm2601_vm8, %v3388_v52, %v3390_v6  ;;  %v7046_v45 = vadd.f32 %v3469_v55, %v3352_v37  ;;  %v3771_v12 = vsel %vm3069_vm9, %v3769_v42, %v3770_v2  ;;  %v7794_v62 = vld [vmem:[#allocation35_spill] sm:$0xff]  ;;  %v5353_v16 = vld [vmem:[#allocation3 + $0x1e0] sm:$0xff] }
 0x338   : > { %v7049_v9 = vpack.c.bf16 %v3391_v23, %v3389_v57  ;;  %v3773_v27 = vsel %vm3069_vm9, %v3770_v2, %v6624_v53 }
 0x339   : > { %v3474_v54 = vpop.f32.mrf.mxu0  ;;  %v7053_v4 = vpack.c.bf16 %v3773_v27, %v3771_v12  ;;  %v3279_v55 = vpop.f32.mrf.mxu3 }
 0x33a   : > { %7792 = vst [vmem:[#allocation28_spill] sm:$0xff] %v7049_v9  ;;  %v2975_v13 = vpop.f32.mrf.mxu2 }
 0x33b   : > { %7793 = vst [vmem:[#allocation22_spill] sm:$0xff] %v7053_v4  ;;  %v2976_v28 = vadd.f32 %v2975_v13, %v6852_v36 }
 0x33c   : > { %3513 = vmatmul.bf16.gmra.mxu0 %v6894_v50  ;;  %v7057_v29 = vpop.f32.mrf.mxu1 }
 0x33d   : > { %v3353_v52 = vadd.f32 %v3274_v18, %v2976_v28  ;;  %v5338_v28 = vld [vmem:[#allocation3 + $0x168] sm:$0xff] }
 0x33e   : > { %3321 = vmatmul.bf16.gmra.mxu3 %v6896_v21  ;;  %3844 = vmatpush.bf16.msra.mxu2 %v5338_v28 }
 0x33f   : > { %3017 = vmatmul.bf16.gmra.mxu2 %v6869_v15  ;;  %v7060_v42 = vadd.f32 %v3471_v63, %v3353_v52 }
 0x341   : > { %v3476_v37 = vpop.f32.mrf.mxu0  ;;  %v3282_v57 = vpop.f32.mrf.mxu3 }
 0x342   : > { %v2978_v53 = vpop.f32.mrf.mxu2 }
 0x343   : > { %v2979_v6 = vadd.f32 %v2978_v53, %v6858_v35  ;;  %v5346_v35 = vld [vmem:[#allocation3 + $0x1a8] sm:$0xff] }
 0x344   : > { %v7064_v2 = vpop.f32.mrf.mxu1  ;;  %4041 = vmatpush.bf16.msra.mxu3 %v5346_v35 }
 0x345   : > { %v3354_v36 = vadd.f32 %v3277_v32, %v2979_v6 }
 0x347   : > { %3660 = vmatmul.bf16.gmra.mxu1 %v7794_v62  ;;  %v7067_v22 = vadd.f32 %v3474_v54, %v3354_v36 }
 0x349   : > { %v3479_v23 = vpop.f32.mrf.mxu0  ;;  %v3284_v27 = vpop.f32.mrf.mxu3 }
 0x34a   : > { %v2980_v18 = vpop.f32.mrf.mxu2 }
 0x34b   : > { %v2981_v12 = vadd.f32 %v2980_v18, %v6877_v20  ;;  %v5354_v18 = vld [vmem:[#allocation3 + $0x1e8] sm:$0xff] }
 0x34c   : > { %3518 = vmatmul.bf16.gmra.mxu0 %v6919_v34  ;;  %v7071_v63 = vpop.f32.mrf.mxu1 }
 0x34d   : > { %v3355_v13 = vadd.f32 %v3279_v55, %v2981_v12  ;;  %v7795_v55 = vld [vmem:[#allocation9_spill] sm:$0xff]  ;;  %4228 = vmatpush.bf16.msra.mxu0 %v5354_v18  ;;  %v5362_v12 = vld [vmem:[#allocation3 + $0x228] sm:$0xff] }
 0x34e   : > { %3326 = vmatmul.bf16.gmra.mxu3 %v6921_v58  ;;  %4423 = vmatpush.bf16.msra.mxu1 %v5362_v12 }
 0x34f   : > { %3022 = vmatmul.bf16.gmra.mxu2 %v6894_v50  ;;  %v7074_v32 = vadd.f32 %v3476_v37, %v3355_v13 }
 0x351   : > { %v3481_v52 = vpop.f32.mrf.mxu0  ;;  %v3287_v6 = vpop.f32.mrf.mxu3  ;;  %4229 = vmatpush.bf16.msra.mxu0 %v5353_v16  ;;  %v5342_v16 = vld [vmem:[#allocation3 + $0x188] sm:$0xff] }
 0x352   : > { %v2983_v54 = vpop.f32.mrf.mxu2 }
 0x353   : > { %v2984_v20 = vadd.f32 %v2983_v54, %v6883_v25 }
 0x354   : > { %v7078_v53 = vpop.f32.mrf.mxu1 }
 0x355   : > { %v3356_v36 = vadd.f32 %v3282_v57, %v2984_v20 }
 0x357   : > { %3665 = vmatmul.bf16.gmra.mxu1 %v7795_v55  ;;  %v7081_v4 = vadd.f32 %v3479_v23, %v3356_v36 }
 0x359   : > { %v3484_v37 = vpop.f32.mrf.mxu0  ;;  %v3289_v25 = vpop.f32.mrf.mxu3 }
 0x35a   : > { %v2985_v13 = vpop.f32.mrf.mxu2 }
 0x35b   : > { %v2986_v28 = vadd.f32 %v2985_v13, %v6902_v17  ;;  %v7796_v13 = vld [vmem:[#allocation37_spill] sm:$0xff] }
 0x35c   : > { %3523 = vmatmul.bf16.gmra.mxu0 %v6944_v31  ;;  %v7085_v35 = vpop.f32.mrf.mxu1 }
 0x35d   : > { %v3357_v54 = vadd.f32 %v3284_v27, %v2986_v28 }
 0x35e   : > { %3331 = vmatmul.bf16.gmra.mxu3 %v6946_v51 }
 0x35f   : > { %3027 = vmatmul.bf16.gmra.mxu2 %v6919_v34  ;;  %v7088_v57 = vadd.f32 %v3481_v52, %v3357_v54  ;;  %v5337_v34 = vld [vmem:[#allocation3 + $0x160] sm:$0xff] }
 0x360   : > { %3845 = vmatpush.bf16.msra.mxu2 %v5337_v34 }
 0x361   : > { %v3486_v20 = vpop.f32.mrf.mxu0  ;;  %v3292_v12 = vpop.f32.mrf.mxu3 }
 0x362   : > { %v2988_v23 = vpop.f32.mrf.mxu2 }
 0x363   : > { %v2989_v36 = vadd.f32 %v2988_v23, %v6908_v49  ;;  %v5345_v49 = vld [vmem:[#allocation3 + $0x1a0] sm:$0xff] }
 0x364   : > { %v7092_v18 = vpop.f32.mrf.mxu1  ;;  %4042 = vmatpush.bf16.msra.mxu3 %v5345_v49 }
 0x365   : > { %v3358_v17 = vadd.f32 %v3287_v6, %v2989_v36 }
 0x367   : > { %3670 = vmatmul.bf16.gmra.mxu1 %v7796_v13  ;;  %v7095_v58 = vadd.f32 %v3484_v37, %v3358_v17 }
 0x369   : > { %v3489_v21 = vpop.f32.mrf.mxu0  ;;  %v3294_v54 = vpop.f32.mrf.mxu3 }
 0x36a   : > { %v2990_v27 = vpop.f32.mrf.mxu2 }
 0x36b   : > { %v2991_v28 = vadd.f32 %v2990_v27, %v6927_v10 }
 0x36c   : > { %3528 = vmatmul.bf16.gmra.mxu0 %v6969_v48  ;;  %v7099_v52 = vpop.f32.mrf.mxu1 }
 0x36d   : > { %v3359_v51 = vadd.f32 %v3289_v25, %v2991_v28  ;;  %v5344_v25 = vld [vmem:[#allocation3 + $0x198] sm:$0xff]  ;;  %v5361_v28 = vld [vmem:[#allocation3 + $0x220] sm:$0xff] }
 0x36e   : > { %3336 = vmatmul.bf16.gmra.mxu3 %v6971_v40  ;;  %4424 = vmatpush.bf16.msra.mxu1 %v5361_v28  ;;  %v5336_v40 = vld [vmem:[#allocation3 + $0x158] sm:$0xff] }
 0x36f   : > { %3032 = vmatmul.bf16.gmra.mxu2 %v6944_v31  ;;  %v7102_v6 = vadd.f32 %v3486_v20, %v3359_v51  ;;  %4043 = vmatpush.bf16.msra.mxu3 %v5344_v25 }
 0x370   : > { %3846 = vmatpush.bf16.msra.mxu2 %v5336_v40 }
 0x371   : > { %v3491_v23 = vpop.f32.mrf.mxu0  ;;  %v3297_v17 = vpop.f32.mrf.mxu3 }
 0x372   : > { %v2993_v37 = vpop.f32.mrf.mxu2 }
 0x373   : > { %v2994_v10 = vadd.f32 %v2993_v37, %v6933_v0  ;;  %v5343_v0 = vld [vmem:[#allocation3 + $0x190] sm:$0xff] }
 0x374   : > { %v7106_v36 = vpop.f32.mrf.mxu1  ;;  %4044 = vmatpush.bf16.msra.mxu3 %v5343_v0  ;;  %v5351_v0 = vld [vmem:[#allocation3 + $0x1d0] sm:$0xff] }
 0x375   : > { %v3360_v27 = vadd.f32 %v3292_v12, %v2994_v10 }
 0x377   : > { %3675 = vmatmul.bf16.gmra.mxu1 %v6743_v59  ;;  %v7109_v49 = vadd.f32 %v3489_v21, %v3360_v27  ;;  %v5352_v21 = vld [vmem:[#allocation3 + $0x1d8] sm:$0xff] }
 0x378   : > { %4045 = vmatpush.bf16.msra.mxu3 %v5342_v16  ;;  %4230 = vmatpush.bf16.msra.mxu0 %v5352_v21  ;;  %v5350_v16 = vld [vmem:[#allocation3 + $0x1c8] sm:$0xff] }
 0x379   : > { %v3494_v51 = vpop.f32.mrf.mxu0  ;;  %v3299_v12 = vpop.f32.mrf.mxu3 }
 0x37a   : > { %v2995_v34 = vpop.f32.mrf.mxu2 }
 0x37b   : > { %v2996_v20 = vadd.f32 %v2995_v34, %v6952_v19  ;;  %v5341_v34 = vld [vmem:[#allocation3 + $0x180] sm:$0xff] }
 0x37c   : > { %3533 = vmatmul.bf16.gmra.mxu0 %v6997_v61  ;;  %v7113_v37 = vpop.f32.mrf.mxu1  ;;  %4046 = vmatpush.bf16.msra.mxu3 %v5341_v34 }
 0x37d   : > { %v3361_v10 = vadd.f32 %v3294_v54, %v2996_v20  ;;  %v5335_v20 = vld [vmem:[#allocation3 + $0x150] sm:$0xff]  ;;  %4231 = vmatpush.bf16.msra.mxu0 %v5351_v0 }
 0x37e   : > { %3341 = vmatmul.bf16.gmra.mxu3 %v7003_v43  ;;  %3847 = vmatpush.bf16.msra.mxu2 %v5335_v20 }
 0x37f   : > { %3037 = vmatmul.bf16.gmra.mxu2 %v6969_v48  ;;  %v7116_v27 = vadd.f32 %v3491_v23, %v3361_v10  ;;  %v5334_v23 = vld [vmem:[#allocation3 + $0x148] sm:$0xff] }
 0x381   : > { %v3496_v25 = vpop.f32.mrf.mxu0  ;;  %v3302_v54 = vpop.f32.mrf.mxu3  ;;  %4232 = vmatpush.bf16.msra.mxu0 %v5350_v16  ;;  %v5360_v16 = vld [vmem:[#allocation3 + $0x218] sm:$0xff] }
 0x382   : > { %v2998_v19 = vpop.f32.mrf.mxu2  ;;  %3848 = vmatpush.bf16.msra.mxu2 %v5334_v23  ;;  %4425 = vmatpush.bf16.msra.mxu1 %v5360_v16 }
 0x383   : > { %v2999_v28 = vadd.f32 %v2998_v19, %v6958_v47 }
 0x384   : > { %v7120_v31 = vpop.f32.mrf.mxu1 }
 0x385   : > { %v3362_v48 = vadd.f32 %v3297_v17, %v2999_v28  ;;  %v5333_v17 = vld [vmem:[#allocation3 + $0x140] sm:$0xff] }
 0x386   : > { %v5349_v28 = vld [vmem:[#allocation3 + $0x1c0] sm:$0xff]  ;;  %3849 = vmatpush.bf16.msra.mxu2 %v5333_v17 }
 0x387   : > { %3680 = vmatmul.bf16.gmra.mxu1 %v6780_v30  ;;  %v7123_v10 = vadd.f32 %v3494_v51, %v3362_v48  ;;  %4233 = vmatpush.bf16.msra.mxu0 %v5349_v28 }
 0x389   : > { %v3499_v40 = vpop.f32.mrf.mxu0  ;;  %v3304_v43 = vpop.f32.mrf.mxu3 }
 0x38a   : > { %v3000_v21 = vpop.f32.mrf.mxu2 }
 0x38b   : > { %v3001_v47 = vadd.f32 %v3000_v21, %v6982_v5 }
 0x38c   : > { %3538 = vmatmul.bf16.gmra.mxu0 %v7024_v24  ;;  %v7127_v19 = vpop.f32.mrf.mxu1 }
 0x38d   : > { %v3363_v34 = vadd.f32 %v3299_v12, %v3001_v47 }
 0x38e   : > { %3346 = vmatmul.bf16.gmra.mxu3 %v7026_v3 }
 0x38f   : > { %3042 = vmatmul.bf16.gmra.mxu2 %v6997_v61  ;;  %v7130_v48 = vadd.f32 %v3496_v25, %v3363_v34 }
 0x391   : > { %v3501_v51 = vpop.f32.mrf.mxu0  ;;  %v3307_v23 = vpop.f32.mrf.mxu3 }
 0x392   : > { %v3003_v20 = vpop.f32.mrf.mxu2 }
 0x393   : > { %v3004_v5 = vadd.f32 %v3003_v20, %v6988_v7 }
 0x394   : > { %v7134_v0 = vpop.f32.mrf.mxu1 }
 0x395   : > { %v3364_v21 = vadd.f32 %v3302_v54, %v3004_v5 }
 0x397   : > { %3685 = vmatmul.bf16.gmra.mxu1 %v6806_v33  ;;  %v7137_v12 = vadd.f32 %v3499_v40, %v3364_v21 }
 0x399   : > { %v3504_v47 = vpop.f32.mrf.mxu0  ;;  %v3309_v34 = vpop.f32.mrf.mxu3 }
 0x39a   : > { %v3005_v25 = vpop.f32.mrf.mxu2 }
 0x39b   : > { %v3006_v17 = vadd.f32 %v3005_v25, %v7007_v60 }
 0x39c   : > { %3543 = vmatmul.bf16.gmra.mxu0 %v7049_v9  ;;  %v7141_v28 = vpop.f32.mrf.mxu1 }
 0x39d   : > { %v3365_v7 = vadd.f32 %v3304_v43, %v3006_v17 }
 0x39e   : > { %4047 = vmatmul.bf16.vlgmr.msra.gmra.mxu3 %v6658_v26 }
 0x39f   : > { %3047 = vmatmul.bf16.gmra.mxu2 %v7024_v24  ;;  %v7144_v20 = vadd.f32 %v3501_v51, %v3365_v7 }
 0x3a1   : > { %v3506_v54 = vpop.f32.mrf.mxu0  ;;  %v3312_v16 = vpop.f32.mrf.mxu3 }
 0x3a2   : > { %v3008_v40 = vpop.f32.mrf.mxu2 }
 0x3a3   : > { %v3009_v5 = vadd.f32 %v3008_v40, %v7013_v56 }
 0x3a4   : > { %v7148_v21 = vpop.f32.mrf.mxu1 }
 0x3a5   : > { %v3366_v60 = vadd.f32 %v3307_v23, %v3009_v5 }
 0x3a7   : > { %3690 = vmatmul.bf16.gmra.mxu1 %v6835_v38  ;;  %v7151_v25 = vadd.f32 %v3504_v47, %v3366_v60 }
 0x3a9   : > { %v3509_v3 = vpop.f32.mrf.mxu0  ;;  %v3314_v26 = vpop.f32.mrf.mxu3 }
 0x3aa   : > { %v3010_v43 = vpop.f32.mrf.mxu2 }
 0x3ab   : > { %v3011_v17 = vadd.f32 %v3010_v43, %v7032_v41 }
 0x3ac   : > { %4234 = vmatmul.bf16.vlgmr.msra.gmra.mxu0 %v7794_v62  ;;  %v7155_v51 = vpop.f32.mrf.mxu1  ;;  %v5359_v62 = vld [vmem:[#allocation3 + $0x210] sm:$0xff] }
 0x3ad   : > { %v3367_v7 = vadd.f32 %v3309_v34, %v3011_v17  ;;  %4426 = vmatpush.bf16.msra.mxu1 %v5359_v62 }
 0x3ae   : > { %4052 = vmatmul.bf16.gmra.mxu3 %v6681_v11 }
 0x3af   : > { %3850 = vmatmul.bf16.vlgmr.msra.gmra.mxu2 %v6637_v39  ;;  %v7158_v56 = vadd.f32 %v3506_v54, %v3367_v7 }
 0x3b1   : > { %v3511_v40 = vpop.f32.mrf.mxu0  ;;  %v3317_v60 = vpop.f32.mrf.mxu3 }
 0x3b2   : > { %v3013_v23 = vpop.f32.mrf.mxu2 }
 0x3b3   : > { %v3014_v47 = vadd.f32 %v3013_v23, %v7038_v14 }
 0x3b4   : > { %v3656_v5 = vpop.f32.mrf.mxu1 }
 0x3b5   : > { %v3368_v9 = vadd.f32 %v3312_v16, %v3014_v47  ;;  %v7163_v41 = vadd.f32 %v3656_v5, %v7046_v45 }
 0x3b7   : > { %3695 = vmatmul.bf16.gmra.mxu1 %v6860_v1  ;;  %v7166_v34 = vadd.f32 %v3509_v3, %v3368_v9 }
 0x3b9   : > { %v3514_v39 = vpop.f32.mrf.mxu0  ;;  %v3319_v14 = vpop.f32.mrf.mxu3 }
 0x3ba   : > { %v3015_v54 = vpop.f32.mrf.mxu2 }
 0x3bb   : > { %v3016_v43 = vadd.f32 %v3015_v54, %v7057_v29 }
 0x3bc   : > { %4239 = vmatmul.bf16.gmra.mxu0 %v7795_v55  ;;  %v3658_v11 = vpop.f32.mrf.mxu1 }
 0x3bd   : > { %v3369_v17 = vadd.f32 %v3314_v26, %v3016_v43  ;;  %v7171_v16 = vadd.f32 %v3658_v11, %v7060_v42  ;;  %v7797_v26 = vld [vmem:[#allocation11_spill] sm:$0xff] }
 0x3be   : > { %4057 = vmatmul.bf16.gmra.mxu3 %v6717_v46 }
 0x3bf   : > { %3855 = vmatmul.bf16.gmra.mxu2 %v6660_v8  ;;  %v7174_v45 = vadd.f32 %v3511_v40, %v3369_v17  ;;  %v7799_v17 = vld [vmem:[#allocation39_spill] sm:$0xff] }
 0x3c1   : > { %v3516_v7 = vpop.f32.mrf.mxu0  ;;  %v3322_v29 = vpop.f32.mrf.mxu3 }
 0x3c2   : > { %v3018_v3 = vpop.f32.mrf.mxu2 }
 0x3c3   : > { %v3019_v9 = vadd.f32 %v3018_v3, %v7064_v2 }
 0x3c4   : > { %v3661_v23 = vpop.f32.mrf.mxu1 }
 0x3c5   : > { %v3370_v47 = vadd.f32 %v3317_v60, %v3019_v9  ;;  %v7179_v55 = vadd.f32 %v3661_v23, %v7067_v22  ;;  %v7798_v60 = vld [vmem:[#allocation36_spill] sm:$0xff] }
 0x3c7   : > { %3700 = vmatmul.bf16.gmra.mxu1 %v7797_v26  ;;  %v7182_v42 = vadd.f32 %v3514_v39, %v3370_v47 }
 0x3c9   : > { %v3519_v5 = vpop.f32.mrf.mxu0  ;;  %v3324_v54 = vpop.f32.mrf.mxu3 }
 0x3ca   : > { %v3020_v62 = vpop.f32.mrf.mxu2 }
 0x3cb   : > { %v3021_v40 = vadd.f32 %v3020_v62, %v7071_v63 }
 0x3cc   : > { %4244 = vmatmul.bf16.gmra.mxu0 %v7796_v13  ;;  %v3663_v46 = vpop.f32.mrf.mxu1 }
 0x3cd   : > { %v3371_v43 = vadd.f32 %v3319_v14, %v3021_v40  ;;  %v7187_v2 = vadd.f32 %v3663_v46, %v7074_v32  ;;  %v7800_v14 = vld [vmem:[#allocation13_spill] sm:$0xff]  ;;  %v5358_v32 = vld [vmem:[#allocation3 + $0x208] sm:$0xff] }
 0x3ce   : > { %4062 = vmatmul.bf16.gmra.mxu3 %v7799_v17  ;;  %4427 = vmatpush.bf16.msra.mxu1 %v5358_v32 }
 0x3cf   : > { %3860 = vmatmul.bf16.gmra.mxu2 %v7798_v60  ;;  %v7190_v22 = vadd.f32 %v3516_v7, %v3371_v43 }
 0x3d1   : > { %v3521_v11 = vpop.f32.mrf.mxu0  ;;  %v3327_v63 = vpop.f32.mrf.mxu3 }
 0x3d2   : > { %v3023_v39 = vpop.f32.mrf.mxu2 }
 0x3d3   : > { %v3024_v3 = vadd.f32 %v3023_v39, %v7078_v53 }
 0x3d4   : > { %v3666_v9 = vpop.f32.mrf.mxu1 }
 0x3d5   : > { %v3372_v23 = vadd.f32 %v3322_v29, %v3024_v3  ;;  %v7195_v13 = vadd.f32 %v3666_v9, %v7081_v4  ;;  %v7801_v4 = vld [vmem:[#allocation38_spill] sm:$0xff] }
 0x3d7   : > { %3705 = vmatmul.bf16.gmra.mxu1 %v7800_v14  ;;  %v7198_v47 = vadd.f32 %v3519_v5, %v3372_v23  ;;  %v7802_v5 = vld [vmem:[#allocation40_spill] sm:$0xff] }
 0x3d9   : > { %v3524_v62 = vpop.f32.mrf.mxu0  ;;  %v3329_v53 = vpop.f32.mrf.mxu3 }
 0x3da   : > { %v3025_v7 = vpop.f32.mrf.mxu2 }
 0x3db   : > { %v3026_v40 = vadd.f32 %v3025_v7, %v7085_v35 }
 0x3dc   : > { %4249 = vmatmul.bf16.gmra.mxu0 %v6743_v59  ;;  %v3668_v46 = vpop.f32.mrf.mxu1 }
 0x3dd   : > { %v3373_v43 = vadd.f32 %v3324_v54, %v3026_v40  ;;  %v7203_v29 = vadd.f32 %v3668_v46, %v7088_v57  ;;  %v7803_v54 = vld [vmem:[#allocation29_spill] sm:$0xff] }
 0x3de   : > { %4067 = vmatmul.bf16.gmra.mxu3 %v7802_v5 }
 0x3df   : > { %3865 = vmatmul.bf16.gmra.mxu2 %v7801_v4  ;;  %v7206_v17 = vadd.f32 %v3521_v11, %v3373_v43 }
 0x3e1   : > { %v3526_v39 = vpop.f32.mrf.mxu0  ;;  %v3332_v35 = vpop.f32.mrf.mxu3 }
 0x3e2   : > { %v3028_v3 = vpop.f32.mrf.mxu2 }
 0x3e3   : > { %v3029_v9 = vadd.f32 %v3028_v3, %v7092_v18 }
 0x3e4   : > { %v3671_v23 = vpop.f32.mrf.mxu1 }
 0x3e5   : > { %v3374_v32 = vadd.f32 %v3327_v63, %v3029_v9  ;;  %v7211_v59 = vadd.f32 %v3671_v23, %v7095_v58  ;;  %v7804_v63 = vld [vmem:[#allocation10_spill] sm:$0xff]  ;;  %v7805_v9 = vld [vmem:[#allocation43_spill] sm:$0xff] }
 0x3e7   : > { %3710 = vmatmul.bf16.gmra.mxu1 %v7803_v54  ;;  %v7214_v57 = vadd.f32 %v3524_v62, %v3374_v32 }
 0x3e9   : > { %v3529_v7 = vpop.f32.mrf.mxu0  ;;  %v3334_v43 = vpop.f32.mrf.mxu3 }
 0x3ea   : > { %v3030_v40 = vpop.f32.mrf.mxu2 }
 0x3eb   : > { %v3031_v11 = vadd.f32 %v3030_v40, %v7099_v52 }
 0x3ec   : > { %4254 = vmatmul.bf16.gmra.mxu0 %v6780_v30  ;;  %v3673_v46 = vpop.f32.mrf.mxu1 }
 0x3ed   : > { %v3375_v5 = vadd.f32 %v3329_v53, %v3031_v11  ;;  %v7219_v18 = vadd.f32 %v3673_v46, %v7102_v6  ;;  %v7806_v53 = vld [vmem:[#allocation19_spill] sm:$0xff]  ;;  %v5357_v6 = vld [vmem:[#allocation3 + $0x200] sm:$0xff] }
 0x3ee   : > { %4072 = vmatmul.bf16.gmra.mxu3 %v7805_v9  ;;  %4428 = vmatpush.bf16.msra.mxu1 %v5357_v6 }
 0x3ef   : > { %3870 = vmatmul.bf16.gmra.mxu2 %v7804_v63  ;;  %v7222_v58 = vadd.f32 %v3526_v39, %v3375_v5 }
 0x3f1   : > { %v3531_v3 = vpop.f32.mrf.mxu0  ;;  %v3337_v52 = vpop.f32.mrf.mxu3 }
 0x3f2   : > { %v3033_v62 = vpop.f32.mrf.mxu2 }
 0x3f3   : > { %v3034_v23 = vadd.f32 %v3033_v62, %v7106_v36 }
 0x3f4   : > { %v3676_v32 = vpop.f32.mrf.mxu1 }
 0x3f5   : > { %v3376_v40 = vadd.f32 %v3332_v35, %v3034_v23  ;;  %v7227_v30 = vadd.f32 %v3676_v32, %v7109_v49  ;;  %v7808_v49 = vld [vmem:[#allocation41_spill] sm:$0xff] }
 0x3f7   : > { %3715 = vmatmul.bf16.gmra.mxu1 %v7806_v53  ;;  %v7230_v11 = vadd.f32 %v3529_v7, %v3376_v40 }
 0x3f9   : > { %v3534_v46 = vpop.f32.mrf.mxu0  ;;  %v3339_v36 = vpop.f32.mrf.mxu3 }
 0x3fa   : > { %v3035_v39 = vpop.f32.mrf.mxu2 }
 0x3fb   : > { %v3036_v5 = vadd.f32 %v3035_v39, %v7113_v37 }
 0x3fc   : > { %4259 = vmatmul.bf16.gmra.mxu0 %v6806_v33  ;;  %v3678_v9 = vpop.f32.mrf.mxu1 }
 0x3fd   : > { %v3377_v62 = vadd.f32 %v3334_v43, %v3036_v5  ;;  %v7235_v35 = vadd.f32 %v3678_v9, %v7116_v27  ;;  %v7809_v43 = vld [vmem:[#allocation17_spill] sm:$0xff] }
 0x3fe   : > { %4077 = vmatmul.bf16.gmra.mxu3 %v6844_v44 }
 0x3ff   : > { %7807 = vst [vmem:[#allocation27_spill] sm:$0xff] %v7235_v35  ;;  %3875 = vmatmul.bf16.gmra.mxu2 %v7808_v49  ;;  %v7238_v23 = vadd.f32 %v3531_v3, %v3377_v62 }
 0x401   : > { %v3536_v32 = vpop.f32.mrf.mxu0  ;;  %v3342_v37 = vpop.f32.mrf.mxu3 }
 0x402   : > { %v3038_v7 = vpop.f32.mrf.mxu2 }
 0x403   : > { %v3039_v40 = vadd.f32 %v3038_v7, %v7120_v31 }
 0x404   : > { %v3681_v6 = vpop.f32.mrf.mxu1 }
 0x405   : > { %v3378_v39 = vadd.f32 %v3337_v52, %v3039_v40  ;;  %v7243_v33 = vadd.f32 %v3681_v6, %v7123_v10  ;;  %v7810_v52 = vld [vmem:[#allocation44_spill] sm:$0xff] }
 0x407   : > { %3720 = vmatmul.bf16.gmra.mxu1 %v7809_v43  ;;  %v7246_v27 = vadd.f32 %v3534_v46, %v3378_v39 }
 0x409   : > { %v3539_v5 = vpop.f32.mrf.mxu0  ;;  %v3344_v62 = vpop.f32.mrf.mxu3 }
 0x40a   : > { %v3040_v9 = vpop.f32.mrf.mxu2 }
 0x40b   : > { %v3041_v3 = vadd.f32 %v3040_v9, %v7127_v19 }
 0x40c   : > { %4264 = vmatmul.bf16.gmra.mxu0 %v6835_v38  ;;  %v3683_v44 = vpop.f32.mrf.mxu1 }
 0x40d   : > { %v3379_v35 = vadd.f32 %v3339_v36, %v3041_v3  ;;  %v7251_v31 = vadd.f32 %v3683_v44, %v7130_v48  ;;  %v7811_v36 = vld [vmem:[#allocation24_spill] sm:$0xff] }
 0x40e   : > { %4082 = vmatmul.bf16.gmra.mxu3 %v6869_v15 }
 0x40f   : > { %3880 = vmatmul.bf16.gmra.mxu2 %v7810_v52  ;;  %v7254_v10 = vadd.f32 %v3536_v32, %v3379_v35 }
 0x411   : > { %v3541_v7 = vpop.f32.mrf.mxu0  ;;  %v3347_v19 = vpop.f32.mrf.mxu3 }
 0x412   : > { %v3043_v46 = vpop.f32.mrf.mxu2 }
 0x413   : > { %v3044_v40 = vadd.f32 %v3043_v46, %v7134_v0 }
 0x414   : > { %v3686_v6 = vpop.f32.mrf.mxu1 }
 0x415   : > { %v3380_v39 = vadd.f32 %v3342_v37, %v3044_v40  ;;  %v7259_v38 = vadd.f32 %v3686_v6, %v7137_v12  ;;  %v7812_v37 = vld [vmem:[#allocation46_spill] sm:$0xff] }
 0x417   : > { %3725 = vmatmul.bf16.gmra.mxu1 %v7811_v36  ;;  %v7262_v48 = vadd.f32 %v3539_v5, %v3380_v39 }
 0x419   : > { %v3544_v9 = vpop.f32.mrf.mxu0  ;;  %v3349_v32 = vpop.f32.mrf.mxu3 }
 0x41a   : > { %v3045_v3 = vpop.f32.mrf.mxu2 }
 0x41b   : > { %v3046_v35 = vadd.f32 %v3045_v3, %v7141_v28 }
 0x41c   : > { %4269 = vmatmul.bf16.gmra.mxu0 %v6860_v1  ;;  %v3688_v15 = vpop.f32.mrf.mxu1 }
 0x41d   : > { %v3381_v44 = vadd.f32 %v3344_v62, %v3046_v35  ;;  %v7267_v0 = vadd.f32 %v3688_v15, %v7144_v20  ;;  %v7813_v62 = vld [vmem:[#allocation26_spill] sm:$0xff] }
 0x41e   : > { %4087 = vmatmul.bf16.gmra.mxu3 %v6894_v50 }
 0x41f   : > { %3885 = vmatmul.bf16.gmra.mxu2 %v7812_v37  ;;  %v7270_v12 = vadd.f32 %v3541_v7, %v3381_v44 }
 0x421   : > { %v3546_v46 = vpop.f32.mrf.mxu0  ;;  %v4048_v39 = vpop.f32.mrf.mxu3 }
 0x422   : > { %v3048_v5 = vpop.f32.mrf.mxu2 }
 0x423   : > { %v3049_v40 = vadd.f32 %v3048_v5, %v7148_v21  ;;  %v7815_v5 = vld [vmem:[#allocation12_spill] sm:$0xff] }
 0x424   : > { %v3691_v6 = vpop.f32.mrf.mxu1 }
 0x425   : > { %v3382_v28 = vadd.f32 %v3347_v19, %v3049_v40  ;;  %v7275_v1 = vadd.f32 %v3691_v6, %v7151_v25  ;;  %v7814_v19 = vld [vmem:[#allocation47_spill] sm:$0xff] }
 0x427   : > { %3730 = vmatmul.bf16.gmra.mxu1 %v7813_v62  ;;  %v7278_v20 = vadd.f32 %v3544_v9, %v3382_v28 }
 0x429   : > { %v4235_v3 = vpop.f32.mrf.mxu0  ;;  %v4050_v44 = vpop.f32.mrf.mxu3 }
 0x42a   : > { %v3050_v35 = vpop.f32.mrf.mxu2 }
 0x42b   : > { %v3051_v7 = vadd.f32 %v3050_v35, %v7155_v51 }
 0x42c   : > { %4274 = vmatmul.bf16.gmra.mxu0 %v7797_v26  ;;  %v3693_v50 = vpop.f32.mrf.mxu1 }
 0x42d   : > { %v3383_v15 = vadd.f32 %v3349_v32, %v3051_v7  ;;  %v7283_v21 = vadd.f32 %v3693_v50, %v7158_v56 }
 0x42e   : > { %4092 = vmatmul.bf16.gmra.mxu3 %v7815_v5  ;;  %v7817_v5 = vld [vmem:[#allocation15_spill] sm:$0xff] }
 0x42f   : > { %3890 = vmatmul.bf16.gmra.mxu2 %v7814_v19  ;;  %v7286_v25 = vadd.f32 %v3546_v46, %v3383_v15 }
 0x431   : > { %v4237_v40 = vpop.f32.mrf.mxu0  ;;  %v4053_v32 = vpop.f32.mrf.mxu3 }
 0x432   : > { %v3851_v9 = vpop.f32.mrf.mxu2 }
 0x433   : > { %v3931_v6 = vadd.f32 %v3851_v9, %v7163_v41 }
 0x434   : > { %v3696_v28 = vpop.f32.mrf.mxu1 }
 0x435   : > { %v4128_v51 = vadd.f32 %v4048_v39, %v3931_v6  ;;  %v7291_v26 = vadd.f32 %v3696_v28, %v7166_v34  ;;  %v7816_v39 = vld [vmem:[#allocation25_spill] sm:$0xff] }
 0x437   : > { %4429 = vmatmul.bf16.vlgmr.msra.gmra.mxu1 %v6660_v8  ;;  %v7294_v56 = vadd.f32 %v4235_v3, %v4128_v51 }
 0x439   : > { %v4240_v50 = vpop.f32.mrf.mxu0  ;;  %v4055_v9 = vpop.f32.mrf.mxu3 }
 0x43a   : > { %v3853_v35 = vpop.f32.mrf.mxu2 }
 0x43b   : > { %v3932_v46 = vadd.f32 %v3853_v35, %v7171_v16 }
 0x43c   : > { %4279 = vmatmul.bf16.gmra.mxu0 %v7800_v14  ;;  %v3698_v7 = vpop.f32.mrf.mxu1 }
 0x43d   : > { %v4129_v15 = vadd.f32 %v4050_v44, %v3932_v46  ;;  %v7299_v41 = vadd.f32 %v3698_v7, %v7174_v45 }
 0x43e   : > { %4097 = vmatmul.bf16.gmra.mxu3 %v7817_v5 }
 0x43f   : > { %3895 = vmatmul.bf16.gmra.mxu2 %v7816_v39  ;;  %v7302_v34 = vadd.f32 %v4237_v40, %v4129_v15  ;;  %v7819_v15 = vld [vmem:[#allocation20_spill] sm:$0xff] }
 0x441   : > { %v4242_v28 = vpop.f32.mrf.mxu0  ;;  %v4058_v46 = vpop.f32.mrf.mxu3 }
 0x442   : > { %v3856_v8 = vpop.f32.mrf.mxu2 }
 0x443   : > { %v3933_v3 = vadd.f32 %v3856_v8, %v7179_v55 }
 0x444   : > { %v3701_v6 = vpop.f32.mrf.mxu1 }
 0x445   : > { %v4130_v16 = vadd.f32 %v4053_v32, %v3933_v3  ;;  %v7307_v14 = vadd.f32 %v3701_v6, %v7182_v42  ;;  %v7818_v32 = vld [vmem:[#allocation14_spill] sm:$0xff] }
 0x447   : > { %4434 = vmatmul.bf16.gmra.mxu1 %v7798_v60  ;;  %v7310_v45 = vadd.f32 %v4240_v50, %v4130_v16 }
 0x449   : > { %v4245_v7 = vpop.f32.mrf.mxu0  ;;  %v4060_v8 = vpop.f32.mrf.mxu3 }
 0x44a   : > { %v3858_v44 = vpop.f32.mrf.mxu2 }
 0x44b   : > { %v3934_v40 = vadd.f32 %v3858_v44, %v7187_v2  ;;  %v7820_v44 = vld [vmem:[#allocation18_spill] sm:$0xff] }
 0x44c   : > { %4284 = vmatmul.bf16.gmra.mxu0 %v7803_v54  ;;  %v3703_v51 = vpop.f32.mrf.mxu1 }
 0x44d   : > { %v4131_v35 = vadd.f32 %v4055_v9, %v3934_v40  ;;  %v7315_v55 = vadd.f32 %v3703_v51, %v7190_v22 }
 0x44e   : > { %4102 = vmatmul.bf16.gmra.mxu3 %v7819_v15 }
 0x44f   : > { %3900 = vmatmul.bf16.gmra.mxu2 %v7818_v32  ;;  %v7318_v42 = vadd.f32 %v4242_v28, %v4131_v35 }
 0x451   : > { %v4247_v3 = vpop.f32.mrf.mxu0 }
 0x452   : > { %v3861_v60 = vpop.f32.mrf.mxu2 }
 0x453   : > { %v3935_v50 = vadd.f32 %v3861_v60, %v7195_v13 }
 0x454   : > { %v3706_v5 = vpop.f32.mrf.mxu1 }
 0x455   : > { %v4132_v2 = vadd.f32 %v4058_v46, %v3935_v50  ;;  %v7323_v54 = vadd.f32 %v3706_v5, %v7198_v47 }
 0x457   : > { %4439 = vmatmul.bf16.gmra.mxu1 %v7801_v4  ;;  %v7326_v22 = vadd.f32 %v4245_v7, %v4132_v2  ;;  %v4063_v4 = vpop.f32.mrf.mxu3  ;;  %v7821_v2 = vld [vmem:[#allocation16_spill] sm:$0xff] }
 0x459   : > { %v4250_v35 = vpop.f32.mrf.mxu0 }
 0x45a   : > { %v3863_v9 = vpop.f32.mrf.mxu2 }
 0x45b   : > { %v3936_v6 = vadd.f32 %v3863_v9, %v7203_v29 }
 0x45c   : > { %4289 = vmatmul.bf16.gmra.mxu0 %v7806_v53  ;;  %v3708_v16 = vpop.f32.mrf.mxu1 }
 0x45d   : > { %v4133_v28 = vadd.f32 %v4060_v8, %v3936_v6  ;;  %v7331_v13 = vadd.f32 %v3708_v16, %v7206_v17 }
 0x45e   : > { %4107 = vmatmul.bf16.gmra.mxu3 %v6997_v61 }
 0x45f   : > { %3905 = vmatmul.bf16.gmra.mxu2 %v7820_v44  ;;  %v7334_v47 = vadd.f32 %v4247_v3, %v4133_v28  ;;  %v4065_v61 = vpop.f32.mrf.mxu3  ;;  %v7823_v3 = vld [vmem:[#allocation28_spill] sm:$0xff]  ;;  %v7827_v28 = vld [vmem:[#allocation22_spill] sm:$0xff] }
 0x461   : > { %v4252_v5 = vpop.f32.mrf.mxu0 }
 0x462   : > { %v3866_v40 = vpop.f32.mrf.mxu2 }
 0x463   : > { %v3937_v51 = vadd.f32 %v3866_v40, %v7211_v59 }
 0x464   : > { %v3711_v46 = vpop.f32.mrf.mxu1 }
 0x465   : > { %v4134_v29 = vadd.f32 %v4063_v4, %v3937_v51  ;;  %v7339_v53 = vadd.f32 %v3711_v46, %v7214_v57 }
 0x467   : > { %4444 = vmatmul.bf16.gmra.mxu1 %v7804_v63  ;;  %v7342_v17 = vadd.f32 %v4250_v35, %v4134_v29 }
 0x46a   : > { %v3868_v7 = vpop.f32.mrf.mxu2 }
 0x46b   : > { %v3938_v15 = vadd.f32 %v3868_v7, %v7219_v18  ;;  %v4068_v7 = vpop.f32.mrf.mxu3 }
 0x46c   : > { %4294 = vmatmul.bf16.gmra.mxu0 %v7809_v43  ;;  %v3713_v60 = vpop.f32.mrf.mxu1 }
 0x46d   : > { %v4135_v50 = vadd.f32 %v4065_v61, %v3938_v15  ;;  %v7347_v59 = vadd.f32 %v3713_v60, %v7222_v58  ;;  %v7822_v58 = vld [vmem:[#allocation23_spill] sm:$0xff] }
 0x46e   : > { %4112 = vmatmul.bf16.gmra.mxu3 %v7024_v24 }
 0x46f   : > { %3910 = vmatmul.bf16.gmra.mxu2 %v7821_v2  ;;  %v7350_v57 = vadd.f32 %v4252_v5, %v4135_v50 }
 0x472   : > { %v3871_v35 = vpop.f32.mrf.mxu2 }
 0x474   : > { %v3716_v63 = vpop.f32.mrf.mxu1 }
 0x475   : > { %v7354_v8 = vadd.f32 %v3716_v63, %v7230_v11  ;;  %v4070_v63 = vpop.f32.mrf.mxu3 }
 0x477   : > { %4449 = vmatmul.bf16.gmra.mxu1 %v7808_v49  ;;  %v7824_v49 = vld [vmem:[#allocation21_spill] sm:$0xff] }
 0x47a   : > { %v3873_v61 = vpop.f32.mrf.mxu2 }
 0x47c   : > { %4299 = vmatmul.bf16.gmra.mxu0 %v7811_v36  ;;  %v3718_v18 = vpop.f32.mrf.mxu1 }
 0x47d   : > { %v7359_v43 = vadd.f32 %v3718_v18, %v7238_v23  ;;  %v7825_v23 = vld [vmem:[#allocation45_spill] sm:$0xff] }
 0x47e   : > { %4117 = vmatmul.bf16.gmra.mxu3 %v7823_v3 }
 0x47f   : > { %3915 = vmatmul.bf16.gmra.mxu2 %v7822_v58 }
 0x484   : > { %v3721_v9 = vpop.f32.mrf.mxu1 }
 0x485   : > { %v7364_v6 = vadd.f32 %v3721_v9, %v7246_v27  ;;  %v7826_v27 = vmov 0.0|0.0   ;;  %v3876_v9 = vpop.f32.mrf.mxu2 }
 0x487   : > { %4454 = vmatmul.bf16.gmra.mxu1 %v7810_v52 }
 0x48c   : > { %4304 = vmatmul.bf16.gmra.mxu0 %v7813_v62  ;;  %v3723_v24 = vpop.f32.mrf.mxu1 }
 0x48d   : > { %v7369_v11 = vadd.f32 %v3723_v24, %v7254_v10 }
 0x48e   : > { %4122 = vmatmul.bf16.gmra.mxu3 %v7825_v23 }
 0x48f   : > { %3920 = vmatmul.bf16.gmra.mxu2 %v7824_v49 }
 0x494   : > { %v3726_v36 = vpop.f32.mrf.mxu1 }
 0x495   : > { %v7374_v16 = vadd.f32 %v3726_v36, %v7262_v48  ;;  %v4073_v36 = vpop.f32.mrf.mxu3 }
 0x497   : > { %4459 = vmatmul.bf16.gmra.mxu1 %v7812_v37  ;;  %v7393_v37 = vld [vmem:[%s7541_s4] ss:$0 sm:$0xff] }
 0x49c   : > { %4309 = vmatmul.bf16.gmra.mxu0 %v7826_v27  ;;  %v3728_v52 = vpop.f32.mrf.mxu1 }
 0x49d   : > { %v7379_v62 = vadd.f32 %v3728_v52, %v7270_v12 }
 0x49f   : > { %3925 = vmatmul.bf16.gmra.mxu2 %v7827_v28 }
 0x4a4   : > { %v3731_v10 = vpop.f32.mrf.mxu1 }
 0x4a5   : > { %v7383_v4 = vadd.f32 %v3731_v10, %v7278_v20  ;;  %v3878_v10 = vpop.f32.mrf.mxu2 }
 0x4a7   : > { %4464 = vmatmul.bf16.gmra.mxu1 %v7814_v19 }
 0x4ac   : > { %v3733_v40 = vpop.f32.mrf.mxu1 }
 0x4ad   : > { %v7387_v48 = vadd.f32 %v3733_v40, %v7286_v25 }
 0x4b4   : > { %v4430_v12 = vpop.f32.mrf.mxu1 }
 0x4b5   : > { %v4510_v51 = vadd.f32 %v4430_v12, %v7294_v56  ;;  %v4255_v56 = vpop.f32.mrf.mxu0 }
 0x4b7   : > { %v4546_v20 = vadd.f32 %v7393_v37, %v4510_v51  ;;  %4469 = vmatmul.bf16.gmra.mxu1 %v7816_v39  ;;  %v4075_v51 = vpop.f32.mrf.mxu3 }
 0x4b9   : > { %v4578_v19 = vmax.f32 %v4546_v20, 0.0 }
 0x4bb   : > { %4610 = vst [vmem:[%s7400_s11] sm:$0xff] %v4578_v19 }
 0x4bc   : > { %v4432_v25 = vpop.f32.mrf.mxu1 }
 0x4bd   : > { %v4511_v46 = vadd.f32 %v4432_v25, %v7302_v34  ;;  %v4257_v18 = vpop.f32.mrf.mxu0 }
 0x4bf   : > { %v4547_v29 = vadd.f32 %v7393_v37, %v4511_v46  ;;  %v3881_v46 = vpop.f32.mrf.mxu2 }
 0x4c1   : > { %v4579_v15 = vmax.f32 %v4547_v29, 0.0 }
 0x4c3   : > { %4611 = vst [vmem:[%s7400_s11 + $0x8] sm:$0xff] %v4579_v15  ;;  %v4078_v15 = vpop.f32.mrf.mxu3 }
 0x4c4   : > { %v4435_v39 = vpop.f32.mrf.mxu1 }
 0x4c5   : > { %v4512_v60 = vadd.f32 %v4435_v39, %v7310_v45  ;;  %v4260_v52 = vpop.f32.mrf.mxu0 }
 0x4c7   : > { %v4548_v50 = vadd.f32 %v7393_v37, %v4512_v60  ;;  %4474 = vmatmul.bf16.gmra.mxu1 %v7818_v32  ;;  %v3939_v60 = vadd.f32 %v3871_v35, %v7227_v30 }
 0x4c9   : > { %v4580_v5 = vmax.f32 %v4548_v50, 0.0  ;;  %v3883_v50 = vpop.f32.mrf.mxu2 }
 0x4cb   : > { %4612 = vst [vmem:[%s7400_s11 + $0x10] sm:$0xff] %v4580_v5 }
 0x4cc   : > { %v4437_v34 = vpop.f32.mrf.mxu1 }
 0x4cd   : > { %v4513_v3 = vadd.f32 %v4437_v34, %v7318_v42  ;;  %v4262_v19 = vpop.f32.mrf.mxu0 }
 0x4cf   : > { %v4549_v24 = vadd.f32 %v7393_v37, %v4513_v3  ;;  %v4136_v3 = vadd.f32 %v4068_v7, %v3939_v60  ;;  %v3941_v7 = vadd.f32 %v3876_v9, %v7243_v33  ;;  %v3942_v60 = vadd.f32 %v3878_v10, %v7251_v31 }
 0x4d1   : > { %v4581_v23 = vmax.f32 %v4549_v24, 0.0  ;;  %v3886_v30 = vpop.f32.mrf.mxu2  ;;  %v4139_v33 = vadd.f32 %v4075_v51, %v3942_v60 }
 0x4d3   : > { %4613 = vst [vmem:[%s7400_s11 + $0x18] sm:$0xff] %v4581_v23  ;;  %v4080_v23 = vpop.f32.mrf.mxu3 }
 0x4d4   : > { %v4440_v45 = vpop.f32.mrf.mxu1 }
 0x4d5   : > { %v4514_v27 = vadd.f32 %v4440_v45, %v7326_v22  ;;  %v7828_v45 = vld [vmem:[#allocation27_spill] sm:$0xff] }
 0x4d7   : > { %v4550_v32 = vadd.f32 %v7393_v37, %v4514_v27  ;;  %4479 = vmatmul.bf16.gmra.mxu1 %v7820_v44  ;;  %v3940_v27 = vadd.f32 %v3873_v61, %v7828_v45  ;;  %v4326_v45 = vadd.f32 %v4262_v19, %v4139_v33 }
 0x4d9   : > { %v4582_v40 = vmax.f32 %v4550_v32, 0.0  ;;  %v4137_v35 = vadd.f32 %v4070_v63, %v3940_v27 }
 0x4db   : > { %4614 = vst [vmem:[%s7400_s11 + $0x20] sm:$0xff] %v4582_v40 }
 0x4dc   : > { %v4442_v12 = vpop.f32.mrf.mxu1 }
 0x4dd   : > { %v4515_v42 = vadd.f32 %v4442_v12, %v7334_v47  ;;  %v4265_v47 = vpop.f32.mrf.mxu0 }
 0x4df   : > { %v4551_v20 = vadd.f32 %v7393_v37, %v4515_v42 }
 0x4e1   : > { %v4583_v25 = vmax.f32 %v4551_v20, 0.0  ;;  %v4324_v20 = vadd.f32 %v4257_v18, %v4137_v35 }
 0x4e3   : > { %4615 = vst [vmem:[%s7400_s11 + $0x28] sm:$0xff] %v4583_v25  ;;  %v4083_v25 = vpop.f32.mrf.mxu3 }
 0x4e4   : > { %v4445_v22 = vpop.f32.mrf.mxu1 }
 0x4e5   : > { %v4516_v29 = vadd.f32 %v4445_v22, %v7342_v17  ;;  %v4267_v40 = vpop.f32.mrf.mxu0 }
 0x4e7   : > { %v4552_v44 = vadd.f32 %v7393_v37, %v4516_v29  ;;  %4484 = vmatmul.bf16.gmra.mxu1 %v7821_v2  ;;  %v4323_v2 = vadd.f32 %v4255_v56, %v4136_v3  ;;  %v4138_v29 = vadd.f32 %v4073_v36, %v3941_v7 }
 0x4e9   : > { %v4584_v39 = vmax.f32 %v4552_v44, 0.0 }
 0x4eb   : > { %4616 = vst [vmem:[%s7400_s11 + $0x30] sm:$0xff] %v4584_v39  ;;  %v3888_v39 = vpop.f32.mrf.mxu2  ;;  %v4085_v3 = vpop.f32.mrf.mxu3 }
 0x4ec   : > { %v4447_v5 = vpop.f32.mrf.mxu1 }
 0x4ed   : > { %v4517_v34 = vadd.f32 %v4447_v5, %v7350_v57  ;;  %v4270_v56 = vpop.f32.mrf.mxu0  ;;  %v4325_v5 = vadd.f32 %v4260_v52, %v4138_v29 }
 0x4ef   : > { %v4553_v24 = vadd.f32 %v7393_v37, %v4517_v34 }
 0x4f1   : > { %v4585_v17 = vmax.f32 %v4553_v24, 0.0 }
 0x4f3   : > { %4617 = vst [vmem:[%s7400_s11 + $0x38] sm:$0xff] %v4585_v17  ;;  %v3891_v24 = vpop.f32.mrf.mxu2  ;;  %v3943_v17 = vadd.f32 %v3881_v46, %v7259_v38 }
 0x4f4   : > { %v4450_v32 = vpop.f32.mrf.mxu1  ;;  %v3947_v33 = vadd.f32 %v3891_v24, %v7291_v26 }
 0x4f5   : > { %v4518_v12 = vadd.f32 %v4450_v32, %v4323_v2  ;;  %v4272_v9 = vpop.f32.mrf.mxu0  ;;  %v4140_v10 = vadd.f32 %v4078_v15, %v3943_v17  ;;  %v4088_v2 = vpop.f32.mrf.mxu3  ;;  %v3944_v32 = vadd.f32 %v3883_v50, %v7267_v0  ;;  %v3945_v15 = vadd.f32 %v3886_v30, %v7275_v1  ;;  %v7829_v30 = vld [vmem:[#allocation42_spill] sm:$0xff] }
 0x4f7   : > { %v4554_v42 = vadd.f32 %v7393_v37, %v4518_v12  ;;  %4489 = vmatmul.bf16.gmra.mxu1 %v7822_v58  ;;  %v4141_v7 = vadd.f32 %v4080_v23, %v3944_v32 }
 0x4f9   : > { %v4586_v57 = vmax.f32 %v4554_v42, 0.0 }
 0x4fb   : > { %4618 = vst [vmem:[%s7400_s11 + $0x40] sm:$0xff] %v4586_v57  ;;  %v3893_v35 = vpop.f32.mrf.mxu2 }
 0x4fc   : > { %v4452_v22 = vpop.f32.mrf.mxu1 }
 0x4fd   : > { %v4519_v61 = vadd.f32 %v4452_v22, %v4324_v20  ;;  %v4275_v12 = vpop.f32.mrf.mxu0  ;;  %v4090_v46 = vpop.f32.mrf.mxu3  ;;  %v4328_v20 = vadd.f32 %v4267_v40, %v4141_v7 }
 0x4ff   : > { %v4555_v44 = vadd.f32 %v7393_v37, %v4519_v61 }
 0x501   : > { %v4587_v63 = vmax.f32 %v4555_v44, 0.0  ;;  %v3946_v44 = vadd.f32 %v3888_v39, %v7283_v21 }
 0x503   : > { %4619 = vst [vmem:[%s7400_s11 + $0x48] sm:$0xff] %v4587_v63  ;;  %v3896_v61 = vpop.f32.mrf.mxu2 }
 0x504   : > { %v4455_v58 = vpop.f32.mrf.mxu1 }
 0x505   : > { %v4520_v34 = vadd.f32 %v4455_v58, %v4325_v5  ;;  %v4277_v0 = vpop.f32.mrf.mxu0  ;;  %v4143_v58 = vadd.f32 %v4085_v3, %v3946_v44 }
 0x507   : > { %v4556_v18 = vadd.f32 %v7393_v37, %v4520_v34  ;;  %4494 = vmatmul.bf16.gmra.mxu1 %v7824_v49  ;;  %v4327_v49 = vadd.f32 %v4265_v47, %v4140_v10  ;;  %v4142_v47 = vadd.f32 %v4083_v25, %v3945_v15 }
 0x509   : > { %v4588_v36 = vmax.f32 %v4556_v18, 0.0  ;;  %v4329_v63 = vadd.f32 %v4270_v56, %v4142_v47  ;;  %v4330_v18 = vadd.f32 %v4272_v9, %v4143_v58  ;;  %v4144_v56 = vadd.f32 %v4088_v2, %v3947_v33 }
 0x50a   : > { %v3949_v2 = vadd.f32 %v3896_v61, %v7307_v14 }
 0x50b   : > { %4620 = vst [vmem:[%s7400_s11 + $0x50] sm:$0xff] %v4588_v36  ;;  %v3898_v34 = vpop.f32.mrf.mxu2  ;;  %v4331_v10 = vadd.f32 %v4275_v12, %v4144_v56 }
 0x50c   : > { %v4457_v27 = vpop.f32.mrf.mxu1 }
 0x50d   : > { %v4521_v31 = vadd.f32 %v4457_v27, %v4326_v45  ;;  %v4280_v1 = vpop.f32.mrf.mxu0 }
 0x50f   : > { %v4557_v52 = vadd.f32 %v7393_v37, %v4521_v31  ;;  %v3948_v31 = vadd.f32 %v3893_v35, %v7299_v41 }
 0x511   : > { %v4589_v51 = vmax.f32 %v4557_v52, 0.0  ;;  %v4145_v32 = vadd.f32 %v4090_v46, %v3948_v31  ;;  %v3950_v46 = vadd.f32 %v3898_v34, %v7315_v55 }
 0x513   : > { %4621 = vst [vmem:[%s7400_s11 + $0x58] sm:$0xff] %v4589_v51  ;;  %v3901_v27 = vpop.f32.mrf.mxu2 }
 0x514   : > { %v4460_v42 = vpop.f32.mrf.mxu1 }
 0x515   : > { %v4522_v57 = vadd.f32 %v4460_v42, %v4327_v49  ;;  %v4282_v3 = vpop.f32.mrf.mxu0  ;;  %v4332_v42 = vadd.f32 %v4277_v0, %v4145_v32 }
 0x517   : > { %v4558_v38 = vadd.f32 %v7393_v37, %v4522_v57  ;;  %4499 = vmatmul.bf16.gmra.mxu1 %v7827_v28  ;;  %v4093_v28 = vpop.f32.mrf.mxu3 }
 0x518   : > { %v4146_v41 = vadd.f32 %v4093_v28, %v3949_v2 }
 0x519   : > { %v4590_v19 = vmax.f32 %v4558_v38, 0.0 }
 0x51a   : > { %v4333_v15 = vadd.f32 %v4280_v1, %v4146_v41 }
 0x51b   : > { %4622 = vst [vmem:[%s7400_s11 + $0x60] sm:$0xff] %v4590_v19  ;;  %v3903_v57 = vpop.f32.mrf.mxu2 }
 0x51c   : > { %v4462_v22 = vpop.f32.mrf.mxu1 }
 0x51d   : > { %v4523_v50 = vadd.f32 %v4462_v22, %v4328_v20  ;;  %v4285_v49 = vpop.f32.mrf.mxu0 }
 0x51f   : > { %v4559_v29 = vadd.f32 %v7393_v37, %v4523_v50  ;;  %v4095_v39 = vpop.f32.mrf.mxu3 }
 0x520   : > { %v4147_v61 = vadd.f32 %v4095_v39, %v3950_v46 }
 0x521   : > { %v4591_v23 = vmax.f32 %v4559_v29, 0.0  ;;  %v3951_v29 = vadd.f32 %v3901_v27, %v7323_v54 }
 0x523   : > { %4623 = vst [vmem:[%s7400_s11 + $0x68] sm:$0xff] %v4591_v23  ;;  %v3906_v14 = vpop.f32.mrf.mxu2  ;;  %v4334_v23 = vadd.f32 %v4282_v3, %v4147_v61 }
 0x524   : > { %v4465_v60 = vpop.f32.mrf.mxu1  ;;  %v3953_v56 = vadd.f32 %v3906_v14, %v7339_v53 }
 0x525   : > { %v4524_v5 = vadd.f32 %v4465_v60, %v4329_v63  ;;  %v4287_v22 = vpop.f32.mrf.mxu0 }
 0x527   : > { %v4560_v40 = vadd.f32 %v7393_v37, %v4524_v5  ;;  %4504 = vmatmul.bf16.gmra.mxu1 %v7829_v30  ;;  %v4098_v9 = vpop.f32.mrf.mxu3 }
 0x528   : > { %v4148_v60 = vadd.f32 %v4098_v9, %v3951_v29 }
 0x529   : > { %v4592_v25 = vmax.f32 %v4560_v40, 0.0  ;;  %v3952_v40 = vadd.f32 %v3903_v57, %v7331_v13 }
 0x52a   : > { %v4335_v30 = vadd.f32 %v4285_v49, %v4148_v60 }
 0x52b   : > { %4624 = vst [vmem:[%s7400_s11 + $0x70] sm:$0xff] %v4592_v25  ;;  %v3908_v58 = vpop.f32.mrf.mxu2 }
 0x52c   : > { %v4467_v36 = vpop.f32.mrf.mxu1 }
 0x52d   : > { %v4525_v21 = vadd.f32 %v4467_v36, %v4330_v18  ;;  %v4290_v55 = vpop.f32.mrf.mxu0 }
 0x52f   : > { %v4561_v17 = vadd.f32 %v7393_v37, %v4525_v21  ;;  %v4100_v19 = vpop.f32.mrf.mxu3 }
 0x530   : > { %v4149_v54 = vadd.f32 %v4100_v19, %v3952_v40 }
 0x531   : > { %v4593_v45 = vmax.f32 %v4561_v17, 0.0 }
 0x532   : > { %v4336_v17 = vadd.f32 %v4287_v22, %v4149_v54 }
 0x533   : > { %4625 = vst [vmem:[%s7400_s11 + $0x78] sm:$0xff] %v4593_v45  ;;  %v3911_v39 = vpop.f32.mrf.mxu2 }
 0x534   : > { %v4470_v52 = vpop.f32.mrf.mxu1  ;;  %v3955_v57 = vadd.f32 %v3911_v39, %v7354_v8 }
 0x535   : > { %v4526_v51 = vadd.f32 %v4470_v52, %v4331_v10  ;;  %v4292_v36 = vpop.f32.mrf.mxu0  ;;  %v3954_v52 = vadd.f32 %v3908_v58, %v7347_v59 }
 0x537   : > { %v4562_v26 = vadd.f32 %v7393_v37, %v4526_v51  ;;  %v4103_v44 = vpop.f32.mrf.mxu3 }
 0x538   : > { %v4150_v27 = vadd.f32 %v4103_v44, %v3953_v56 }
 0x539   : > { %v4594_v24 = vmax.f32 %v4562_v26, 0.0 }
 0x53a   : > { %v4337_v32 = vadd.f32 %v4290_v55, %v4150_v27 }
 0x53b   : > { %4626 = vst [vmem:[%s7400_s11 + $0x80] sm:$0xff] %v4594_v24  ;;  %v3913_v26 = vpop.f32.mrf.mxu2 }
 0x53c   : > { %v4472_v7 = vpop.f32.mrf.mxu1 }
 0x53d   : > { %v4527_v38 = vadd.f32 %v4472_v7, %v4332_v42  ;;  %v4295_v51 = vpop.f32.mrf.mxu0 }
 0x53f   : > { %v4563_v12 = vadd.f32 %v7393_v37, %v4527_v38  ;;  %v4105_v33 = vpop.f32.mrf.mxu3 }
 0x540   : > { %v4151_v53 = vadd.f32 %v4105_v33, %v3954_v52 }
 0x541   : > { %v4595_v35 = vmax.f32 %v4563_v12, 0.0 }
 0x542   : > { %v4338_v7 = vadd.f32 %v4292_v36, %v4151_v53 }
 0x543   : > { %4627 = vst [vmem:[%s7400_s11 + $0x88] sm:$0xff] %v4595_v35  ;;  %v3916_v59 = vpop.f32.mrf.mxu2 }
 0x544   : > { %v4475_v20 = vpop.f32.mrf.mxu1 }
 0x545   : > { %v4528_v50 = vadd.f32 %v4475_v20, %v4333_v15  ;;  %v4297_v41 = vpop.f32.mrf.mxu0  ;;  %v3956_v15 = vadd.f32 %v3913_v26, %v7359_v43 }
 0x547   : > { %v4564_v0 = vadd.f32 %v7393_v37, %v4528_v50  ;;  %v4108_v31 = vpop.f32.mrf.mxu3 }
 0x548   : > { %v4152_v35 = vadd.f32 %v4108_v31, %v3955_v57 }
 0x549   : > { %v4596_v47 = vmax.f32 %v4564_v0, 0.0 }
 0x54a   : > { %v4339_v20 = vadd.f32 %v4295_v51, %v4152_v35 }
 0x54b   : > { %4628 = vst [vmem:[%s7400_s11 + $0x90] sm:$0xff] %v4596_v47  ;;  %v3918_v47 = vpop.f32.mrf.mxu2 }
 0x54c   : > { %v4477_v63 = vpop.f32.mrf.mxu1  ;;  %v3958_v40 = vadd.f32 %v3918_v47, %v7369_v11 }
 0x54d   : > { %v4529_v28 = vadd.f32 %v4477_v63, %v4334_v23  ;;  %v4300_v8 = vpop.f32.mrf.mxu0  ;;  %v3957_v23 = vadd.f32 %v3916_v59, %v7364_v6 }
 0x54f   : > { %v4565_v5 = vadd.f32 %v7393_v37, %v4529_v28  ;;  %v4110_v42 = vpop.f32.mrf.mxu3 }
 0x550   : > { %v4153_v61 = vadd.f32 %v4110_v42, %v3956_v15 }
 0x551   : > { %v4597_v1 = vmax.f32 %v4565_v5, 0.0 }
 0x552   : > { %v4340_v44 = vadd.f32 %v4297_v41, %v4153_v61 }
 0x553   : > { %4629 = vst [vmem:[%s7400_s11 + $0x98] sm:$0xff] %v4597_v1  ;;  %v3921_v1 = vpop.f32.mrf.mxu2 }
 0x554   : > { %v4480_v34 = vpop.f32.mrf.mxu1 }
 0x555   : > { %v4530_v25 = vadd.f32 %v4480_v34, %v4335_v30  ;;  %v4302_v5 = vpop.f32.mrf.mxu0 }
 0x557   : > { %v4566_v18 = vadd.f32 %v7393_v37, %v4530_v25  ;;  %v4113_v22 = vpop.f32.mrf.mxu3 }
 0x558   : > { %v4154_v43 = vadd.f32 %v4113_v22, %v3957_v23 }
 0x559   : > { %v4598_v21 = vmax.f32 %v4566_v18, 0.0 }
 0x55a   : > { %v4341_v30 = vadd.f32 %v4300_v8, %v4154_v43 }
 0x55b   : > { %4630 = vst [vmem:[%s7400_s11 + $0xa0] sm:$0xff] %v4598_v21  ;;  %v3959_v21 = vadd.f32 %v3921_v1, %v7374_v16  ;;  %v3923_v56 = vpop.f32.mrf.mxu2 }
 0x55c   : > { %v4482_v3 = vpop.f32.mrf.mxu1  ;;  %v3960_v31 = vadd.f32 %v3923_v56, %v7379_v62 }
 0x55d   : > { %v4531_v45 = vadd.f32 %v4482_v3, %v4336_v17  ;;  %v4305_v36 = vpop.f32.mrf.mxu0 }
 0x55f   : > { %v4567_v13 = vadd.f32 %v7393_v37, %v4531_v45  ;;  %v4115_v60 = vpop.f32.mrf.mxu3 }
 0x560   : > { %v4155_v33 = vadd.f32 %v4115_v60, %v3958_v40 }
 0x561   : > { %v4599_v10 = vmax.f32 %v4567_v13, 0.0 }
 0x562   : > { %v4342_v39 = vadd.f32 %v4302_v5, %v4155_v33 }
 0x563   : > { %4631 = vst [vmem:[%s7400_s11 + $0xa8] sm:$0xff] %v4599_v10  ;;  %v3926_v26 = vpop.f32.mrf.mxu2 }
 0x564   : > { %v4485_v9 = vpop.f32.mrf.mxu1 }
 0x565   : > { %v4532_v24 = vadd.f32 %v4485_v9, %v4337_v32  ;;  %v4307_v32 = vpop.f32.mrf.mxu0 }
 0x567   : > { %v4568_v2 = vadd.f32 %v7393_v37, %v4532_v24  ;;  %v4118_v54 = vpop.f32.mrf.mxu3 }
 0x568   : > { %v4156_v45 = vadd.f32 %v4118_v54, %v3959_v21 }
 0x569   : > { %v4600_v49 = vmax.f32 %v4568_v2, 0.0  ;;  %v3961_v2 = vadd.f32 %v3926_v26, %v7383_v4 }
 0x56a   : > { %v4343_v10 = vadd.f32 %v4305_v36, %v4156_v45 }
 0x56b   : > { %4632 = vst [vmem:[%s7400_s11 + $0xb0] sm:$0xff] %v4600_v49  ;;  %v3928_v41 = vpop.f32.mrf.mxu2 }
 0x56c   : > { %v4487_v38 = vpop.f32.mrf.mxu1  ;;  %v3962_v35 = vadd.f32 %v3928_v41, %v7387_v48 }
 0x56d   : > { %v4533_v12 = vadd.f32 %v4487_v38, %v4338_v7  ;;  %v4310_v62 = vpop.f32.mrf.mxu0 }
 0x56f   : > { %v4569_v19 = vadd.f32 %v7393_v37, %v4533_v12  ;;  %v4120_v13 = vpop.f32.mrf.mxu3 }
 0x570   : > { %v4157_v16 = vadd.f32 %v4120_v13, %v3960_v31 }
 0x571   : > { %v4601_v46 = vmax.f32 %v4569_v19, 0.0 }
 0x572   : > { %v4344_v49 = vadd.f32 %v4307_v32, %v4157_v16 }
 0x573   : > { %4633 = vst [vmem:[%s7400_s11 + $0xb8] sm:$0xff] %v4601_v46 }
 0x574   : > { %v4490_v50 = vpop.f32.mrf.mxu1 }
 0x575   : > { %v4534_v14 = vadd.f32 %v4490_v50, %v4339_v20  ;;  %v4312_v22 = vpop.f32.mrf.mxu0 }
 0x577   : > { %v4570_v0 = vadd.f32 %v7393_v37, %v4534_v14  ;;  %v4123_v53 = vpop.f32.mrf.mxu3 }
 0x578   : > { %v4158_v7 = vadd.f32 %v4123_v53, %v3961_v2 }
 0x579   : > { %v4602_v29 = vmax.f32 %v4570_v0, 0.0 }
 0x57a   : > { %v4345_v59 = vadd.f32 %v4310_v62, %v4158_v7 }
 0x57b   : > { %4634 = vst [vmem:[%s7400_s11 + $0xc0] sm:$0xff] %v4602_v29 }
 0x57c   : > { %v4492_v63 = vpop.f32.mrf.mxu1 }
 0x57d   : > { %v4535_v28 = vadd.f32 %v4492_v63, %v4340_v44 }
 0x57f   : > { %v4571_v55 = vadd.f32 %v7393_v37, %v4535_v28  ;;  %v4125_v19 = vpop.f32.mrf.mxu3 }
 0x580   : > { %v4159_v15 = vadd.f32 %v4125_v19, %v3962_v35 }
 0x581   : > { %v4603_v58 = vmax.f32 %v4571_v55, 0.0 }
 0x582   : > { %v4346_v14 = vadd.f32 %v4312_v22, %v4159_v15 }
 0x583   : > { %4635 = vst [vmem:[%s7400_s11 + $0xc8] sm:$0xff] %v4603_v58 }
 0x584   : > { %v4495_v34 = vpop.f32.mrf.mxu1 }
 0x585   : > { %v4536_v25 = vadd.f32 %v4495_v34, %v4341_v30 }
 0x587   : > { %v4572_v6 = vadd.f32 %v7393_v37, %v4536_v25 }
 0x589   : > { %v4604_v18 = vmax.f32 %v4572_v6, 0.0 }
 0x58b   : > { %4636 = vst [vmem:[%s7400_s11 + $0xd0] sm:$0xff] %v4604_v18 }
 0x58c   : > { %v4497_v17 = vpop.f32.mrf.mxu1 }
 0x58d   : > { %v4537_v3 = vadd.f32 %v4497_v17, %v4342_v39 }
 0x58f   : > { %v4573_v11 = vadd.f32 %v7393_v37, %v4537_v3 }
 0x591   : > { %v4605_v27 = vmax.f32 %v4573_v11, 0.0 }
 0x593   : > { %4637 = vst [vmem:[%s7400_s11 + $0xd8] sm:$0xff] %v4605_v27 }
 0x594   : > { %v4500_v52 = vpop.f32.mrf.mxu1 }
 0x595   : > { %v4538_v51 = vadd.f32 %v4500_v52, %v4343_v10 }
 0x597   : > { %v4574_v9 = vadd.f32 %v7393_v37, %v4538_v51 }
 0x599   : > { %v4606_v24 = vmax.f32 %v4574_v9, 0.0 }
 0x59b   : > { %4638 = vst [vmem:[%s7400_s11 + $0xe0] sm:$0xff] %v4606_v24 }
 0x59c   : > { %v4502_v42 = vpop.f32.mrf.mxu1 }
 0x59d   : > { %v4539_v57 = vadd.f32 %v4502_v42, %v4344_v49 }
 0x59f   : > { %v4575_v38 = vadd.f32 %v7393_v37, %v4539_v57 }
 0x5a1   : > { %v4607_v12 = vmax.f32 %v4575_v38, 0.0 }
 0x5a3   : > { %4639 = vst [vmem:[%s7400_s11 + $0xe8] sm:$0xff] %v4607_v12 }
 0x5a4   : > { %v4505_v46 = vpop.f32.mrf.mxu1 }
 0x5a5   : > { %v4540_v4 = vadd.f32 %v4505_v46, %v4345_v59 }
 0x5a7   : > { %v4576_v20 = vadd.f32 %v7393_v37, %v4540_v4 }
 0x5a9   : > { %v4608_v50 = vmax.f32 %v4576_v20, 0.0 }
 0x5ab   : > { %4640 = vst [vmem:[%s7400_s11 + $0xf0] sm:$0xff] %v4608_v50 }
 0x5ac   : > { %v4507_v48 = vpop.f32.mrf.mxu1 }
 0x5ad   : > { %v4541_v61 = vadd.f32 %v4507_v48, %v4346_v14 }
 0x5af   : > { %v4577_v8 = vadd.f32 %v7393_v37, %v4541_v61 }
 0x5b1   : > { %v4609_v0 = vmax.f32 %v4577_v8, 0.0 }
 0x5b3   : > { %4641 = vst [vmem:[%s7400_s11 + $0xf8] sm:$0xff] %v4609_v0 }
 0x5b4   : > { %5510 = shalt.err (!%p5507_p8)
}
 0x5b5   : > { %s5556_s7 = smov 128   ;;  %s5557_s10 = smov 8  }
 0x5b6   : > { %5373 = dma.vmem_to_hbm [thread:$0]  (%p5626_p5), %s4656_s17, 4096, %s4658_s23, %s4643_s22, %s5556_s7, %s5556_s7, %s5557_s10  }
 0x5b7 PF: > { %p5385_p9 = scmp.ge.s32.totalorder %s5549_s21, 2  ;;  %s4672_s11 = sand.u32 1, %s5537_s18  }
 0x5b8   : > { %s4673_s12 = scalar_lea.sflag [#allocation5], %s4672_s11 }
 0x5b9   : > { %p5380_p10 = pnand %p5385_p9, %p5630_p6 }
 0x5bb   : > { %p5381_p11 = pneg %p5380_p10 }
 0x5bd   : > { %5532 = dma.done.wait (%p5381_p11), %s4673_s12, 4096  }
 0x5be   : > { %5534 = vsyncadd (%p5381_p11), %s4673_s12, 4294963200  ;;  %p16_p12 = scmp.ge.s32.totalorder %s5613_s24, 4   ;;  %s7830_s18 = smov %s5541_s19 }
 0x5bf   : > { %s7831_s19 = smov %s5545_s20  ;;  %s7832_s20 = smov %s5624_s27 }
 0x5c0   : > { %s7833_s21 = smov %s5613_s24  ;;  %18 = sbr.rel (!%p16_p12) target bundleno = 4 (0x4), region = 97 }
 0x5c5   :  { %4679 = vsyncpa [#allocation4], 1 }
 0x5c6   :  { %4681 = vsyncpa [#allocation4 + $0x1], 1 }
 0x5c7   :  { %4682 = vsyncpa [#allocation5], 1 }
 0x5c8   :  { %4684 = vsyncpa [#allocation5 + $0x1], 1 }

</bundles_post_ra>
